<compile_context>
chip_gen: v7x
topology: tpu7x:2x2x1
jax: 0.10.0
libtpu: 0.0.40
codegen_flags: <defaults>
</compile_context>

<pallas_src>
import jax
import jax.numpy as jnp
from jax.experimental import pallas as pl
from jax.experimental.pallas import tpu as pltpu

# ----------------------------- model config ---------------------------------
IMAGE_SIZE = 16
PATCH_SIZE = 4
CHANNELS = 3
DIM = 32
DEPTH = 2
HEADS = 4
DIM_HEAD = 8
MLP_DIM = 64
CONV1_OUT = 64

NUM_PATCHES = (IMAGE_SIZE // PATCH_SIZE) ** 2          # 16
PATCH_DIM = CHANNELS * PATCH_SIZE * PATCH_SIZE         # 48
INNER_DIM = HEADS * DIM_HEAD                           # 32
N_TOKENS = NUM_PATCHES + 1                             # 17 (cls + patches)
NP_PAD = 24                                            # token axis padded to 8-multiple
LN_EPS = 1e-5
ATTN_SCALE = DIM_HEAD ** (-0.5)
NEG_INF = -1e30

_PARALLEL = pltpu.CompilerParams(dimension_semantics=("parallel",))


# ----------------------------- in-kernel helpers ------------------------------
def _erf_approx(x):
    # Abramowitz & Stegun 7.1.26, |abs err| <= 1.5e-7: matches torch exact-GELU in f32.
    a1, a2, a3, a4, a5 = 0.254829592, -0.284496736, 1.421413741, -1.453152027, 1.061405429
    p = 0.3275911
    s = jnp.where(x >= 0.0, 1.0, -1.0)
    ax = jnp.abs(x)
    t = 1.0 / (1.0 + p * ax)
    poly = ((((a5 * t + a4) * t + a3) * t + a2) * t + a1) * t
    return s * (1.0 - poly * jnp.exp(-ax * ax))


def _gelu(x):
    return 0.5 * x * (1.0 + _erf_approx(x * 0.7071067811865476))


def _layernorm(x, g, b):
    # torch nn.LayerNorm (biased variance), g/b shaped (1, D)
    mean = jnp.mean(x, axis=-1, keepdims=True)
    xc = x - mean
    var = jnp.mean(xc * xc, axis=-1, keepdims=True)
    return xc * jax.lax.rsqrt(var + LN_EPS) * g + b


# ----------------------------- Pallas kernels --------------------------------
def _conv3x3_kernel(xp_ref, w_ref, b_ref, o_ref):
    # xp_ref: (1, H+2, W+2, Cin) zero-padded input tile (one batch element)
    # w_ref : (9, Cin, Cout) tap-major weights; b_ref: (1, Cout)
    # o_ref : (1, H*W, Cout)
    Hp, Wp, cin = xp_ref.shape[1], xp_ref.shape[2], xp_ref.shape[3]
    H, W = Hp - 2, Wp - 2
    cout = w_ref.shape[2]
    xp = xp_ref[0]                                     # (H+2, W+2, Cin)
    acc = jnp.zeros((H * W, cout), jnp.float32)
    tap = 0
    for dy in range(3):
        for dx in range(3):
            xs = xp[dy:dy + H, dx:dx + W, :].reshape(H * W, cin)
            acc = acc + jnp.dot(xs, w_ref[tap], preferred_element_type=jnp.float32)
            tap += 1
    o_ref[0] = (acc + b_ref[...]).astype(o_ref.dtype)


def _embed_kernel(tok_ref, w_ref, b_ref, cls_ref, pos0_ref, posp_ref, o_ref):
    # tok_ref: (1, NUM_PATCHES, PATCH_DIM); output (1, NP_PAD, DIM)
    # Fuses: patch-embedding linear + cls-token prepend + positional-embedding add
    # + zero padding of the extra (alignment) token rows.
    emb = jnp.dot(tok_ref[0], w_ref[...], preferred_element_type=jnp.float32)
    emb = emb + b_ref[...] + posp_ref[...]             # (NUM_PATCHES, DIM)
    row0 = cls_ref[...] + pos0_ref[...]                # (1, DIM)
    o_ref[0, 0:1, :] = row0.astype(o_ref.dtype)
    o_ref[0, 1:N_TOKENS, :] = emb.astype(o_ref.dtype)
    o_ref[0, N_TOKENS:NP_PAD, :] = jnp.zeros((NP_PAD - N_TOKENS, DIM), o_ref.dtype)


def _attn_block_kernel(x_ref, g_ref, bln_ref, wq_ref, wk_ref, wv_ref, wo_ref, bo_ref, o_ref):
    # Fused: LN1 -> per-head QKV -> masked softmax attention -> out proj -> residual.
    # x_ref: (1, NP_PAD, DIM); wq/wk/wv: (HEADS, DIM, DIM_HEAD); wo: (HEADS, DIM_HEAD, DIM)
    x = x_ref[0]                                       # (NP_PAD, DIM)
    h = _layernorm(x, g_ref[...], bln_ref[...])
    # mask padded key positions (tokens >= N_TOKENS) so real tokens are unaffected
    key_id = jax.lax.broadcasted_iota(jnp.int32, (NP_PAD, NP_PAD), 1)
    bias = jnp.where(key_id < N_TOKENS, 0.0, NEG_INF).astype(jnp.float32)

    acc = jnp.zeros((NP_PAD, DIM), jnp.float32)
    for hh in range(HEADS):
        q = jnp.dot(h, wq_ref[hh], preferred_element_type=jnp.float32)   # (NP, Dh)
        k = jnp.dot(h, wk_ref[hh], preferred_element_type=jnp.float32)
        v = jnp.dot(h, wv_ref[hh], preferred_element_type=jnp.float32)
        s = jax.lax.dot_general(q, k, (((1,), (1,)), ((), ())),
                                preferred_element_type=jnp.float32)
        s = s * ATTN_SCALE + bias
        s = s - jnp.max(s, axis=-1, keepdims=True)
        p = jnp.exp(s)
        p = p * pl.reciprocal(jnp.sum(p, axis=-1, keepdims=True), approx=True)
        o_h = jnp.dot(p, v, preferred_element_type=jnp.float32)          # (NP, Dh)
        acc = acc + jnp.dot(o_h, wo_ref[hh], preferred_element_type=jnp.float32)
    o_ref[0] = (x + acc + bo_ref[...]).astype(o_ref.dtype)


def _ff_block_kernel(x_ref, g_ref, bln_ref, w1_ref, b1_ref, w2_ref, b2_ref, o_ref):
    # Fused: LN2 -> Linear + GELU -> Linear -> residual.
    x = x_ref[0]                                       # (NP_PAD, DIM)
    h = _layernorm(x, g_ref[...], bln_ref[...])
    h1 = jnp.dot(h, w1_ref[...], preferred_element_type=jnp.float32) + b1_ref[...]
    h1 = _gelu(h1)
    h2 = jnp.dot(h1, w2_ref[...], preferred_element_type=jnp.float32) + b2_ref[...]
    o_ref[0] = (x + h2).astype(o_ref.dtype)


# ----------------------------- kernel wrappers --------------------------------
def conv3x3(x_nhwc, w3, bias):
    # x_nhwc: (B, H, W, Cin); w3: (9, Cin, Cout) (tap order ky, kx); bias: (Cout,)
    B, H, W, cin = x_nhwc.shape
    cout = w3.shape[-1]
    xp = jnp.pad(x_nhwc, ((0, 0), (1, 1), (1, 1), (0, 0)))
    out = pl.pallas_call(
        _conv3x3_kernel,
        grid=(B,),
        out_shape=jax.ShapeDtypeStruct((B, H * W, cout), x_nhwc.dtype),
        in_specs=[
            pl.BlockSpec((1, H + 2, W + 2, cin), lambda n: (n, 0, 0, 0)),
            pl.BlockSpec((9, cin, cout), lambda n: (0, 0, 0)),
            pl.BlockSpec((1, cout), lambda n: (0, 0)),
        ],
        out_specs=pl.BlockSpec((1, H * W, cout), lambda n: (n, 0, 0)),
        compiler_params=_PARALLEL,
    )(xp, w3, bias.reshape(1, cout))
    return out.reshape(B, H, W, cout)


def embed_tokens(tok, pe_w, pe_b, cls, pos):
    # tok: (B, NUM_PATCHES, PATCH_DIM) -> (B, NP_PAD, DIM) with cls/pos folded in.
    B = tok.shape[0]
    pos0 = pos[0, 0:1, :]                              # (1, DIM)
    posp = pos[0, 1:N_TOKENS, :]                       # (NUM_PATCHES, DIM)
    return pl.pallas_call(
        _embed_kernel,
        grid=(B,),
        out_shape=jax.ShapeDtypeStruct((B, NP_PAD, DIM), tok.dtype),
        in_specs=[
            pl.BlockSpec((1, NUM_PATCHES, PATCH_DIM), lambda n: (n, 0, 0)),
            pl.BlockSpec((PATCH_DIM, DIM), lambda n: (0, 0)),
            pl.BlockSpec((1, DIM), lambda n: (0, 0)),
            pl.BlockSpec((1, DIM), lambda n: (0, 0)),
            pl.BlockSpec((1, DIM), lambda n: (0, 0)),
            pl.BlockSpec((NUM_PATCHES, DIM), lambda n: (0, 0)),
        ],
        out_specs=pl.BlockSpec((1, NP_PAD, DIM), lambda n: (n, 0, 0)),
        compiler_params=_PARALLEL,
    )(tok, pe_w, pe_b.reshape(1, DIM), cls.reshape(1, DIM), pos0, posp)


def attn_block(x, lp):
    # x: (B, NP_PAD, DIM) -> x + Attention(LN1(x))
    B = x.shape[0]
    wqkv = lp["wqkv"]                                  # (DIM, 3*INNER_DIM)
    # per-head weight stacks so the kernel only ever indexes a leading (slab) dim
    wq = wqkv[:, 0 * INNER_DIM:1 * INNER_DIM].reshape(DIM, HEADS, DIM_HEAD).transpose(1, 0, 2)
    wk = wqkv[:, 1 * INNER_DIM:2 * INNER_DIM].reshape(DIM, HEADS, DIM_HEAD).transpose(1, 0, 2)
    wv = wqkv[:, 2 * INNER_DIM:3 * INNER_DIM].reshape(DIM, HEADS, DIM_HEAD).transpose(1, 0, 2)
    wo = lp["wo"].reshape(HEADS, DIM_HEAD, DIM)
    return pl.pallas_call(
        _attn_block_kernel,
        grid=(B,),
        out_shape=jax.ShapeDtypeStruct(x.shape, x.dtype),
        in_specs=[
            pl.BlockSpec((1, NP_PAD, DIM), lambda n: (n, 0, 0)),
            pl.BlockSpec((1, DIM), lambda n: (0, 0)),
            pl.BlockSpec((1, DIM), lambda n: (0, 0)),
            pl.BlockSpec((HEADS, DIM, DIM_HEAD), lambda n: (0, 0, 0)),
            pl.BlockSpec((HEADS, DIM, DIM_HEAD), lambda n: (0, 0, 0)),
            pl.BlockSpec((HEADS, DIM, DIM_HEAD), lambda n: (0, 0, 0)),
            pl.BlockSpec((HEADS, DIM_HEAD, DIM), lambda n: (0, 0, 0)),
            pl.BlockSpec((1, DIM), lambda n: (0, 0)),
        ],
        out_specs=pl.BlockSpec((1, NP_PAD, DIM), lambda n: (n, 0, 0)),
        compiler_params=_PARALLEL,
    )(x, lp["ln1_g"].reshape(1, DIM), lp["ln1_b"].reshape(1, DIM),
      wq, wk, wv, wo, lp["bo"].reshape(1, DIM))


def ff_block(x, lp):
    # x: (B, NP_PAD, DIM) -> x + FeedForward(LN2(x))
    B = x.shape[0]
    return pl.pallas_call(
        _ff_block_kernel,
        grid=(B,),
        out_shape=jax.ShapeDtypeStruct(x.shape, x.dtype),
        in_specs=[
            pl.BlockSpec((1, NP_PAD, DIM), lambda n: (n, 0, 0)),
            pl.BlockSpec((1, DIM), lambda n: (0, 0)),
            pl.BlockSpec((1, DIM), lambda n: (0, 0)),
            pl.BlockSpec((DIM, MLP_DIM), lambda n: (0, 0)),
            pl.BlockSpec((1, MLP_DIM), lambda n: (0, 0)),
            pl.BlockSpec((MLP_DIM, DIM), lambda n: (0, 0)),
            pl.BlockSpec((1, DIM), lambda n: (0, 0)),
        ],
        out_specs=pl.BlockSpec((1, NP_PAD, DIM), lambda n: (n, 0, 0)),
        compiler_params=_PARALLEL,
    )(x, lp["ln2_g"].reshape(1, DIM), lp["ln2_b"].reshape(1, DIM),
      lp["w1"], lp["b1"].reshape(1, MLP_DIM), lp["w2"], lp["b2"].reshape(1, DIM))


# ----------------------------- plain-JAX glue ----------------------------------
def patchify(x_nhwc, p):
    # NHWC equivalent of einops 'b c (h p1) (w p2) -> b (h w) (p1 p2 c)'.
    B, H, W, C = x_nhwc.shape
    h, w = H // p, W // p
    x = x_nhwc.reshape(B, h, p, w, p, C)
    x = x.transpose(0, 1, 3, 2, 4, 5)                  # (B, h, w, p1, p2, C)
    return x.reshape(B, h * w, p * p * C)


# ----------------------------- full forward ------------------------------------
def vit_forward(img_nchw, params):
    x = jnp.transpose(img_nchw, (0, 2, 3, 1))                      # NCHW -> NHWC
    h0 = conv3x3(x, params["conv1_w"], params["conv1_b"])          # (B,16,16,64)
    # TODO(synk): self.conv2 / self.conv3 are used in the PyTorch forward() but never
    # defined in __init__; synthesized as Conv2d(64, 3, k=3, pad=1) so that the
    # patch embedding (patch_dim = 3*p*p) type-checks.
    # conv2(h0) + conv3(h0) folded algebraically into ONE conv with summed weights.
    w23 = params["conv2_w"] + params["conv3_w"]
    b23 = params["conv2_b"] + params["conv3_b"]
    s = conv3x3(h0, w23, b23)                                      # (B,16,16,3)

    tok = patchify(s, PATCH_SIZE)                                  # (B, 16, 48)
    # patch-embed + cls token + pos embedding, padded to NP_PAD tokens
    x = embed_tokens(tok, params["pe_w"], params["pe_b"], params["cls"], params["pos"])
    # emb dropout / attention / ff dropouts are p=0.0 -> identity.

    for lp in params["layers"]:
        x = attn_block(x, lp)          # fused LN1 + attention + residual
        x = ff_block(x, lp)            # fused LN2 + MLP + residual
    return x[:, :N_TOKENS, :]                                      # (B, 17, DIM)


# ----------------------------- deterministic init ------------------------------
def init_params(key):
    keys = iter(jax.random.split(key, 64))

    def nrm(shape, std=0.02):
        return jax.random.normal(next(keys), shape, jnp.float32) * std

    params = {
        "conv1_w": nrm((9, CHANNELS, CONV1_OUT), 0.1),      # tap-major (ky,kx), cin, cout
        "conv1_b": nrm((CONV1_OUT,), 0.1),
        "conv2_w": nrm((9, CONV1_OUT, CHANNELS), 0.05),
        "conv2_b": nrm((CHANNELS,), 0.05),
        "conv3_w": nrm((9, CONV1_OUT, CHANNELS), 0.05),
        "conv3_b": nrm((CHANNELS,), 0.05),
        "pe_w": nrm((PATCH_DIM, DIM)),
        "pe_b": jnp.zeros((DIM,), jnp.float32),
        "pos": nrm((1, NUM_PATCHES + 1, DIM), 1.0),
        "cls": nrm((1, 1, DIM), 1.0),
        "layers": [],
    }
    for _ in range(DEPTH):
        params["layers"].append({
            "ln1_g": jnp.ones((DIM,), jnp.float32),
            "ln1_b": jnp.zeros((DIM,), jnp.float32),
            "wqkv": nrm((DIM, 3 * INNER_DIM)),
            "wo": nrm((INNER_DIM, DIM)),
            "bo": jnp.zeros((DIM,), jnp.float32),
            "ln2_g": jnp.ones((DIM,), jnp.float32),
            "ln2_b": jnp.zeros((DIM,), jnp.float32),
            "w1": nrm((DIM, MLP_DIM)),
            "b1": jnp.zeros((MLP_DIM,), jnp.float32),
            "w2": nrm((MLP_DIM, DIM)),
            "b2": jnp.zeros((DIM,), jnp.float32),
        })
    return params


if __name__ == "__main__":
    key = jax.random.PRNGKey(0)
    pkey, xkey = jax.random.split(key)
    params = init_params(pkey)
    img = jax.random.normal(xkey, (2, CHANNELS, IMAGE_SIZE, IMAGE_SIZE), jnp.float32)

    out = jax.jit(vit_forward)(img, params)
    out = jax.block_until_ready(out)
    assert out.shape == (2, N_TOKENS, DIM), out.shape
    assert bool(jnp.all(jnp.isfinite(out)))
    print("KERNEL_OK")
</pallas_src>

<mosaic_0001>
module attributes {stable_mosaic.version = 11 : i64} {
  func.func @_conv3x3_kernel(%arg0: i32, %arg1: memref<1x18x18x3xf32, #tpu.memory_space<vmem>>, %arg2: memref<9x3x64xf32, #tpu.memory_space<vmem>>, %arg3: memref<1x64xf32, #tpu.memory_space<vmem>>, %arg4: memref<1x256x64xf32, #tpu.memory_space<vmem>>) attributes {dimension_semantics = [#tpu.dimension_semantics<parallel>], iteration_bounds = array<i64: 2>, scalar_prefetch = 0 : i64, scratch_operands = 0 : i64, tpu.core_type = #tpu.core_type<tc>, window_params = [{transform_indices = @transform_0, window_bounds = array<i64: 1, 18, 18, 3>}, {pipeline_mode = #tpu.pipeline_mode<synchronous>, transform_indices = @transform_1, window_bounds = array<i64: 9, 3, 64>}, {pipeline_mode = #tpu.pipeline_mode<synchronous>, transform_indices = @transform_2, window_bounds = array<i64: 1, 64>}, {transform_indices = @transform_3, window_bounds = array<i64: 1, 256, 64>}]} {
    %c0 = arith.constant 0 : index
    %c0_0 = arith.constant 0 : index
    %c0_1 = arith.constant 0 : index
    %c0_2 = arith.constant 0 : index
    %0 = vector.load %arg1[%c0, %c0_0, %c0_1, %c0_2] : memref<1x18x18x3xf32, #tpu.memory_space<vmem>>, vector<1x18x18x3xf32>
    %1 = vector.shape_cast %0 : vector<1x18x18x3xf32> to vector<18x18x3xf32>
    %cst = arith.constant 0.000000e+00 : f32
    %2 = vector.broadcast %cst : f32 to vector<256x64xf32>
    %3 = vector.extract_strided_slice %1 {offsets = [0, 0, 0], sizes = [16, 16, 3], strides = [1, 1, 1]} : vector<18x18x3xf32> to vector<16x16x3xf32>
    %4 = vector.shape_cast %3 : vector<16x16x3xf32> to vector<256x3xf32>
    %c0_3 = arith.constant 0 : index
    %c0_4 = arith.constant 0 : index
    %c0_5 = arith.constant 0 : index
    %5 = vector.load %arg2[%c0_3, %c0_4, %c0_5] : memref<9x3x64xf32, #tpu.memory_space<vmem>>, vector<1x3x64xf32>
    %6 = vector.shape_cast %5 : vector<1x3x64xf32> to vector<3x64xf32>
    %cst_6 = arith.constant dense<0.000000e+00> : vector<256x64xf32>
    %7 = tpu.matmul %4, %6, %cst_6 {dimension_numbers = #tpu.dot_dimension_numbers<[1], [0], [0], [1], [0, 0, 1, 1], [], []>} : vector<256x3xf32>, vector<3x64xf32>, vector<256x64xf32> -> vector<256x64xf32>
    %8 = arith.addf %2, %7 : vector<256x64xf32>
    %9 = vector.extract_strided_slice %1 {offsets = [0, 1, 0], sizes = [16, 16, 3], strides = [1, 1, 1]} : vector<18x18x3xf32> to vector<16x16x3xf32>
    %10 = vector.shape_cast %9 : vector<16x16x3xf32> to vector<256x3xf32>
    %c1 = arith.constant 1 : index
    %c0_7 = arith.constant 0 : index
    %c0_8 = arith.constant 0 : index
    %11 = vector.load %arg2[%c1, %c0_7, %c0_8] : memref<9x3x64xf32, #tpu.memory_space<vmem>>, vector<1x3x64xf32>
    %12 = vector.shape_cast %11 : vector<1x3x64xf32> to vector<3x64xf32>
    %cst_9 = arith.constant dense<0.000000e+00> : vector<256x64xf32>
    %13 = tpu.matmul %10, %12, %cst_9 {dimension_numbers = #tpu.dot_dimension_numbers<[1], [0], [0], [1], [0, 0, 1, 1], [], []>} : vector<256x3xf32>, vector<3x64xf32>, vector<256x64xf32> -> vector<256x64xf32>
    %14 = arith.addf %8, %13 : vector<256x64xf32>
    %15 = vector.extract_strided_slice %1 {offsets = [0, 2, 0], sizes = [16, 16, 3], strides = [1, 1, 1]} : vector<18x18x3xf32> to vector<16x16x3xf32>
    %16 = vector.shape_cast %15 : vector<16x16x3xf32> to vector<256x3xf32>
    %c2 = arith.constant 2 : index
    %c0_10 = arith.constant 0 : index
    %c0_11 = arith.constant 0 : index
    %17 = vector.load %arg2[%c2, %c0_10, %c0_11] : memref<9x3x64xf32, #tpu.memory_space<vmem>>, vector<1x3x64xf32>
    %18 = vector.shape_cast %17 : vector<1x3x64xf32> to vector<3x64xf32>
    %cst_12 = arith.constant dense<0.000000e+00> : vector<256x64xf32>
    %19 = tpu.matmul %16, %18, %cst_12 {dimension_numbers = #tpu.dot_dimension_numbers<[1], [0], [0], [1], [0, 0, 1, 1], [], []>} : vector<256x3xf32>, vector<3x64xf32>, vector<256x64xf32> -> vector<256x64xf32>
    %20 = arith.addf %14, %19 : vector<256x64xf32>
    %21 = vector.extract_strided_slice %1 {offsets = [1, 0, 0], sizes = [16, 16, 3], strides = [1, 1, 1]} : vector<18x18x3xf32> to vector<16x16x3xf32>
    %22 = vector.shape_cast %21 : vector<16x16x3xf32> to vector<256x3xf32>
    %c3 = arith.constant 3 : index
    %c0_13 = arith.constant 0 : index
    %c0_14 = arith.constant 0 : index
    %23 = vector.load %arg2[%c3, %c0_13, %c0_14] : memref<9x3x64xf32, #tpu.memory_space<vmem>>, vector<1x3x64xf32>
    %24 = vector.shape_cast %23 : vector<1x3x64xf32> to vector<3x64xf32>
    %cst_15 = arith.constant dense<0.000000e+00> : vector<256x64xf32>
    %25 = tpu.matmul %22, %24, %cst_15 {dimension_numbers = #tpu.dot_dimension_numbers<[1], [0], [0], [1], [0, 0, 1, 1], [], []>} : vector<256x3xf32>, vector<3x64xf32>, vector<256x64xf32> -> vector<256x64xf32>
    %26 = arith.addf %20, %25 : vector<256x64xf32>
    %27 = vector.extract_strided_slice %1 {offsets = [1, 1, 0], sizes = [16, 16, 3], strides = [1, 1, 1]} : vector<18x18x3xf32> to vector<16x16x3xf32>
    %28 = vector.shape_cast %27 : vector<16x16x3xf32> to vector<256x3xf32>
    %c4 = arith.constant 4 : index
    %c0_16 = arith.constant 0 : index
    %c0_17 = arith.constant 0 : index
    %29 = vector.load %arg2[%c4, %c0_16, %c0_17] : memref<9x3x64xf32, #tpu.memory_space<vmem>>, vector<1x3x64xf32>
    %30 = vector.shape_cast %29 : vector<1x3x64xf32> to vector<3x64xf32>
    %cst_18 = arith.constant dense<0.000000e+00> : vector<256x64xf32>
    %31 = tpu.matmul %28, %30, %cst_18 {dimension_numbers = #tpu.dot_dimension_numbers<[1], [0], [0], [1], [0, 0, 1, 1], [], []>} : vector<256x3xf32>, vector<3x64xf32>, vector<256x64xf32> -> vector<256x64xf32>
    %32 = arith.addf %26, %31 : vector<256x64xf32>
    %33 = vector.extract_strided_slice %1 {offsets = [1, 2, 0], sizes = [16, 16, 3], strides = [1, 1, 1]} : vector<18x18x3xf32> to vector<16x16x3xf32>
    %34 = vector.shape_cast %33 : vector<16x16x3xf32> to vector<256x3xf32>
    %c5 = arith.constant 5 : index
    %c0_19 = arith.constant 0 : index
    %c0_20 = arith.constant 0 : index
    %35 = vector.load %arg2[%c5, %c0_19, %c0_20] : memref<9x3x64xf32, #tpu.memory_space<vmem>>, vector<1x3x64xf32>
    %36 = vector.shape_cast %35 : vector<1x3x64xf32> to vector<3x64xf32>
    %cst_21 = arith.constant dense<0.000000e+00> : vector<256x64xf32>
    %37 = tpu.matmul %34, %36, %cst_21 {dimension_numbers = #tpu.dot_dimension_numbers<[1], [0], [0], [1], [0, 0, 1, 1], [], []>} : vector<256x3xf32>, vector<3x64xf32>, vector<256x64xf32> -> vector<256x64xf32>
    %38 = arith.addf %32, %37 : vector<256x64xf32>
    %39 = vector.extract_strided_slice %1 {offsets = [2, 0, 0], sizes = [16, 16, 3], strides = [1, 1, 1]} : vector<18x18x3xf32> to vector<16x16x3xf32>
    %40 = vector.shape_cast %39 : vector<16x16x3xf32> to vector<256x3xf32>
    %c6 = arith.constant 6 : index
    %c0_22 = arith.constant 0 : index
    %c0_23 = arith.constant 0 : index
    %41 = vector.load %arg2[%c6, %c0_22, %c0_23] : memref<9x3x64xf32, #tpu.memory_space<vmem>>, vector<1x3x64xf32>
    %42 = vector.shape_cast %41 : vector<1x3x64xf32> to vector<3x64xf32>
    %cst_24 = arith.constant dense<0.000000e+00> : vector<256x64xf32>
    %43 = tpu.matmul %40, %42, %cst_24 {dimension_numbers = #tpu.dot_dimension_numbers<[1], [0], [0], [1], [0, 0, 1, 1], [], []>} : vector<256x3xf32>, vector<3x64xf32>, vector<256x64xf32> -> vector<256x64xf32>
    %44 = arith.addf %38, %43 : vector<256x64xf32>
    %45 = vector.extract_strided_slice %1 {offsets = [2, 1, 0], sizes = [16, 16, 3], strides = [1, 1, 1]} : vector<18x18x3xf32> to vector<16x16x3xf32>
    %46 = vector.shape_cast %45 : vector<16x16x3xf32> to vector<256x3xf32>
    %c7 = arith.constant 7 : index
    %c0_25 = arith.constant 0 : index
    %c0_26 = arith.constant 0 : index
    %47 = vector.load %arg2[%c7, %c0_25, %c0_26] : memref<9x3x64xf32, #tpu.memory_space<vmem>>, vector<1x3x64xf32>
    %48 = vector.shape_cast %47 : vector<1x3x64xf32> to vector<3x64xf32>
    %cst_27 = arith.constant dense<0.000000e+00> : vector<256x64xf32>
    %49 = tpu.matmul %46, %48, %cst_27 {dimension_numbers = #tpu.dot_dimension_numbers<[1], [0], [0], [1], [0, 0, 1, 1], [], []>} : vector<256x3xf32>, vector<3x64xf32>, vector<256x64xf32> -> vector<256x64xf32>
    %50 = arith.addf %44, %49 : vector<256x64xf32>
    %51 = vector.extract_strided_slice %1 {offsets = [2, 2, 0], sizes = [16, 16, 3], strides = [1, 1, 1]} : vector<18x18x3xf32> to vector<16x16x3xf32>
    %52 = vector.shape_cast %51 : vector<16x16x3xf32> to vector<256x3xf32>
    %c8 = arith.constant 8 : index
    %c0_28 = arith.constant 0 : index
    %c0_29 = arith.constant 0 : index
    %53 = vector.load %arg2[%c8, %c0_28, %c0_29] : memref<9x3x64xf32, #tpu.memory_space<vmem>>, vector<1x3x64xf32>
    %54 = vector.shape_cast %53 : vector<1x3x64xf32> to vector<3x64xf32>
    %cst_30 = arith.constant dense<0.000000e+00> : vector<256x64xf32>
    %55 = tpu.matmul %52, %54, %cst_30 {dimension_numbers = #tpu.dot_dimension_numbers<[1], [0], [0], [1], [0, 0, 1, 1], [], []>} : vector<256x3xf32>, vector<3x64xf32>, vector<256x64xf32> -> vector<256x64xf32>
    %56 = arith.addf %50, %55 : vector<256x64xf32>
    %c0_31 = arith.constant 0 : index
    %c0_32 = arith.constant 0 : index
    %57 = vector.load %arg3[%c0_31, %c0_32] : memref<1x64xf32, #tpu.memory_space<vmem>>, vector<1x64xf32>
    %58 = vector.broadcast %57 : vector<1x64xf32> to vector<256x64xf32>
    %59 = arith.addf %56, %58 : vector<256x64xf32>
    %c0_33 = arith.constant 0 : index
    %c0_34 = arith.constant 0 : index
    %c0_35 = arith.constant 0 : index
    %60 = vector.load %arg4[%c0_33, %c0_34, %c0_35] : memref<1x256x64xf32, #tpu.memory_space<vmem>>, vector<1x256x64xf32>
    %61 = vector.shape_cast %60 : vector<1x256x64xf32> to vector<256x64xf32>
    %62 = vector.shape_cast %59 : vector<256x64xf32> to vector<1x256x64xf32>
    tpu.vector_store %arg4[%c0_33, %c0_34, %c0_35], %62 {strides = array<i32>} : memref<1x256x64xf32, #tpu.memory_space<vmem>>, vector<1x256x64xf32>,
    return
  }
  func.func @transform_0(%arg0: i32) -> (i32, i32, i32, i32) {
    %c0_i32 = arith.constant 0 : i32
    %c0_i32_0 = arith.constant 0 : i32
    %c0_i32_1 = arith.constant 0 : i32
    %c0_i32_2 = arith.constant 0 : i32
    return %arg0, %c0_i32, %c0_i32_0, %c0_i32_1 : i32, i32, i32, i32
  }
  func.func @transform_1(%arg0: i32) -> (i32, i32, i32) {
    %c0_i32 = arith.constant 0 : i32
    %c0_i32_0 = arith.constant 0 : i32
    %c0_i32_1 = arith.constant 0 : i32
    %c0_i32_2 = arith.constant 0 : i32
    return %c0_i32, %c0_i32_0, %c0_i32_1 : i32, i32, i32
  }
  func.func @transform_2(%arg0: i32) -> (i32, i32) {
    %c0_i32 = arith.constant 0 : i32
    %c0_i32_0 = arith.constant 0 : i32
    %c0_i32_1 = arith.constant 0 : i32
    return %c0_i32, %c0_i32_0 : i32, i32
  }
  func.func @transform_3(%arg0: i32) -> (i32, i32, i32) {
    %c0_i32 = arith.constant 0 : i32
    %c0_i32_0 = arith.constant 0 : i32
    %c0_i32_1 = arith.constant 0 : i32
    return %arg0, %c0_i32, %c0_i32_0 : i32, i32, i32
  }
}

module attributes {stable_mosaic.version = 11 : i64} {
  func.func @_conv3x3_kernel(%arg0: i32, %arg1: memref<1x18x18x64xf32, #tpu.memory_space<vmem>>, %arg2: memref<9x64x3xf32, #tpu.memory_space<vmem>>, %arg3: memref<1x3xf32, #tpu.memory_space<vmem>>, %arg4: memref<1x256x3xf32, #tpu.memory_space<vmem>>) attributes {dimension_semantics = [#tpu.dimension_semantics<parallel>], iteration_bounds = array<i64: 2>, scalar_prefetch = 0 : i64, scratch_operands = 0 : i64, tpu.core_type = #tpu.core_type<tc>, window_params = [{transform_indices = @transform_0, window_bounds = array<i64: 1, 18, 18, 64>}, {pipeline_mode = #tpu.pipeline_mode<synchronous>, transform_indices = @transform_1, window_bounds = array<i64: 9, 64, 3>}, {pipeline_mode = #tpu.pipeline_mode<synchronous>, transform_indices = @transform_2, window_bounds = array<i64: 1, 3>}, {transform_indices = @transform_3, window_bounds = array<i64: 1, 256, 3>}]} {
    %c0 = arith.constant 0 : index
    %c0_0 = arith.constant 0 : index
    %c0_1 = arith.constant 0 : index
    %c0_2 = arith.constant 0 : index
    %0 = vector.load %arg1[%c0, %c0_0, %c0_1, %c0_2] : memref<1x18x18x64xf32, #tpu.memory_space<vmem>>, vector<1x18x18x64xf32>
    %1 = vector.shape_cast %0 : vector<1x18x18x64xf32> to vector<18x18x64xf32>
    %cst = arith.constant 0.000000e+00 : f32
    %2 = vector.broadcast %cst : f32 to vector<256x3xf32>
    %3 = vector.extract_strided_slice %1 {offsets = [0, 0, 0], sizes = [16, 16, 64], strides = [1, 1, 1]} : vector<18x18x64xf32> to vector<16x16x64xf32>
    %4 = vector.shape_cast %3 : vector<16x16x64xf32> to vector<256x64xf32>
    %c0_3 = arith.constant 0 : index
    %c0_4 = arith.constant 0 : index
    %c0_5 = arith.constant 0 : index
    %5 = vector.load %arg2[%c0_3, %c0_4, %c0_5] : memref<9x64x3xf32, #tpu.memory_space<vmem>>, vector<1x64x3xf32>
    %6 = vector.shape_cast %5 : vector<1x64x3xf32> to vector<64x3xf32>
    %cst_6 = arith.constant dense<0.000000e+00> : vector<256x3xf32>
    %7 = tpu.matmul %4, %6, %cst_6 {dimension_numbers = #tpu.dot_dimension_numbers<[1], [0], [0], [1], [0, 0, 1, 1], [], []>} : vector<256x64xf32>, vector<64x3xf32>, vector<256x3xf32> -> vector<256x3xf32>
    %8 = arith.addf %2, %7 : vector<256x3xf32>
    %9 = vector.extract_strided_slice %1 {offsets = [0, 1, 0], sizes = [16, 16, 64], strides = [1, 1, 1]} : vector<18x18x64xf32> to vector<16x16x64xf32>
    %10 = vector.shape_cast %9 : vector<16x16x64xf32> to vector<256x64xf32>
    %c1 = arith.constant 1 : index
    %c0_7 = arith.constant 0 : index
    %c0_8 = arith.constant 0 : index
    %11 = vector.load %arg2[%c1, %c0_7, %c0_8] : memref<9x64x3xf32, #tpu.memory_space<vmem>>, vector<1x64x3xf32>
    %12 = vector.shape_cast %11 : vector<1x64x3xf32> to vector<64x3xf32>
    %cst_9 = arith.constant dense<0.000000e+00> : vector<256x3xf32>
    %13 = tpu.matmul %10, %12, %cst_9 {dimension_numbers = #tpu.dot_dimension_numbers<[1], [0], [0], [1], [0, 0, 1, 1], [], []>} : vector<256x64xf32>, vector<64x3xf32>, vector<256x3xf32> -> vector<256x3xf32>
    %14 = arith.addf %8, %13 : vector<256x3xf32>
    %15 = vector.extract_strided_slice %1 {offsets = [0, 2, 0], sizes = [16, 16, 64], strides = [1, 1, 1]} : vector<18x18x64xf32> to vector<16x16x64xf32>
    %16 = vector.shape_cast %15 : vector<16x16x64xf32> to vector<256x64xf32>
    %c2 = arith.constant 2 : index
    %c0_10 = arith.constant 0 : index
    %c0_11 = arith.constant 0 : index
    %17 = vector.load %arg2[%c2, %c0_10, %c0_11] : memref<9x64x3xf32, #tpu.memory_space<vmem>>, vector<1x64x3xf32>
    %18 = vector.shape_cast %17 : vector<1x64x3xf32> to vector<64x3xf32>
    %cst_12 = arith.constant dense<0.000000e+00> : vector<256x3xf32>
    %19 = tpu.matmul %16, %18, %cst_12 {dimension_numbers = #tpu.dot_dimension_numbers<[1], [0], [0], [1], [0, 0, 1, 1], [], []>} : vector<256x64xf32>, vector<64x3xf32>, vector<256x3xf32> -> vector<256x3xf32>
    %20 = arith.addf %14, %19 : vector<256x3xf32>
    %21 = vector.extract_strided_slice %1 {offsets = [1, 0, 0], sizes = [16, 16, 64], strides = [1, 1, 1]} : vector<18x18x64xf32> to vector<16x16x64xf32>
    %22 = vector.shape_cast %21 : vector<16x16x64xf32> to vector<256x64xf32>
    %c3 = arith.constant 3 : index
    %c0_13 = arith.constant 0 : index
    %c0_14 = arith.constant 0 : index
    %23 = vector.load %arg2[%c3, %c0_13, %c0_14] : memref<9x64x3xf32, #tpu.memory_space<vmem>>, vector<1x64x3xf32>
    %24 = vector.shape_cast %23 : vector<1x64x3xf32> to vector<64x3xf32>
    %cst_15 = arith.constant dense<0.000000e+00> : vector<256x3xf32>
    %25 = tpu.matmul %22, %24, %cst_15 {dimension_numbers = #tpu.dot_dimension_numbers<[1], [0], [0], [1], [0, 0, 1, 1], [], []>} : vector<256x64xf32>, vector<64x3xf32>, vector<256x3xf32> -> vector<256x3xf32>
    %26 = arith.addf %20, %25 : vector<256x3xf32>
    %27 = vector.extract_strided_slice %1 {offsets = [1, 1, 0], sizes = [16, 16, 64], strides = [1, 1, 1]} : vector<18x18x64xf32> to vector<16x16x64xf32>
    %28 = vector.shape_cast %27 : vector<16x16x64xf32> to vector<256x64xf32>
    %c4 = arith.constant 4 : index
    %c0_16 = arith.constant 0 : index
    %c0_17 = arith.constant 0 : index
    %29 = vector.load %arg2[%c4, %c0_16, %c0_17] : memref<9x64x3xf32, #tpu.memory_space<vmem>>, vector<1x64x3xf32>
    %30 = vector.shape_cast %29 : vector<1x64x3xf32> to vector<64x3xf32>
    %cst_18 = arith.constant dense<0.000000e+00> : vector<256x3xf32>
    %31 = tpu.matmul %28, %30, %cst_18 {dimension_numbers = #tpu.dot_dimension_numbers<[1], [0], [0], [1], [0, 0, 1, 1], [], []>} : vector<256x64xf32>, vector<64x3xf32>, vector<256x3xf32> -> vector<256x3xf32>
    %32 = arith.addf %26, %31 : vector<256x3xf32>
    %33 = vector.extract_strided_slice %1 {offsets = [1, 2, 0], sizes = [16, 16, 64], strides = [1, 1, 1]} : vector<18x18x64xf32> to vector<16x16x64xf32>
    %34 = vector.shape_cast %33 : vector<16x16x64xf32> to vector<256x64xf32>
    %c5 = arith.constant 5 : index
    %c0_19 = arith.constant 0 : index
    %c0_20 = arith.constant 0 : index
    %35 = vector.load %arg2[%c5, %c0_19, %c0_20] : memref<9x64x3xf32, #tpu.memory_space<vmem>>, vector<1x64x3xf32>
    %36 = vector.shape_cast %35 : vector<1x64x3xf32> to vector<64x3xf32>
    %cst_21 = arith.constant dense<0.000000e+00> : vector<256x3xf32>
    %37 = tpu.matmul %34, %36, %cst_21 {dimension_numbers = #tpu.dot_dimension_numbers<[1], [0], [0], [1], [0, 0, 1, 1], [], []>} : vector<256x64xf32>, vector<64x3xf32>, vector<256x3xf32> -> vector<256x3xf32>
    %38 = arith.addf %32, %37 : vector<256x3xf32>
    %39 = vector.extract_strided_slice %1 {offsets = [2, 0, 0], sizes = [16, 16, 64], strides = [1, 1, 1]} : vector<18x18x64xf32> to vector<16x16x64xf32>
    %40 = vector.shape_cast %39 : vector<16x16x64xf32> to vector<256x64xf32>
    %c6 = arith.constant 6 : index
    %c0_22 = arith.constant 0 : index
    %c0_23 = arith.constant 0 : index
    %41 = vector.load %arg2[%c6, %c0_22, %c0_23] : memref<9x64x3xf32, #tpu.memory_space<vmem>>, vector<1x64x3xf32>
    %42 = vector.shape_cast %41 : vector<1x64x3xf32> to vector<64x3xf32>
    %cst_24 = arith.constant dense<0.000000e+00> : vector<256x3xf32>
    %43 = tpu.matmul %40, %42, %cst_24 {dimension_numbers = #tpu.dot_dimension_numbers<[1], [0], [0], [1], [0, 0, 1, 1], [], []>} : vector<256x64xf32>, vector<64x3xf32>, vector<256x3xf32> -> vector<256x3xf32>
    %44 = arith.addf %38, %43 : vector<256x3xf32>
    %45 = vector.extract_strided_slice %1 {offsets = [2, 1, 0], sizes = [16, 16, 64], strides = [1, 1, 1]} : vector<18x18x64xf32> to vector<16x16x64xf32>
    %46 = vector.shape_cast %45 : vector<16x16x64xf32> to vector<256x64xf32>
    %c7 = arith.constant 7 : index
    %c0_25 = arith.constant 0 : index
    %c0_26 = arith.constant 0 : index
    %47 = vector.load %arg2[%c7, %c0_25, %c0_26] : memref<9x64x3xf32, #tpu.memory_space<vmem>>, vector<1x64x3xf32>
    %48 = vector.shape_cast %47 : vector<1x64x3xf32> to vector<64x3xf32>
    %cst_27 = arith.constant dense<0.000000e+00> : vector<256x3xf32>
    %49 = tpu.matmul %46, %48, %cst_27 {dimension_numbers = #tpu.dot_dimension_numbers<[1], [0], [0], [1], [0, 0, 1, 1], [], []>} : vector<256x64xf32>, vector<64x3xf32>, vector<256x3xf32> -> vector<256x3xf32>
    %50 = arith.addf %44, %49 : vector<256x3xf32>
    %51 = vector.extract_strided_slice %1 {offsets = [2, 2, 0], sizes = [16, 16, 64], strides = [1, 1, 1]} : vector<18x18x64xf32> to vector<16x16x64xf32>
    %52 = vector.shape_cast %51 : vector<16x16x64xf32> to vector<256x64xf32>
    %c8 = arith.constant 8 : index
    %c0_28 = arith.constant 0 : index
    %c0_29 = arith.constant 0 : index
    %53 = vector.load %arg2[%c8, %c0_28, %c0_29] : memref<9x64x3xf32, #tpu.memory_space<vmem>>, vector<1x64x3xf32>
    %54 = vector.shape_cast %53 : vector<1x64x3xf32> to vector<64x3xf32>
    %cst_30 = arith.constant dense<0.000000e+00> : vector<256x3xf32>
    %55 = tpu.matmul %52, %54, %cst_30 {dimension_numbers = #tpu.dot_dimension_numbers<[1], [0], [0], [1], [0, 0, 1, 1], [], []>} : vector<256x64xf32>, vector<64x3xf32>, vector<256x3xf32> -> vector<256x3xf32>
    %56 = arith.addf %50, %55 : vector<256x3xf32>
    %c0_31 = arith.constant 0 : index
    %c0_32 = arith.constant 0 : index
    %57 = vector.load %arg3[%c0_31, %c0_32] : memref<1x3xf32, #tpu.memory_space<vmem>>, vector<1x3xf32>
    %58 = vector.broadcast %57 : vector<1x3xf32> to vector<256x3xf32>
    %59 = arith.addf %56, %58 : vector<256x3xf32>
    %c0_33 = arith.constant 0 : index
    %c0_34 = arith.constant 0 : index
    %c0_35 = arith.constant 0 : index
    %60 = vector.load %arg4[%c0_33, %c0_34, %c0_35] : memref<1x256x3xf32, #tpu.memory_space<vmem>>, vector<1x256x3xf32>
    %61 = vector.shape_cast %60 : vector<1x256x3xf32> to vector<256x3xf32>
    %62 = vector.shape_cast %59 : vector<256x3xf32> to vector<1x256x3xf32>
    tpu.vector_store %arg4[%c0_33, %c0_34, %c0_35], %62 {strides = array<i32>} : memref<1x256x3xf32, #tpu.memory_space<vmem>>, vector<1x256x3xf32>,
    return
  }
  func.func @transform_0(%arg0: i32) -> (i32, i32, i32, i32) {
    %c0_i32 = arith.constant 0 : i32
    %c0_i32_0 = arith.constant 0 : i32
    %c0_i32_1 = arith.constant 0 : i32
    %c0_i32_2 = arith.constant 0 : i32
    return %arg0, %c0_i32, %c0_i32_0, %c0_i32_1 : i32, i32, i32, i32
  }
  func.func @transform_1(%arg0: i32) -> (i32, i32, i32) {
    %c0_i32 = arith.constant 0 : i32
    %c0_i32_0 = arith.constant 0 : i32
    %c0_i32_1 = arith.constant 0 : i32
    %c0_i32_2 = arith.constant 0 : i32
    return %c0_i32, %c0_i32_0, %c0_i32_1 : i32, i32, i32
  }
  func.func @transform_2(%arg0: i32) -> (i32, i32) {
    %c0_i32 = arith.constant 0 : i32
    %c0_i32_0 = arith.constant 0 : i32
    %c0_i32_1 = arith.constant 0 : i32
    return %c0_i32, %c0_i32_0 : i32, i32
  }
  func.func @transform_3(%arg0: i32) -> (i32, i32, i32) {
    %c0_i32 = arith.constant 0 : i32
    %c0_i32_0 = arith.constant 0 : i32
    %c0_i32_1 = arith.constant 0 : i32
    return %arg0, %c0_i32, %c0_i32_0 : i32, i32, i32
  }
}

module attributes {stable_mosaic.version = 11 : i64} {
  func.func @_embed_kernel(%arg0: i32, %arg1: memref<1x16x48xf32, #tpu.memory_space<vmem>>, %arg2: memref<48x32xf32, #tpu.memory_space<vmem>>, %arg3: memref<1x32xf32, #tpu.memory_space<vmem>>, %arg4: memref<1x32xf32, #tpu.memory_space<vmem>>, %arg5: memref<1x32xf32, #tpu.memory_space<vmem>>, %arg6: memref<16x32xf32, #tpu.memory_space<vmem>>, %arg7: memref<1x24x32xf32, #tpu.memory_space<vmem>>) attributes {dimension_semantics = [#tpu.dimension_semantics<parallel>], iteration_bounds = array<i64: 2>, scalar_prefetch = 0 : i64, scratch_operands = 0 : i64, tpu.core_type = #tpu.core_type<tc>, window_params = [{transform_indices = @transform_0, window_bounds = array<i64: 1, 16, 48>}, {pipeline_mode = #tpu.pipeline_mode<synchronous>, transform_indices = @transform_1, window_bounds = array<i64: 48, 32>}, {pipeline_mode = #tpu.pipeline_mode<synchronous>, transform_indices = @transform_2, window_bounds = array<i64: 1, 32>}, {pipeline_mode = #tpu.pipeline_mode<synchronous>, transform_indices = @transform_3, window_bounds = array<i64: 1, 32>}, {pipeline_mode = #tpu.pipeline_mode<synchronous>, transform_indices = @transform_4, window_bounds = array<i64: 1, 32>}, {pipeline_mode = #tpu.pipeline_mode<synchronous>, transform_indices = @transform_5, window_bounds = array<i64: 16, 32>}, {transform_indices = @transform_6, window_bounds = array<i64: 1, 24, 32>}]} {
    %c0 = arith.constant 0 : index
    %c0_0 = arith.constant 0 : index
    %c0_1 = arith.constant 0 : index
    %0 = vector.load %arg1[%c0, %c0_0, %c0_1] : memref<1x16x48xf32, #tpu.memory_space<vmem>>, vector<1x16x48xf32>
    %1 = vector.shape_cast %0 : vector<1x16x48xf32> to vector<16x48xf32>
    %c0_2 = arith.constant 0 : index
    %c0_3 = arith.constant 0 : index
    %2 = vector.load %arg2[%c0_2, %c0_3] : memref<48x32xf32, #tpu.memory_space<vmem>>, vector<48x32xf32>
    %cst = arith.constant dense<0.000000e+00> : vector<16x32xf32>
    %3 = tpu.matmul %1, %2, %cst {dimension_numbers = #tpu.dot_dimension_numbers<[1], [0], [0], [1], [0, 0, 1, 1], [], []>} : vector<16x48xf32>, vector<48x32xf32>, vector<16x32xf32> -> vector<16x32xf32>
    %c0_4 = arith.constant 0 : index
    %c0_5 = arith.constant 0 : index
    %4 = vector.load %arg3[%c0_4, %c0_5] : memref<1x32xf32, #tpu.memory_space<vmem>>, vector<1x32xf32>
    %5 = vector.broadcast %4 : vector<1x32xf32> to vector<16x32xf32>
    %6 = arith.addf %3, %5 : vector<16x32xf32>
    %c0_6 = arith.constant 0 : index
    %c0_7 = arith.constant 0 : index
    %7 = vector.load %arg6[%c0_6, %c0_7] : memref<16x32xf32, #tpu.memory_space<vmem>>, vector<16x32xf32>
    %8 = arith.addf %6, %7 : vector<16x32xf32>
    %c0_8 = arith.constant 0 : index
    %c0_9 = arith.constant 0 : index
    %9 = vector.load %arg4[%c0_8, %c0_9] : memref<1x32xf32, #tpu.memory_space<vmem>>, vector<1x32xf32>
    %c0_10 = arith.constant 0 : index
    %c0_11 = arith.constant 0 : index
    %10 = vector.load %arg5[%c0_10, %c0_11] : memref<1x32xf32, #tpu.memory_space<vmem>>, vector<1x32xf32>
    %11 = arith.addf %9, %10 : vector<1x32xf32>
    %c0_12 = arith.constant 0 : index
    %c0_13 = arith.constant 0 : index
    %c0_14 = arith.constant 0 : index
    %12 = vector.load %arg7[%c0_12, %c0_13, %c0_14] : memref<1x24x32xf32, #tpu.memory_space<vmem>>, vector<1x1x32xf32>
    %13 = vector.shape_cast %12 : vector<1x1x32xf32> to vector<1x32xf32>
    %14 = vector.shape_cast %11 : vector<1x32xf32> to vector<1x1x32xf32>
    tpu.vector_store %arg7[%c0_12, %c0_13, %c0_14], %14 {strides = array<i32>} : memref<1x24x32xf32, #tpu.memory_space<vmem>>, vector<1x1x32xf32>,
    %c0_15 = arith.constant 0 : index
    %c1 = arith.constant 1 : index
    %c0_16 = arith.constant 0 : index
    %15 = vector.load %arg7[%c0_15, %c1, %c0_16] : memref<1x24x32xf32, #tpu.memory_space<vmem>>, vector<1x16x32xf32>
    %16 = vector.shape_cast %15 : vector<1x16x32xf32> to vector<16x32xf32>
    %17 = vector.shape_cast %8 : vector<16x32xf32> to vector<1x16x32xf32>
    tpu.vector_store %arg7[%c0_15, %c1, %c0_16], %17 {strides = array<i32>} : memref<1x24x32xf32, #tpu.memory_space<vmem>>, vector<1x16x32xf32>,
    %cst_17 = arith.constant 0.000000e+00 : f32
    %18 = vector.broadcast %cst_17 : f32 to vector<7x32xf32>
    %c0_18 = arith.constant 0 : index
    %c17 = arith.constant 17 : index
    %c0_19 = arith.constant 0 : index
    %19 = vector.load %arg7[%c0_18, %c17, %c0_19] : memref<1x24x32xf32, #tpu.memory_space<vmem>>, vector<1x7x32xf32>
    %20 = vector.shape_cast %19 : vector<1x7x32xf32> to vector<7x32xf32>
    %21 = vector.shape_cast %18 : vector<7x32xf32> to vector<1x7x32xf32>
    tpu.vector_store %arg7[%c0_18, %c17, %c0_19], %21 {strides = array<i32>} : memref<1x24x32xf32, #tpu.memory_space<vmem>>, vector<1x7x32xf32>,
    return
  }
  func.func @transform_0(%arg0: i32) -> (i32, i32, i32) {
    %c0_i32 = arith.constant 0 : i32
    %c0_i32_0 = arith.constant 0 : i32
    %c0_i32_1 = arith.constant 0 : i32
    return %arg0, %c0_i32, %c0_i32_0 : i32, i32, i32
  }
  func.func @transform_1(%arg0: i32) -> (i32, i32) {
    %c0_i32 = arith.constant 0 : i32
    %c0_i32_0 = arith.constant 0 : i32
    %c0_i32_1 = arith.constant 0 : i32
    return %c0_i32, %c0_i32_0 : i32, i32
  }
  func.func @transform_2(%arg0: i32) -> (i32, i32) {
    %c0_i32 = arith.constant 0 : i32
    %c0_i32_0 = arith.constant 0 : i32
    %c0_i32_1 = arith.constant 0 : i32
    return %c0_i32, %c0_i32_0 : i32, i32
  }
  func.func @transform_3(%arg0: i32) -> (i32, i32) {
    %c0_i32 = arith.constant 0 : i32
    %c0_i32_0 = arith.constant 0 : i32
    %c0_i32_1 = arith.constant 0 : i32
    return %c0_i32, %c0_i32_0 : i32, i32
  }
  func.func @transform_4(%arg0: i32) -> (i32, i32) {
    %c0_i32 = arith.constant 0 : i32
    %c0_i32_0 = arith.constant 0 : i32
    %c0_i32_1 = arith.constant 0 : i32
    return %c0_i32, %c0_i32_0 : i32, i32
  }
  func.func @transform_5(%arg0: i32) -> (i32, i32) {
    %c0_i32 = arith.constant 0 : i32
    %c0_i32_0 = arith.constant 0 : i32
    %c0_i32_1 = arith.constant 0 : i32
    return %c0_i32, %c0_i32_0 : i32, i32
  }
  func.func @transform_6(%arg0: i32) -> (i32, i32, i32) {
    %c0_i32 = arith.constant 0 : i32
    %c0_i32_0 = arith.constant 0 : i32
    %c0_i32_1 = arith.constant 0 : i32
    return %arg0, %c0_i32, %c0_i32_0 : i32, i32, i32
  }
}

module attributes {stable_mosaic.version = 11 : i64} {
  func.func @_attn_block_kernel(%arg0: i32, %arg1: memref<1x24x32xf32, #tpu.memory_space<vmem>>, %arg2: memref<1x32xf32, #tpu.memory_space<vmem>>, %arg3: memref<1x32xf32, #tpu.memory_space<vmem>>, %arg4: memref<4x32x8xf32, #tpu.memory_space<vmem>>, %arg5: memref<4x32x8xf32, #tpu.memory_space<vmem>>, %arg6: memref<4x32x8xf32, #tpu.memory_space<vmem>>, %arg7: memref<4x8x32xf32, #tpu.memory_space<vmem>>, %arg8: memref<1x32xf32, #tpu.memory_space<vmem>>, %arg9: memref<1x24x32xf32, #tpu.memory_space<vmem>>) attributes {dimension_semantics = [#tpu.dimension_semantics<parallel>], iteration_bounds = array<i64: 2>, scalar_prefetch = 0 : i64, scratch_operands = 0 : i64, tpu.core_type = #tpu.core_type<tc>, window_params = [{transform_indices = @transform_0, window_bounds = array<i64: 1, 24, 32>}, {pipeline_mode = #tpu.pipeline_mode<synchronous>, transform_indices = @transform_1, window_bounds = array<i64: 1, 32>}, {pipeline_mode = #tpu.pipeline_mode<synchronous>, transform_indices = @transform_2, window_bounds = array<i64: 1, 32>}, {pipeline_mode = #tpu.pipeline_mode<synchronous>, transform_indices = @transform_3, window_bounds = array<i64: 4, 32, 8>}, {pipeline_mode = #tpu.pipeline_mode<synchronous>, transform_indices = @transform_4, window_bounds = array<i64: 4, 32, 8>}, {pipeline_mode = #tpu.pipeline_mode<synchronous>, transform_indices = @transform_5, window_bounds = array<i64: 4, 32, 8>}, {pipeline_mode = #tpu.pipeline_mode<synchronous>, transform_indices = @transform_6, window_bounds = array<i64: 4, 8, 32>}, {pipeline_mode = #tpu.pipeline_mode<synchronous>, transform_indices = @transform_7, window_bounds = array<i64: 1, 32>}, {transform_indices = @transform_8, window_bounds = array<i64: 1, 24, 32>}]} {
    %c0 = arith.constant 0 : index
    %c0_0 = arith.constant 0 : index
    %c0_1 = arith.constant 0 : index
    %0 = vector.load %arg1[%c0, %c0_0, %c0_1] : memref<1x24x32xf32, #tpu.memory_space<vmem>>, vector<1x24x32xf32>
    %1 = vector.shape_cast %0 : vector<1x24x32xf32> to vector<24x32xf32>
    %c0_2 = arith.constant 0 : index
    %c0_3 = arith.constant 0 : index
    %2 = vector.load %arg2[%c0_2, %c0_3] : memref<1x32xf32, #tpu.memory_space<vmem>>, vector<1x32xf32>
    %c0_4 = arith.constant 0 : index
    %c0_5 = arith.constant 0 : index
    %3 = vector.load %arg3[%c0_4, %c0_5] : memref<1x32xf32, #tpu.memory_space<vmem>>, vector<1x32xf32>
    %cst = arith.constant dense<0.000000e+00> : vector<24xf32>
    %4 = vector.multi_reduction <add>, %1, %cst [1] : vector<24x32xf32> to vector<24xf32>
    %5 = vector.shape_cast %4 : vector<24xf32> to vector<24x1xf32>
    %cst_6 = arith.constant 3.200000e+01 : f32
    %6 = vector.broadcast %cst_6 : f32 to vector<24x1xf32>
    %7 = arith.divf %5, %6 : vector<24x1xf32>
    %8 = vector.broadcast %7 : vector<24x1xf32> to vector<24x32xf32>
    %9 = arith.subf %1, %8 : vector<24x32xf32>
    %10 = arith.mulf %9, %9 : vector<24x32xf32>
    %cst_7 = arith.constant dense<0.000000e+00> : vector<24xf32>
    %11 = vector.multi_reduction <add>, %10, %cst_7 [1] : vector<24x32xf32> to vector<24xf32>
    %12 = vector.shape_cast %11 : vector<24xf32> to vector<24x1xf32>
    %cst_8 = arith.constant 3.200000e+01 : f32
    %13 = vector.broadcast %cst_8 : f32 to vector<24x1xf32>
    %14 = arith.divf %12, %13 : vector<24x1xf32>
    %cst_9 = arith.constant 9.99999974E-6 : f32
    %15 = vector.broadcast %cst_9 : f32 to vector<24x1xf32>
    %16 = arith.addf %14, %15 : vector<24x1xf32>
    %17 = math.rsqrt %16 : vector<24x1xf32>
    %18 = vector.broadcast %17 : vector<24x1xf32> to vector<24x32xf32>
    %19 = arith.mulf %9, %18 : vector<24x32xf32>
    %20 = vector.broadcast %2 : vector<1x32xf32> to vector<24x32xf32>
    %21 = arith.mulf %19, %20 : vector<24x32xf32>
    %22 = vector.broadcast %3 : vector<1x32xf32> to vector<24x32xf32>
    %23 = arith.addf %21, %22 : vector<24x32xf32>
    %24 = tpu.iota {dimensions = array<i32: 1>} : vector<24x24xi32>
    %c17_i32 = arith.constant 17 : i32
    %25 = vector.broadcast %c17_i32 : i32 to vector<24x24xi32>
    %26 = arith.cmpi slt, %24, %25 : vector<24x24xi32>
    %cst_10 = arith.constant 0.000000e+00 : f32
    %cst_11 = arith.constant -1.000000e+30 : f32
    %27 = vector.broadcast %cst_10 : f32 to vector<24x24xf32>
    %28 = vector.broadcast %cst_11 : f32 to vector<24x24xf32>
    %29 = arith.select %26, %27, %28 : vector<24x24xi1>, vector<24x24xf32>
    %cst_12 = arith.constant 0.000000e+00 : f32
    %30 = vector.broadcast %cst_12 : f32 to vector<24x32xf32>
    %c0_13 = arith.constant 0 : index
    %c0_14 = arith.constant 0 : index
    %c0_15 = arith.constant 0 : index
    %31 = vector.load %arg4[%c0_13, %c0_14, %c0_15] : memref<4x32x8xf32, #tpu.memory_space<vmem>>, vector<1x32x8xf32>
    %32 = vector.shape_cast %31 : vector<1x32x8xf32> to vector<32x8xf32>
    %cst_16 = arith.constant dense<0.000000e+00> : vector<24x8xf32>
    %33 = tpu.matmul %23, %32, %cst_16 {dimension_numbers = #tpu.dot_dimension_numbers<[1], [0], [0], [1], [0, 0, 1, 1], [], []>} : vector<24x32xf32>, vector<32x8xf32>, vector<24x8xf32> -> vector<24x8xf32>
    %c0_17 = arith.constant 0 : index
    %c0_18 = arith.constant 0 : index
    %c0_19 = arith.constant 0 : index
    %34 = vector.load %arg5[%c0_17, %c0_18, %c0_19] : memref<4x32x8xf32, #tpu.memory_space<vmem>>, vector<1x32x8xf32>
    %35 = vector.shape_cast %34 : vector<1x32x8xf32> to vector<32x8xf32>
    %cst_20 = arith.constant dense<0.000000e+00> : vector<24x8xf32>
    %36 = tpu.matmul %23, %35, %cst_20 {dimension_numbers = #tpu.dot_dimension_numbers<[1], [0], [0], [1], [0, 0, 1, 1], [], []>} : vector<24x32xf32>, vector<32x8xf32>, vector<24x8xf32> -> vector<24x8xf32>
    %c0_21 = arith.constant 0 : index
    %c0_22 = arith.constant 0 : index
    %c0_23 = arith.constant 0 : index
    %37 = vector.load %arg6[%c0_21, %c0_22, %c0_23] : memref<4x32x8xf32, #tpu.memory_space<vmem>>, vector<1x32x8xf32>
    %38 = vector.shape_cast %37 : vector<1x32x8xf32> to vector<32x8xf32>
    %cst_24 = arith.constant dense<0.000000e+00> : vector<24x8xf32>
    %39 = tpu.matmul %23, %38, %cst_24 {dimension_numbers = #tpu.dot_dimension_numbers<[1], [0], [0], [1], [0, 0, 1, 1], [], []>} : vector<24x32xf32>, vector<32x8xf32>, vector<24x8xf32> -> vector<24x8xf32>
    %cst_25 = arith.constant dense<0.000000e+00> : vector<24x24xf32>
    %40 = tpu.matmul %33, %36, %cst_25 {dimension_numbers = #tpu.dot_dimension_numbers<[1], [1], [0], [0], [0, 0, 1, 0], [], []>} : vector<24x8xf32>, vector<24x8xf32>, vector<24x24xf32> -> vector<24x24xf32>
    %cst_26 = arith.constant 0.353553385 : f32
    %41 = vector.broadcast %cst_26 : f32 to vector<24x24xf32>
    %42 = arith.mulf %40, %41 : vector<24x24xf32>
    %43 = arith.addf %42, %29 : vector<24x24xf32>
    %cst_27 = arith.constant dense<0xFF800000> : vector<24xf32>
    %44 = vector.multi_reduction <maximumf>, %43, %cst_27 [1] : vector<24x24xf32> to vector<24xf32>
    %45 = vector.shape_cast %44 : vector<24xf32> to vector<24x1xf32>
    %46 = vector.broadcast %45 : vector<24x1xf32> to vector<24x24xf32>
    %47 = arith.subf %43, %46 : vector<24x24xf32>
    %48 = math.exp %47 : vector<24x24xf32>
    %cst_28 = arith.constant dense<0.000000e+00> : vector<24xf32>
    %49 = vector.multi_reduction <add>, %48, %cst_28 [1] : vector<24x24xf32> to vector<24xf32>
    %50 = vector.shape_cast %49 : vector<24xf32> to vector<24x1xf32>
    %51 = tpu.reciprocal %50 {approx = true} : vector<24x1xf32> -> vector<24x1xf32>
    %52 = vector.broadcast %51 : vector<24x1xf32> to vector<24x24xf32>
    %53 = arith.mulf %48, %52 : vector<24x24xf32>
    %cst_29 = arith.constant dense<0.000000e+00> : vector<24x8xf32>
    %54 = tpu.matmul %53, %39, %cst_29 {dimension_numbers = #tpu.dot_dimension_numbers<[1], [0], [0], [1], [0, 0, 1, 1], [], []>} : vector<24x24xf32>, vector<24x8xf32>, vector<24x8xf32> -> vector<24x8xf32>
    %c0_30 = arith.constant 0 : index
    %c0_31 = arith.constant 0 : index
    %c0_32 = arith.constant 0 : index
    %55 = vector.load %arg7[%c0_30, %c0_31, %c0_32] : memref<4x8x32xf32, #tpu.memory_space<vmem>>, vector<1x8x32xf32>
    %56 = vector.shape_cast %55 : vector<1x8x32xf32> to vector<8x32xf32>
    %cst_33 = arith.constant dense<0.000000e+00> : vector<24x32xf32>
    %57 = tpu.matmul %54, %56, %cst_33 {dimension_numbers = #tpu.dot_dimension_numbers<[1], [0], [0], [1], [0, 0, 1, 1], [], []>} : vector<24x8xf32>, vector<8x32xf32>, vector<24x32xf32> -> vector<24x32xf32>
    %58 = arith.addf %30, %57 : vector<24x32xf32>
    %c1 = arith.constant 1 : index
    %c0_34 = arith.constant 0 : index
    %c0_35 = arith.constant 0 : index
    %59 = vector.load %arg4[%c1, %c0_34, %c0_35] : memref<4x32x8xf32, #tpu.memory_space<vmem>>, vector<1x32x8xf32>
    %60 = vector.shape_cast %59 : vector<1x32x8xf32> to vector<32x8xf32>
    %cst_36 = arith.constant dense<0.000000e+00> : vector<24x8xf32>
    %61 = tpu.matmul %23, %60, %cst_36 {dimension_numbers = #tpu.dot_dimension_numbers<[1], [0], [0], [1], [0, 0, 1, 1], [], []>} : vector<24x32xf32>, vector<32x8xf32>, vector<24x8xf32> -> vector<24x8xf32>
    %c1_37 = arith.constant 1 : index
    %c0_38 = arith.constant 0 : index
    %c0_39 = arith.constant 0 : index
    %62 = vector.load %arg5[%c1_37, %c0_38, %c0_39] : memref<4x32x8xf32, #tpu.memory_space<vmem>>, vector<1x32x8xf32>
    %63 = vector.shape_cast %62 : vector<1x32x8xf32> to vector<32x8xf32>
    %cst_40 = arith.constant dense<0.000000e+00> : vector<24x8xf32>
    %64 = tpu.matmul %23, %63, %cst_40 {dimension_numbers = #tpu.dot_dimension_numbers<[1], [0], [0], [1], [0, 0, 1, 1], [], []>} : vector<24x32xf32>, vector<32x8xf32>, vector<24x8xf32> -> vector<24x8xf32>
    %c1_41 = arith.constant 1 : index
    %c0_42 = arith.constant 0 : index
    %c0_43 = arith.constant 0 : index
    %65 = vector.load %arg6[%c1_41, %c0_42, %c0_43] : memref<4x32x8xf32, #tpu.memory_space<vmem>>, vector<1x32x8xf32>
    %66 = vector.shape_cast %65 : vector<1x32x8xf32> to vector<32x8xf32>
    %cst_44 = arith.constant dense<0.000000e+00> : vector<24x8xf32>
    %67 = tpu.matmul %23, %66, %cst_44 {dimension_numbers = #tpu.dot_dimension_numbers<[1], [0], [0], [1], [0, 0, 1, 1], [], []>} : vector<24x32xf32>, vector<32x8xf32>, vector<24x8xf32> -> vector<24x8xf32>
    %cst_45 = arith.constant dense<0.000000e+00> : vector<24x24xf32>
    %68 = tpu.matmul %61, %64, %cst_45 {dimension_numbers = #tpu.dot_dimension_numbers<[1], [1], [0], [0], [0, 0, 1, 0], [], []>} : vector<24x8xf32>, vector<24x8xf32>, vector<24x24xf32> -> vector<24x24xf32>
    %cst_46 = arith.constant 0.353553385 : f32
    %69 = vector.broadcast %cst_46 : f32 to vector<24x24xf32>
    %70 = arith.mulf %68, %69 : vector<24x24xf32>
    %71 = arith.addf %70, %29 : vector<24x24xf32>
    %cst_47 = arith.constant dense<0xFF800000> : vector<24xf32>
    %72 = vector.multi_reduction <maximumf>, %71, %cst_47 [1] : vector<24x24xf32> to vector<24xf32>
    %73 = vector.shape_cast %72 : vector<24xf32> to vector<24x1xf32>
    %74 = vector.broadcast %73 : vector<24x1xf32> to vector<24x24xf32>
    %75 = arith.subf %71, %74 : vector<24x24xf32>
    %76 = math.exp %75 : vector<24x24xf32>
    %cst_48 = arith.constant dense<0.000000e+00> : vector<24xf32>
    %77 = vector.multi_reduction <add>, %76, %cst_48 [1] : vector<24x24xf32> to vector<24xf32>
    %78 = vector.shape_cast %77 : vector<24xf32> to vector<24x1xf32>
    %79 = tpu.reciprocal %78 {approx = true} : vector<24x1xf32> -> vector<24x1xf32>
    %80 = vector.broadcast %79 : vector<24x1xf32> to vector<24x24xf32>
    %81 = arith.mulf %76, %80 : vector<24x24xf32>
    %cst_49 = arith.constant dense<0.000000e+00> : vector<24x8xf32>
    %82 = tpu.matmul %81, %67, %cst_49 {dimension_numbers = #tpu.dot_dimension_numbers<[1], [0], [0], [1], [0, 0, 1, 1], [], []>} : vector<24x24xf32>, vector<24x8xf32>, vector<24x8xf32> -> vector<24x8xf32>
    %c1_50 = arith.constant 1 : index
    %c0_51 = arith.constant 0 : index
    %c0_52 = arith.constant 0 : index
    %83 = vector.load %arg7[%c1_50, %c0_51, %c0_52] : memref<4x8x32xf32, #tpu.memory_space<vmem>>, vector<1x8x32xf32>
    %84 = vector.shape_cast %83 : vector<1x8x32xf32> to vector<8x32xf32>
    %cst_53 = arith.constant dense<0.000000e+00> : vector<24x32xf32>
    %85 = tpu.matmul %82, %84, %cst_53 {dimension_numbers = #tpu.dot_dimension_numbers<[1], [0], [0], [1], [0, 0, 1, 1], [], []>} : vector<24x8xf32>, vector<8x32xf32>, vector<24x32xf32> -> vector<24x32xf32>
    %86 = arith.addf %58, %85 : vector<24x32xf32>
    %c2 = arith.constant 2 : index
    %c0_54 = arith.constant 0 : index
    %c0_55 = arith.constant 0 : index
    %87 = vector.load %arg4[%c2, %c0_54, %c0_55] : memref<4x32x8xf32, #tpu.memory_space<vmem>>, vector<1x32x8xf32>
    %88 = vector.shape_cast %87 : vector<1x32x8xf32> to vector<32x8xf32>
    %cst_56 = arith.constant dense<0.000000e+00> : vector<24x8xf32>
    %89 = tpu.matmul %23, %88, %cst_56 {dimension_numbers = #tpu.dot_dimension_numbers<[1], [0], [0], [1], [0, 0, 1, 1], [], []>} : vector<24x32xf32>, vector<32x8xf32>, vector<24x8xf32> -> vector<24x8xf32>
    %c2_57 = arith.constant 2 : index
    %c0_58 = arith.constant 0 : index
    %c0_59 = arith.constant 0 : index
    %90 = vector.load %arg5[%c2_57, %c0_58, %c0_59] : memref<4x32x8xf32, #tpu.memory_space<vmem>>, vector<1x32x8xf32>
    %91 = vector.shape_cast %90 : vector<1x32x8xf32> to vector<32x8xf32>
    %cst_60 = arith.constant dense<0.000000e+00> : vector<24x8xf32>
    %92 = tpu.matmul %23, %91, %cst_60 {dimension_numbers = #tpu.dot_dimension_numbers<[1], [0], [0], [1], [0, 0, 1, 1], [], []>} : vector<24x32xf32>, vector<32x8xf32>, vector<24x8xf32> -> vector<24x8xf32>
    %c2_61 = arith.constant 2 : index
    %c0_62 = arith.constant 0 : index
    %c0_63 = arith.constant 0 : index
    %93 = vector.load %arg6[%c2_61, %c0_62, %c0_63] : memref<4x32x8xf32, #tpu.memory_space<vmem>>, vector<1x32x8xf32>
    %94 = vector.shape_cast %93 : vector<1x32x8xf32> to vector<32x8xf32>
    %cst_64 = arith.constant dense<0.000000e+00> : vector<24x8xf32>
    %95 = tpu.matmul %23, %94, %cst_64 {dimension_numbers = #tpu.dot_dimension_numbers<[1], [0], [0], [1], [0, 0, 1, 1], [], []>} : vector<24x32xf32>, vector<32x8xf32>, vector<24x8xf32> -> vector<24x8xf32>
    %cst_65 = arith.constant dense<0.000000e+00> : vector<24x24xf32>
    %96 = tpu.matmul %89, %92, %cst_65 {dimension_numbers = #tpu.dot_dimension_numbers<[1], [1], [0], [0], [0, 0, 1, 0], [], []>} : vector<24x8xf32>, vector<24x8xf32>, vector<24x24xf32> -> vector<24x24xf32>
    %cst_66 = arith.constant 0.353553385 : f32
    %97 = vector.broadcast %cst_66 : f32 to vector<24x24xf32>
    %98 = arith.mulf %96, %97 : vector<24x24xf32>
    %99 = arith.addf %98, %29 : vector<24x24xf32>
    %cst_67 = arith.constant dense<0xFF800000> : vector<24xf32>
    %100 = vector.multi_reduction <maximumf>, %99, %cst_67 [1] : vector<24x24xf32> to vector<24xf32>
    %101 = vector.shape_cast %100 : vector<24xf32> to vector<24x1xf32>
    %102 = vector.broadcast %101 : vector<24x1xf32> to vector<24x24xf32>
    %103 = arith.subf %99, %102 : vector<24x24xf32>
    %104 = math.exp %103 : vector<24x24xf32>
    %cst_68 = arith.constant dense<0.000000e+00> : vector<24xf32>
    %105 = vector.multi_reduction <add>, %104, %cst_68 [1] : vector<24x24xf32> to vector<24xf32>
    %106 = vector.shape_cast %105 : vector<24xf32> to vector<24x1xf32>
    %107 = tpu.reciprocal %106 {approx = true} : vector<24x1xf32> -> vector<24x1xf32>
    %108 = vector.broadcast %107 : vector<24x1xf32> to vector<24x24xf32>
    %109 = arith.mulf %104, %108 : vector<24x24xf32>
    %cst_69 = arith.constant dense<0.000000e+00> : vector<24x8xf32>
    %110 = tpu.matmul %109, %95, %cst_69 {dimension_numbers = #tpu.dot_dimension_numbers<[1], [0], [0], [1], [0, 0, 1, 1], [], []>} : vector<24x24xf32>, vector<24x8xf32>, vector<24x8xf32> -> vector<24x8xf32>
    %c2_70 = arith.constant 2 : index
    %c0_71 = arith.constant 0 : index
    %c0_72 = arith.constant 0 : index
    %111 = vector.load %arg7[%c2_70, %c0_71, %c0_72] : memref<4x8x32xf32, #tpu.memory_space<vmem>>, vector<1x8x32xf32>
    %112 = vector.shape_cast %111 : vector<1x8x32xf32> to vector<8x32xf32>
    %cst_73 = arith.constant dense<0.000000e+00> : vector<24x32xf32>
    %113 = tpu.matmul %110, %112, %cst_73 {dimension_numbers = #tpu.dot_dimension_numbers<[1], [0], [0], [1], [0, 0, 1, 1], [], []>} : vector<24x8xf32>, vector<8x32xf32>, vector<24x32xf32> -> vector<24x32xf32>
    %114 = arith.addf %86, %113 : vector<24x32xf32>
    %c3 = arith.constant 3 : index
    %c0_74 = arith.constant 0 : index
    %c0_75 = arith.constant 0 : index
    %115 = vector.load %arg4[%c3, %c0_74, %c0_75] : memref<4x32x8xf32, #tpu.memory_space<vmem>>, vector<1x32x8xf32>
    %116 = vector.shape_cast %115 : vector<1x32x8xf32> to vector<32x8xf32>
    %cst_76 = arith.constant dense<0.000000e+00> : vector<24x8xf32>
    %117 = tpu.matmul %23, %116, %cst_76 {dimension_numbers = #tpu.dot_dimension_numbers<[1], [0], [0], [1], [0, 0, 1, 1], [], []>} : vector<24x32xf32>, vector<32x8xf32>, vector<24x8xf32> -> vector<24x8xf32>
    %c3_77 = arith.constant 3 : index
    %c0_78 = arith.constant 0 : index
    %c0_79 = arith.constant 0 : index
    %118 = vector.load %arg5[%c3_77, %c0_78, %c0_79] : memref<4x32x8xf32, #tpu.memory_space<vmem>>, vector<1x32x8xf32>
    %119 = vector.shape_cast %118 : vector<1x32x8xf32> to vector<32x8xf32>
    %cst_80 = arith.constant dense<0.000000e+00> : vector<24x8xf32>
    %120 = tpu.matmul %23, %119, %cst_80 {dimension_numbers = #tpu.dot_dimension_numbers<[1], [0], [0], [1], [0, 0, 1, 1], [], []>} : vector<24x32xf32>, vector<32x8xf32>, vector<24x8xf32> -> vector<24x8xf32>
    %c3_81 = arith.constant 3 : index
    %c0_82 = arith.constant 0 : index
    %c0_83 = arith.constant 0 : index
    %121 = vector.load %arg6[%c3_81, %c0_82, %c0_83] : memref<4x32x8xf32, #tpu.memory_space<vmem>>, vector<1x32x8xf32>
    %122 = vector.shape_cast %121 : vector<1x32x8xf32> to vector<32x8xf32>
    %cst_84 = arith.constant dense<0.000000e+00> : vector<24x8xf32>
    %123 = tpu.matmul %23, %122, %cst_84 {dimension_numbers = #tpu.dot_dimension_numbers<[1], [0], [0], [1], [0, 0, 1, 1], [], []>} : vector<24x32xf32>, vector<32x8xf32>, vector<24x8xf32> -> vector<24x8xf32>
    %cst_85 = arith.constant dense<0.000000e+00> : vector<24x24xf32>
    %124 = tpu.matmul %117, %120, %cst_85 {dimension_numbers = #tpu.dot_dimension_numbers<[1], [1], [0], [0], [0, 0, 1, 0], [], []>} : vector<24x8xf32>, vector<24x8xf32>, vector<24x24xf32> -> vector<24x24xf32>
    %cst_86 = arith.constant 0.353553385 : f32
    %125 = vector.broadcast %cst_86 : f32 to vector<24x24xf32>
    %126 = arith.mulf %124, %125 : vector<24x24xf32>
    %127 = arith.addf %126, %29 : vector<24x24xf32>
    %cst_87 = arith.constant dense<0xFF800000> : vector<24xf32>
    %128 = vector.multi_reduction <maximumf>, %127, %cst_87 [1] : vector<24x24xf32> to vector<24xf32>
    %129 = vector.shape_cast %128 : vector<24xf32> to vector<24x1xf32>
    %130 = vector.broadcast %129 : vector<24x1xf32> to vector<24x24xf32>
    %131 = arith.subf %127, %130 : vector<24x24xf32>
    %132 = math.exp %131 : vector<24x24xf32>
    %cst_88 = arith.constant dense<0.000000e+00> : vector<24xf32>
    %133 = vector.multi_reduction <add>, %132, %cst_88 [1] : vector<24x24xf32> to vector<24xf32>
    %134 = vector.shape_cast %133 : vector<24xf32> to vector<24x1xf32>
    %135 = tpu.reciprocal %134 {approx = true} : vector<24x1xf32> -> vector<24x1xf32>
    %136 = vector.broadcast %135 : vector<24x1xf32> to vector<24x24xf32>
    %137 = arith.mulf %132, %136 : vector<24x24xf32>
    %cst_89 = arith.constant dense<0.000000e+00> : vector<24x8xf32>
    %138 = tpu.matmul %137, %123, %cst_89 {dimension_numbers = #tpu.dot_dimension_numbers<[1], [0], [0], [1], [0, 0, 1, 1], [], []>} : vector<24x24xf32>, vector<24x8xf32>, vector<24x8xf32> -> vector<24x8xf32>
    %c3_90 = arith.constant 3 : index
    %c0_91 = arith.constant 0 : index
    %c0_92 = arith.constant 0 : index
    %139 = vector.load %arg7[%c3_90, %c0_91, %c0_92] : memref<4x8x32xf32, #tpu.memory_space<vmem>>, vector<1x8x32xf32>
    %140 = vector.shape_cast %139 : vector<1x8x32xf32> to vector<8x32xf32>
    %cst_93 = arith.constant dense<0.000000e+00> : vector<24x32xf32>
    %141 = tpu.matmul %138, %140, %cst_93 {dimension_numbers = #tpu.dot_dimension_numbers<[1], [0], [0], [1], [0, 0, 1, 1], [], []>} : vector<24x8xf32>, vector<8x32xf32>, vector<24x32xf32> -> vector<24x32xf32>
    %142 = arith.addf %114, %141 : vector<24x32xf32>
    %143 = arith.addf %1, %142 : vector<24x32xf32>
    %c0_94 = arith.constant 0 : index
    %c0_95 = arith.constant 0 : index
    %144 = vector.load %arg8[%c0_94, %c0_95] : memref<1x32xf32, #tpu.memory_space<vmem>>, vector<1x32xf32>
    %145 = vector.broadcast %144 : vector<1x32xf32> to vector<24x32xf32>
    %146 = arith.addf %143, %145 : vector<24x32xf32>
    %c0_96 = arith.constant 0 : index
    %c0_97 = arith.constant 0 : index
    %c0_98 = arith.constant 0 : index
    %147 = vector.load %arg9[%c0_96, %c0_97, %c0_98] : memref<1x24x32xf32, #tpu.memory_space<vmem>>, vector<1x24x32xf32>
    %148 = vector.shape_cast %147 : vector<1x24x32xf32> to vector<24x32xf32>
    %149 = vector.shape_cast %146 : vector<24x32xf32> to vector<1x24x32xf32>
    tpu.vector_store %arg9[%c0_96, %c0_97, %c0_98], %149 {strides = array<i32>} : memref<1x24x32xf32, #tpu.memory_space<vmem>>, vector<1x24x32xf32>,
    return
  }
  func.func @transform_0(%arg0: i32) -> (i32, i32, i32) {
    %c0_i32 = arith.constant 0 : i32
    %c0_i32_0 = arith.constant 0 : i32
    %c0_i32_1 = arith.constant 0 : i32
    return %arg0, %c0_i32, %c0_i32_0 : i32, i32, i32
  }
  func.func @transform_1(%arg0: i32) -> (i32, i32) {
    %c0_i32 = arith.constant 0 : i32
    %c0_i32_0 = arith.constant 0 : i32
    %c0_i32_1 = arith.constant 0 : i32
    return %c0_i32, %c0_i32_0 : i32, i32
  }
  func.func @transform_2(%arg0: i32) -> (i32, i32) {
    %c0_i32 = arith.constant 0 : i32
    %c0_i32_0 = arith.constant 0 : i32
    %c0_i32_1 = arith.constant 0 : i32
    return %c0_i32, %c0_i32_0 : i32, i32
  }
  func.func @transform_3(%arg0: i32) -> (i32, i32, i32) {
    %c0_i32 = arith.constant 0 : i32
    %c0_i32_0 = arith.constant 0 : i32
    %c0_i32_1 = arith.constant 0 : i32
    %c0_i32_2 = arith.constant 0 : i32
    return %c0_i32, %c0_i32_0, %c0_i32_1 : i32, i32, i32
  }
  func.func @transform_4(%arg0: i32) -> (i32, i32, i32) {
    %c0_i32 = arith.constant 0 : i32
    %c0_i32_0 = arith.constant 0 : i32
    %c0_i32_1 = arith.constant 0 : i32
    %c0_i32_2 = arith.constant 0 : i32
    return %c0_i32, %c0_i32_0, %c0_i32_1 : i32, i32, i32
  }
  func.func @transform_5(%arg0: i32) -> (i32, i32, i32) {
    %c0_i32 = arith.constant 0 : i32
    %c0_i32_0 = arith.constant 0 : i32
    %c0_i32_1 = arith.constant 0 : i32
    %c0_i32_2 = arith.constant 0 : i32
    return %c0_i32, %c0_i32_0, %c0_i32_1 : i32, i32, i32
  }
  func.func @transform_6(%arg0: i32) -> (i32, i32, i32) {
    %c0_i32 = arith.constant 0 : i32
    %c0_i32_0 = arith.constant 0 : i32
    %c0_i32_1 = arith.constant 0 : i32
    %c0_i32_2 = arith.constant 0 : i32
    return %c0_i32, %c0_i32_0, %c0_i32_1 : i32, i32, i32
  }
  func.func @transform_7(%arg0: i32) -> (i32, i32) {
    %c0_i32 = arith.constant 0 : i32
    %c0_i32_0 = arith.constant 0 : i32
    %c0_i32_1 = arith.constant 0 : i32
    return %c0_i32, %c0_i32_0 : i32, i32
  }
  func.func @transform_8(%arg0: i32) -> (i32, i32, i32) {
    %c0_i32 = arith.constant 0 : i32
    %c0_i32_0 = arith.constant 0 : i32
    %c0_i32_1 = arith.constant 0 : i32
    return %arg0, %c0_i32, %c0_i32_0 : i32, i32, i32
  }
}

module attributes {stable_mosaic.version = 11 : i64} {
  func.func @_ff_block_kernel(%arg0: i32, %arg1: memref<1x24x32xf32, #tpu.memory_space<vmem>>, %arg2: memref<1x32xf32, #tpu.memory_space<vmem>>, %arg3: memref<1x32xf32, #tpu.memory_space<vmem>>, %arg4: memref<32x64xf32, #tpu.memory_space<vmem>>, %arg5: memref<1x64xf32, #tpu.memory_space<vmem>>, %arg6: memref<64x32xf32, #tpu.memory_space<vmem>>, %arg7: memref<1x32xf32, #tpu.memory_space<vmem>>, %arg8: memref<1x24x32xf32, #tpu.memory_space<vmem>>) attributes {dimension_semantics = [#tpu.dimension_semantics<parallel>], iteration_bounds = array<i64: 2>, scalar_prefetch = 0 : i64, scratch_operands = 0 : i64, tpu.core_type = #tpu.core_type<tc>, window_params = [{transform_indices = @transform_0, window_bounds = array<i64: 1, 24, 32>}, {pipeline_mode = #tpu.pipeline_mode<synchronous>, transform_indices = @transform_1, window_bounds = array<i64: 1, 32>}, {pipeline_mode = #tpu.pipeline_mode<synchronous>, transform_indices = @transform_2, window_bounds = array<i64: 1, 32>}, {pipeline_mode = #tpu.pipeline_mode<synchronous>, transform_indices = @transform_3, window_bounds = array<i64: 32, 64>}, {pipeline_mode = #tpu.pipeline_mode<synchronous>, transform_indices = @transform_4, window_bounds = array<i64: 1, 64>}, {pipeline_mode = #tpu.pipeline_mode<synchronous>, transform_indices = @transform_5, window_bounds = array<i64: 64, 32>}, {pipeline_mode = #tpu.pipeline_mode<synchronous>, transform_indices = @transform_6, window_bounds = array<i64: 1, 32>}, {transform_indices = @transform_7, window_bounds = array<i64: 1, 24, 32>}]} {
    %c0 = arith.constant 0 : index
    %c0_0 = arith.constant 0 : index
    %c0_1 = arith.constant 0 : index
    %0 = vector.load %arg1[%c0, %c0_0, %c0_1] : memref<1x24x32xf32, #tpu.memory_space<vmem>>, vector<1x24x32xf32>
    %1 = vector.shape_cast %0 : vector<1x24x32xf32> to vector<24x32xf32>
    %c0_2 = arith.constant 0 : index
    %c0_3 = arith.constant 0 : index
    %2 = vector.load %arg2[%c0_2, %c0_3] : memref<1x32xf32, #tpu.memory_space<vmem>>, vector<1x32xf32>
    %c0_4 = arith.constant 0 : index
    %c0_5 = arith.constant 0 : index
    %3 = vector.load %arg3[%c0_4, %c0_5] : memref<1x32xf32, #tpu.memory_space<vmem>>, vector<1x32xf32>
    %cst = arith.constant dense<0.000000e+00> : vector<24xf32>
    %4 = vector.multi_reduction <add>, %1, %cst [1] : vector<24x32xf32> to vector<24xf32>
    %5 = vector.shape_cast %4 : vector<24xf32> to vector<24x1xf32>
    %cst_6 = arith.constant 3.200000e+01 : f32
    %6 = vector.broadcast %cst_6 : f32 to vector<24x1xf32>
    %7 = arith.divf %5, %6 : vector<24x1xf32>
    %8 = vector.broadcast %7 : vector<24x1xf32> to vector<24x32xf32>
    %9 = arith.subf %1, %8 : vector<24x32xf32>
    %10 = arith.mulf %9, %9 : vector<24x32xf32>
    %cst_7 = arith.constant dense<0.000000e+00> : vector<24xf32>
    %11 = vector.multi_reduction <add>, %10, %cst_7 [1] : vector<24x32xf32> to vector<24xf32>
    %12 = vector.shape_cast %11 : vector<24xf32> to vector<24x1xf32>
    %cst_8 = arith.constant 3.200000e+01 : f32
    %13 = vector.broadcast %cst_8 : f32 to vector<24x1xf32>
    %14 = arith.divf %12, %13 : vector<24x1xf32>
    %cst_9 = arith.constant 9.99999974E-6 : f32
    %15 = vector.broadcast %cst_9 : f32 to vector<24x1xf32>
    %16 = arith.addf %14, %15 : vector<24x1xf32>
    %17 = math.rsqrt %16 : vector<24x1xf32>
    %18 = vector.broadcast %17 : vector<24x1xf32> to vector<24x32xf32>
    %19 = arith.mulf %9, %18 : vector<24x32xf32>
    %20 = vector.broadcast %2 : vector<1x32xf32> to vector<24x32xf32>
    %21 = arith.mulf %19, %20 : vector<24x32xf32>
    %22 = vector.broadcast %3 : vector<1x32xf32> to vector<24x32xf32>
    %23 = arith.addf %21, %22 : vector<24x32xf32>
    %c0_10 = arith.constant 0 : index
    %c0_11 = arith.constant 0 : index
    %24 = vector.load %arg4[%c0_10, %c0_11] : memref<32x64xf32, #tpu.memory_space<vmem>>, vector<32x64xf32>
    %cst_12 = arith.constant dense<0.000000e+00> : vector<24x64xf32>
    %25 = tpu.matmul %23, %24, %cst_12 {dimension_numbers = #tpu.dot_dimension_numbers<[1], [0], [0], [1], [0, 0, 1, 1], [], []>} : vector<24x32xf32>, vector<32x64xf32>, vector<24x64xf32> -> vector<24x64xf32>
    %c0_13 = arith.constant 0 : index
    %c0_14 = arith.constant 0 : index
    %26 = vector.load %arg5[%c0_13, %c0_14] : memref<1x64xf32, #tpu.memory_space<vmem>>, vector<1x64xf32>
    %27 = vector.broadcast %26 : vector<1x64xf32> to vector<24x64xf32>
    %28 = arith.addf %25, %27 : vector<24x64xf32>
    %cst_15 = arith.constant 5.000000e-01 : f32
    %29 = vector.broadcast %cst_15 : f32 to vector<24x64xf32>
    %30 = arith.mulf %29, %28 : vector<24x64xf32>
    %cst_16 = arith.constant 0.707106769 : f32
    %31 = vector.broadcast %cst_16 : f32 to vector<24x64xf32>
    %32 = arith.mulf %28, %31 : vector<24x64xf32>
    %cst_17 = arith.constant 0.000000e+00 : f32
    %33 = vector.broadcast %cst_17 : f32 to vector<24x64xf32>
    %34 = arith.cmpf oge, %32, %33 : vector<24x64xf32>
    %cst_18 = arith.constant 1.000000e+00 : f32
    %cst_19 = arith.constant -1.000000e+00 : f32
    %35 = vector.broadcast %cst_18 : f32 to vector<24x64xf32>
    %36 = vector.broadcast %cst_19 : f32 to vector<24x64xf32>
    %37 = arith.select %34, %35, %36 : vector<24x64xi1>, vector<24x64xf32>
    %38 = math.absf %32 : vector<24x64xf32>
    %cst_20 = arith.constant 0.327591091 : f32
    %39 = vector.broadcast %cst_20 : f32 to vector<24x64xf32>
    %40 = arith.mulf %39, %38 : vector<24x64xf32>
    %cst_21 = arith.constant 1.000000e+00 : f32
    %41 = vector.broadcast %cst_21 : f32 to vector<24x64xf32>
    %42 = arith.addf %41, %40 : vector<24x64xf32>
    %cst_22 = arith.constant 1.000000e+00 : f32
    %43 = vector.broadcast %cst_22 : f32 to vector<24x64xf32>
    %44 = arith.divf %43, %42 : vector<24x64xf32>
    %cst_23 = arith.constant 1.06140542 : f32
    %45 = vector.broadcast %cst_23 : f32 to vector<24x64xf32>
    %46 = arith.mulf %45, %44 : vector<24x64xf32>
    %cst_24 = arith.constant -1.45315206 : f32
    %47 = vector.broadcast %cst_24 : f32 to vector<24x64xf32>
    %48 = arith.addf %46, %47 : vector<24x64xf32>
    %49 = arith.mulf %48, %44 : vector<24x64xf32>
    %cst_25 = arith.constant 1.42141378 : f32
    %50 = vector.broadcast %cst_25 : f32 to vector<24x64xf32>
    %51 = arith.addf %49, %50 : vector<24x64xf32>
    %52 = arith.mulf %51, %44 : vector<24x64xf32>
    %cst_26 = arith.constant -0.284496725 : f32
    %53 = vector.broadcast %cst_26 : f32 to vector<24x64xf32>
    %54 = arith.addf %52, %53 : vector<24x64xf32>
    %55 = arith.mulf %54, %44 : vector<24x64xf32>
    %cst_27 = arith.constant 0.254829586 : f32
    %56 = vector.broadcast %cst_27 : f32 to vector<24x64xf32>
    %57 = arith.addf %55, %56 : vector<24x64xf32>
    %58 = arith.mulf %57, %44 : vector<24x64xf32>
    %cst_28 = arith.constant 0.000000e+00 : f32
    %59 = vector.broadcast %cst_28 : f32 to vector<24x64xf32>
    %60 = arith.subf %59, %38 : vector<24x64xf32>
    %61 = arith.mulf %60, %38 : vector<24x64xf32>
    %62 = math.exp %61 : vector<24x64xf32>
    %63 = arith.mulf %58, %62 : vector<24x64xf32>
    %cst_29 = arith.constant 1.000000e+00 : f32
    %64 = vector.broadcast %cst_29 : f32 to vector<24x64xf32>
    %65 = arith.subf %64, %63 : vector<24x64xf32>
    %66 = arith.mulf %37, %65 : vector<24x64xf32>
    %cst_30 = arith.constant 1.000000e+00 : f32
    %67 = vector.broadcast %cst_30 : f32 to vector<24x64xf32>
    %68 = arith.addf %67, %66 : vector<24x64xf32>
    %69 = arith.mulf %30, %68 : vector<24x64xf32>
    %c0_31 = arith.constant 0 : index
    %c0_32 = arith.constant 0 : index
    %70 = vector.load %arg6[%c0_31, %c0_32] : memref<64x32xf32, #tpu.memory_space<vmem>>, vector<64x32xf32>
    %cst_33 = arith.constant dense<0.000000e+00> : vector<24x32xf32>
    %71 = tpu.matmul %69, %70, %cst_33 {dimension_numbers = #tpu.dot_dimension_numbers<[1], [0], [0], [1], [0, 0, 1, 1], [], []>} : vector<24x64xf32>, vector<64x32xf32>, vector<24x32xf32> -> vector<24x32xf32>
    %c0_34 = arith.constant 0 : index
    %c0_35 = arith.constant 0 : index
    %72 = vector.load %arg7[%c0_34, %c0_35] : memref<1x32xf32, #tpu.memory_space<vmem>>, vector<1x32xf32>
    %73 = vector.broadcast %72 : vector<1x32xf32> to vector<24x32xf32>
    %74 = arith.addf %71, %73 : vector<24x32xf32>
    %75 = arith.addf %1, %74 : vector<24x32xf32>
    %c0_36 = arith.constant 0 : index
    %c0_37 = arith.constant 0 : index
    %c0_38 = arith.constant 0 : index
    %76 = vector.load %arg8[%c0_36, %c0_37, %c0_38] : memref<1x24x32xf32, #tpu.memory_space<vmem>>, vector<1x24x32xf32>
    %77 = vector.shape_cast %76 : vector<1x24x32xf32> to vector<24x32xf32>
    %78 = vector.shape_cast %75 : vector<24x32xf32> to vector<1x24x32xf32>
    tpu.vector_store %arg8[%c0_36, %c0_37, %c0_38], %78 {strides = array<i32>} : memref<1x24x32xf32, #tpu.memory_space<vmem>>, vector<1x24x32xf32>,
    return
  }
  func.func @transform_0(%arg0: i32) -> (i32, i32, i32) {
    %c0_i32 = arith.constant 0 : i32
    %c0_i32_0 = arith.constant 0 : i32
    %c0_i32_1 = arith.constant 0 : i32
    return %arg0, %c0_i32, %c0_i32_0 : i32, i32, i32
  }
  func.func @transform_1(%arg0: i32) -> (i32, i32) {
    %c0_i32 = arith.constant 0 : i32
    %c0_i32_0 = arith.constant 0 : i32
    %c0_i32_1 = arith.constant 0 : i32
    return %c0_i32, %c0_i32_0 : i32, i32
  }
  func.func @transform_2(%arg0: i32) -> (i32, i32) {
    %c0_i32 = arith.constant 0 : i32
    %c0_i32_0 = arith.constant 0 : i32
    %c0_i32_1 = arith.constant 0 : i32
    return %c0_i32, %c0_i32_0 : i32, i32
  }
  func.func @transform_3(%arg0: i32) -> (i32, i32) {
    %c0_i32 = arith.constant 0 : i32
    %c0_i32_0 = arith.constant 0 : i32
    %c0_i32_1 = arith.constant 0 : i32
    return %c0_i32, %c0_i32_0 : i32, i32
  }
  func.func @transform_4(%arg0: i32) -> (i32, i32) {
    %c0_i32 = arith.constant 0 : i32
    %c0_i32_0 = arith.constant 0 : i32
    %c0_i32_1 = arith.constant 0 : i32
    return %c0_i32, %c0_i32_0 : i32, i32
  }
  func.func @transform_5(%arg0: i32) -> (i32, i32) {
    %c0_i32 = arith.constant 0 : i32
    %c0_i32_0 = arith.constant 0 : i32
    %c0_i32_1 = arith.constant 0 : i32
    return %c0_i32, %c0_i32_0 : i32, i32
  }
  func.func @transform_6(%arg0: i32) -> (i32, i32) {
    %c0_i32 = arith.constant 0 : i32
    %c0_i32_0 = arith.constant 0 : i32
    %c0_i32_1 = arith.constant 0 : i32
    return %c0_i32, %c0_i32_0 : i32, i32
  }
  func.func @transform_7(%arg0: i32) -> (i32, i32, i32) {
    %c0_i32 = arith.constant 0 : i32
    %c0_i32_0 = arith.constant 0 : i32
    %c0_i32_1 = arith.constant 0 : i32
    return %arg0, %c0_i32, %c0_i32_0 : i32, i32, i32
  }
}

</mosaic_0001>

<bundles_post_ra>
// kernel: vit_forward.9
= control target key start
LH: loop header
LB: loop body
LE: loop exit
PB: predicated region body
PF: predicated region fallthrough
CT: control target
= control target key end

     0   :  { %s521_s21 = smov 0   ;;  %s573_s0 = inlined_call_operand.vmem [shape: f32[2,16,48], index: 0, kind: input, shape index: {}]   ;;  %s574_s1 = inlined_call_operand.vmem [shape: f32[48,32], index: 1, kind: input, shape index: {}]   ;;  %s575_s2 = inlined_call_operand.vmem [shape: f32[1,32], index: 2, kind: input, shape index: {}]   ;;  %s576_s3 = inlined_call_operand.vmem [shape: f32[1,32], index: 3, kind: input, shape index: {}]   ;;  %s577_s4 = inlined_call_operand.vmem [shape: f32[1,32], index: 4, kind: input, shape index: {}]   ;;  %s578_s5 = inlined_call_operand.vmem [shape: f32[16,32], index: 5, kind: input, shape index: {}]   ;;  %s579_s6 = inlined_call_operand.vmem [shape: f32[2,24,32], index: 6, kind: output, shape index: {}]  }
   0x1 LB: > { %s418_s22 = sadd.s32 4294967295, %s483_s21   ;;  %p422_p0 = scmp.ge.s32.totalorder %s483_s21, 1  ;;  %s483_s21 = sphi %s521_s21, %s16_s21  }
   0x2   : > { %p212_p1 = scmp.lt.s32.totalorder %s483_s21, 3 }
   0x4   : > { %p213_p2 = pnand %p422_p0, %p212_p1 }
   0x5   : > { %v254_v0 = vld [vmem:[%s574_s1] sm:$0xff] (!%p213_p2)  ;;  %v255_v1 = vld [vmem:[%s574_s1 + $0x8] sm:$0xff] (!%p213_p2)  ;;  %v256_v2 = vld [vmem:[%s574_s1 + $0x10] sm:$0xff] (!%p213_p2)  ;;  %p242_p3 = scmp.lt.s32.totalorder (!%p213_p2), %s418_s22, 1  ;;  %vm267_vm0 = vcmask (!%p213_p2), 392192   ;;  %vm356_vm1 = vcmask (!%p213_p2), 253952  }
   0x6   : > { %216 = sbr.rel (%p213_p2) target bundleno = 238 (0xee), region = 44  ;;  %v455_v3 = vpack.c.bf16 (!%p213_p2), %v255_v1, %v254_v0  ;;  %v257_v4 = vld [vmem:[%s574_s1 + $0x18] sm:$0xff] (!%p213_p2)  ;;  %v258_v5 = vld [vmem:[%s574_s1 + $0x20] sm:$0xff] (!%p213_p2)  ;;  %v259_v7 = vld [vmem:[%s574_s1 + $0x28] sm:$0xff] (!%p213_p2)  ;;  %vm361_vm2 = vcmask (!%p213_p2), 260096   ;;  %v485_v13 = vmov (!%p213_p2), 0.0  }
   0x7   : > { %v459_v6 = vpack.c.bf16 (!%p213_p2), %v257_v4, %v256_v2  ;;  %v353_v8 = vld [vmem:[%s576_s3] sm:$0x1] (!%p213_p2)  ;;  %v463_v11 = vpack.c.bf16 (!%p213_p2), %v259_v7, %v258_v5  ;;  %v350_v17 = vld [vmem:[%s578_s5 + $0x8] sm:$0xff] (!%p213_p2)  ;;  %vm358_vm3 = vcmask (!%p213_p2), 261120  }
   0x8   : > { %v354_v9 = vld [vmem:[%s577_s4] sm:$0x1] (!%p213_p2)  ;;  %456 = vmatprep.subr.bf16.mxu0 (!%p213_p2), %v455_v3 }
   0x9   : > { %v355_v10 = vadd.f32 (!%p213_p2), %v354_v9, %v353_v8  ;;  %458 = vmatpush3.bf16.msra.mxu0 (!%p213_p2), %v455_v3  ;;  %v426_v15 = vld [vmem:[%s575_s2] ss:$0 sm:$0xff] (!%p213_p2) }
   0xa   : > { %460 = vmatprep.subr.bf16.mxu0 (!%p213_p2), %v459_v6  ;;  %v349_v20 = vld [vmem:[%s578_s5] sm:$0xff] (!%p213_p2) }
   0xd   : > { %s581_s22 = smov (!%p242_p3, %s418_s22), 1  ;;  %462 = vmatpush3.bf16.msra.mxu0 %v459_v6 }
   0xe   : > { %s431_s15 = sshll.u32 %s581_s22, 4  ;;  %s467_s16 = smul.u32 24, %s581_s22  ;;  %464 = vmatprep.subr.bf16.mxu0 %v463_v11 }
   0xf   : > { %s246_s19 = scalar_lea.vmem %s573_s0, %s431_s15 }
  0x10   : > { %s251_s24 = scalar_lea.vmem %s579_s6, %s467_s16  ;;  %v252_v12 = vld [vmem:[%s246_s19] sm:$0xff]  ;;  %v253_v14 = vld [vmem:[%s246_s19 + $0x8] sm:$0xff] }
  0x11   : > { %452 = vmatprep.mubr.msk.f32.mxu0 %vm267_vm0, %v252_v12  ;;  %357 = vst.msk [vmem:[%s251_s24] sm:$0x1] %vm356_vm1, %v355_v10  ;;  %466 = vmatpush3.bf16.msra.mxu0 %v463_v11 }
  0x12   : > { %362 = vst.msk [vmem:[%s251_s24 + $0x11] sm:$0x7f] %vm361_vm2, %v485_v13 }
  0x14   : > { %453 = vmatmul.mubr.msk.f32.vlgmr.msra.gmra.mrb[0].mxu0 %vm267_vm0, %v253_v14 }
  0xe7   : > { %v454_v16 = vpop.f32.mrb[0].mxu0 }
  0xe8   : > { %v346_v18 = vadd.f32 %v454_v16, %v426_v15  ;;  %v340_v19 = vpop.f32.mrb[1].mxu0 }
  0xe9   : > { %v341_v21 = vadd.f32 %v426_v15, %v340_v19 }
  0xea   : > { %v352_v22 = vadd.f32 %v350_v17, %v346_v18 }
  0xeb   : > { %v351_v23 = vadd.f32 %v349_v20, %v341_v21 }
  0xec   : > { %360 = vst.msk [vmem:[%s251_s24 + $0x9] sm:$0xff] %vm358_vm3, %v352_v22 }
  0xed   : > { %359 = vst.msk [vmem:[%s251_s24 + $0x1] sm:$0xff] %vm358_vm3, %v351_v23 }
  0xee PF: > { %s16_s21 = sadd.s32 1, %s483_s21  }
  0xef   : > { %p13_p4 = scmp.ge.s32.totalorder %s16_s21, 4  }
  0xf1   :  { %15 = sbr.rel (!%p13_p4) target bundleno = 1 (0x1), region = 74 }

// kernel: vit_forward.8
= control target key start
LH: loop header
LB: loop body
LE: loop exit
PB: predicated region body
PF: predicated region fallthrough
CT: control target
= control target key end

     0   :  { %s4888_s12 = smov 0   ;;  %s6307_s0 = inlined_call_operand.vmem [shape: f32[2,18,18,64], index: 0, kind: input, shape index: {}]   ;;  %s6308_s1 = inlined_call_operand.vmem [shape: f32[9,64,3], index: 1, kind: input, shape index: {}]   ;;  %s6309_s2 = inlined_call_operand.vmem [shape: f32[1,3], index: 2, kind: input, shape index: {}]   ;;  %s6310_s3 = inlined_call_operand.vmem [shape: f32[2,256,3], index: 3, kind: output, shape index: {}]  }
   0x1 LB: > { %s3134_s13 = sadd.s32 4294967295, %s4866_s12   ;;  %p3138_p0 = scmp.ge.s32.totalorder %s4866_s12, 1  ;;  %s4866_s12 = sphi %s4888_s12, %s13_s12  }
   0x2   : > { %p137_p1 = scmp.lt.s32.totalorder %s4866_s12, 3 }
   0x4   : > { %p138_p2 = pnand %p3138_p0, %p137_p1 }
   0x6   : > { %141 = sbr.rel (%p138_p2) target bundleno = 535 (0x217), region = 32 }
   0xd   : > { %v3142_v0 = vld [vmem:[%s6308_s1 + $0x40] sm:$0xff]  ;;  %v3143_v1 = vld [vmem:[%s6308_s1 + $0x48] sm:$0xff]  ;;  %p161_p3 = scmp.lt.s32.totalorder %s3134_s13, 1  ;;  %v3144_v5 = vld [vmem:[%s6308_s1 + $0x50] sm:$0xff]  ;;  %vm281_vm0 = vcmask 1046528   ;;  %vm371_vm1 = vcmask 523264  }
   0xe   : > { %v3294_v2 = vld [vmem:[%s6308_s1 + $0x100] sm:$0xff]  ;;  %v4434_v3 = vpack.c.bf16 %v3143_v1, %v3142_v0  ;;  %v3295_v4 = vld [vmem:[%s6308_s1 + $0x108] sm:$0xff]  ;;  %v3145_v6 = vld [vmem:[%s6308_s1 + $0x58] sm:$0xff]  ;;  %vm950_vm2 = vcmask 1045504   ;;  %vm3046_vm3 = vcmask 23552  }
   0xf   : > { %v4914_v7 = vpack.c.bf16 %v3295_v4, %v3294_v2  ;;  %v4438_v8 = vpack.c.bf16 %v3145_v6, %v3144_v5  ;;  %v3296_v9 = vld [vmem:[%s6308_s1 + $0x110] sm:$0xff]  ;;  %v3297_v10 = vld [vmem:[%s6308_s1 + $0x118] sm:$0xff]  ;;  %v3146_v11 = vld [vmem:[%s6308_s1 + $0x60] sm:$0xff]  ;;  %s6488_s13 = smov (!%p161_p3, %s3134_s13), 1 }
  0x10   : > { %4435 = vmatprep.subr.bf16.mxu1 %v4434_v3  ;;  %v4927_v12 = vpack.c.bf16 %v3297_v10, %v3296_v9  ;;  %v3147_v13 = vld [vmem:[%s6308_s1 + $0x68] sm:$0xff]  ;;  %v3298_v14 = vld [vmem:[%s6308_s1 + $0x120] sm:$0xff]  ;;  %s4842_s11 = smul.u32 432, %s6488_s13  ;;  %v3148_v17 = vld [vmem:[%s6308_s1 + $0x70] sm:$0xff] }
  0x11   : > { %6386 = vst [vmem:[#allocation2_spill] sm:$0xff] %v4914_v7  ;;  %v3299_v15 = vld [vmem:[%s6308_s1 + $0x128] sm:$0xff]  ;;  %4499 = vmatprep.subr.bf16.mxu0 %v4914_v7  ;;  %4437 = vmatpush3.bf16.msra.mxu1 %v4434_v3  ;;  %v4442_v16 = vpack.c.bf16 %v3147_v13, %v3146_v11  ;;  %v3149_v19 = vld [vmem:[%s6308_s1 + $0x78] sm:$0xff]  ;;  %v3300_v20 = vld [vmem:[%s6308_s1 + $0x130] sm:$0xff] }
  0x12   : > { %6387 = vst [vmem:[#allocation3_spill] sm:$0xff] %v4927_v12  ;;  %4501 = vmatpush3.bf16.msra.mxu0 %v4914_v7  ;;  %4439 = vmatprep.subr.bf16.mxu1 %v4438_v8  ;;  %v4945_v18 = vpack.c.bf16 %v3299_v15, %v3298_v14  ;;  %v3301_v21 = vld [vmem:[%s6308_s1 + $0x138] sm:$0xff]  ;;  %s4959_s24 = scalar_lea.vmem %s6307_s0, %s4842_s11  ;;  %v4446_v29 = vpack.c.bf16 %v3149_v19, %v3148_v17  ;;  %v225_v34 = vld [vmem:[%s6308_s1] sm:$0xff]  ;;  %v226_v35 = vld [vmem:[%s6308_s1 + $0x8] sm:$0xff] }
  0x13   : > { %4503 = vmatprep.subr.bf16.mxu0 %v4927_v12  ;;  %v4962_v22 = vld [vmem:[%s4959_s24] sm:$0xff]  ;;  %v4965_v23 = vld [vmem:[%s4959_s24 + $0x8] sm:$0xff]  ;;  %v4968_v24 = vld [vmem:[%s4959_s24 + $0x18] sm:$0xff]  ;;  %v4982_v32 = vpack.c.bf16 %v3301_v21, %v3300_v20  ;;  %v4450_v43 = vpack.c.bf16 %v226_v35, %v225_v34 }
  0x14   : > { %6388 = vst [vmem:[#allocation4_spill] sm:$0xff] %v4945_v18  ;;  %v282_v25 = vrot.slane %v4962_v22, 1  ;;  %v283_v26 = vrot.slane %v4965_v23, 1  ;;  %v4973_v27 = vld [vmem:[%s4959_s24 + $0x20] sm:$0xff]  ;;  %v287_v28 = vrot.slane %v4968_v24, 1  ;;  %v3335_v39 = vld [vmem:[%s6308_s1 + $0x148] sm:$0xff] }
  0x15   : > { %4441 = vmatpush3.bf16.msra.mxu1 %v4438_v8  ;;  %v288_v30 = vrot.slane %v4973_v27, 1  ;;  %v4979_v31 = vld [vmem:[%s4959_s24 + $0x10] sm:$0x3]  ;;  %6389 = vst [vmem:[#allocation5_spill] sm:$0xff] %v4982_v32  ;;  %v4992_v36 = vld [vmem:[%s4959_s24 + $0x28] sm:$0x3] }
  0x16   : > { %4505 = vmatpush3.bf16.msra.mxu0 %v4927_v12  ;;  %4443 = vmatprep.subr.bf16.mxu1 %v4442_v16  ;;  %v284_v33 = vsel %vm281_vm0, %v282_v25, %v283_v26  ;;  %v3334_v38 = vld [vmem:[%s6308_s1 + $0x140] sm:$0xff]  ;;  %v285_v40 = vrot.slane %v4979_v31, 1  ;;  %v5005_v41 = vld [vmem:[%s4959_s24 + $0x30] sm:$0xff]  ;;  %v5008_v42 = vld [vmem:[%s4959_s24 + $0x38] sm:$0xff]  ;;  %v290_v44 = vrot.slane %v4992_v36, 1 }
  0x17   : > { %4507 = vmatprep.subr.bf16.mxu0 %v4945_v18  ;;  %3874 = vmatprep.mubr.msk.f32.mxu1 %vm371_vm1, %v284_v33  ;;  %v289_v37 = vsel %vm281_vm0, %v287_v28, %v288_v30  ;;  %v4514_v45 = vpack.c.bf16 %v3335_v39, %v3334_v38  ;;  %v5014_v46 = vld [vmem:[%s4959_s24 + $0x40] sm:$0x3]  ;;  %v3336_v47 = vld [vmem:[%s6308_s1 + $0x150] sm:$0xff]  ;;  %v292_v48 = vrot.slane %v5005_v41, 1  ;;  %v293_v49 = vrot.slane %v5008_v42, 1  ;;  %v5022_v50 = vld [vmem:[%s4959_s24 + $0x48] sm:$0xff] }
  0x18   : > { %4130 = vmatprep.mubr.msk.f32.mxu0 %vm371_vm1, %v289_v37  ;;  %v5025_v51 = vld [vmem:[%s4959_s24 + $0x50] sm:$0xff]  ;;  %v3337_v52 = vld [vmem:[%s6308_s1 + $0x158] sm:$0xff]  ;;  %v286_v53 = vsel %vm281_vm0, %v283_v26, %v285_v40  ;;  %v291_v56 = vsel %vm281_vm0, %v288_v30, %v290_v44  ;;  %v295_v57 = vrot.slane %v5014_v46, 1  ;;  %v297_v58 = vrot.slane %v5022_v50, 1  ;;  %v5046_v62 = vld [vmem:[%s4959_s24 + $0x60] sm:$0xff] }
  0x19   : > { %4445 = vmatpush3.bf16.msra.mxu1 %v4442_v16  ;;  %v227_v54 = vld [vmem:[%s6308_s1 + $0x10] sm:$0xff]  ;;  %v228_v55 = vld [vmem:[%s6308_s1 + $0x18] sm:$0xff]  ;;  %v298_v59 = vrot.slane %v5025_v51, 1  ;;  %v4518_v61 = vpack.c.bf16 %v3337_v52, %v3336_v47  ;;  %v5050_v63 = vsel %vm281_vm0, %v292_v48, %v293_v49  ;;  %v5053_v0 = vld [vmem:[%s4959_s24 + $0x68] sm:$0xff]  ;;  %v302_v10 = vrot.slane %v5046_v62, 1 }
  0x1a   : > { %4509 = vmatpush3.bf16.msra.mxu0 %v4945_v18  ;;  %4447 = vmatprep.subr.bf16.mxu1 %v4446_v29  ;;  %v5043_v60 = vld [vmem:[%s4959_s24 + $0x58] sm:$0x3]  ;;  %6390 = vst [vmem:[#allocation6_spill] sm:$0xff] %v5050_v63  ;;  %v4454_v1 = vpack.c.bf16 %v228_v55, %v227_v54  ;;  %v3338_v2 = vld [vmem:[%s6308_s1 + $0x160] sm:$0xff]  ;;  %v3339_v3 = vld [vmem:[%s6308_s1 + $0x168] sm:$0xff]  ;;  %v5070_v6 = vsel %vm281_vm0, %v293_v49, %v295_v57  ;;  %v303_v11 = vrot.slane %v5053_v0, 1 }
  0x1b   : > { %4511 = vmatprep.subr.bf16.mxu0 %v4982_v32  ;;  %v229_v4 = vld [vmem:[%s6308_s1 + $0x20] sm:$0xff]  ;;  %v230_v5 = vld [vmem:[%s6308_s1 + $0x28] sm:$0xff]  ;;  %6391 = vst [vmem:[#allocation7_spill] sm:$0xff] %v5070_v6  ;;  %v300_v8 = vrot.slane %v5043_v60, 1  ;;  %v5076_v9 = vsel %vm281_vm0, %v297_v58, %v298_v59  ;;  %v5081_v13 = vld [vmem:[%s4959_s24 + $0x70] sm:$0x3]  ;;  %v4522_v15 = vpack.c.bf16 %v3339_v3, %v3338_v2 }
  0x1c   : > { %6392 = vst [vmem:[#allocation8_spill] sm:$0xff] %v5076_v9  ;;  %v5084_v14 = vld [vmem:[%s4959_s24 + $0x78] sm:$0xff]  ;;  %v5088_v16 = vld [vmem:[%s4959_s24 + $0x80] sm:$0xff]  ;;  %v3340_v17 = vld [vmem:[%s6308_s1 + $0x170] sm:$0xff]  ;;  %v4458_v20 = vpack.c.bf16 %v230_v5, %v229_v4  ;;  %v305_v25 = vrot.slane %v5081_v13, 1  ;;  %v5107_v26 = vsel %vm281_vm0, %v302_v10, %v303_v11 }
  0x1d   : > { %4449 = vmatpush3.bf16.msra.mxu1 %v4446_v29  ;;  %v3341_v19 = vld [vmem:[%s6308_s1 + $0x178] sm:$0xff]  ;;  %v5103_v21 = vsel %vm281_vm0, %v298_v59, %v300_v8  ;;  %6394 = vst [vmem:[#allocation10_spill] sm:$0xff] %v5107_v26  ;;  %v307_v28 = vrot.slane %v5084_v14, 1  ;;  %v308_v29 = vrot.slane %v5088_v16, 1  ;;  %v5112_v30 = vld [vmem:[%s4959_s24 + $0x88] sm:$0x3] }
  0x1e   : > { %4513 = vmatpush3.bf16.msra.mxu0 %v4982_v32  ;;  %4451 = vmatprep.subr.bf16.mxu1 %v4450_v43  ;;  %6393 = vst [vmem:[#allocation9_spill] sm:$0xff] %v5103_v21  ;;  %v5115_v33 = vld [vmem:[%s4959_s24 + $0x90] sm:$0xff]  ;;  %v4526_v34 = vpack.c.bf16 %v3341_v19, %v3340_v17  ;;  %v5120_v35 = vld [vmem:[%s4959_s24 + $0x98] sm:$0xff]  ;;  %v3375_v38 = vld [vmem:[%s6308_s1 + $0x188] sm:$0xff]  ;;  %v310_v44 = vrot.slane %v5112_v30, 1 }
  0x1f   : > { %4515 = vmatprep.subr.bf16.mxu0 %v4514_v45  ;;  %v231_v39 = vld [vmem:[%s6308_s1 + $0x30] sm:$0xff]  ;;  %v232_v40 = vld [vmem:[%s6308_s1 + $0x38] sm:$0xff]  ;;  %v312_v47 = vrot.slane %v5115_v33, 1  ;;  %v313_v48 = vrot.slane %v5120_v35, 1  ;;  %v5150_v49 = vld [vmem:[%s4959_s24 + $0xa0] sm:$0x3] }
  0x20   : > { %3875 = vmatmul.mubr.msk.f32.vlgmr.msra.gmra.mrb[0].mxu1 %vm371_vm1, %v286_v53  ;;  %v5157_v53 = vld [vmem:[%s4959_s24 + $0xa8] sm:$0xff]  ;;  %v5160_v54 = vld [vmem:[%s4959_s24 + $0xb0] sm:$0xff]  ;;  %v4462_v55 = vpack.c.bf16 %v232_v40, %v231_v39  ;;  %v315_v57 = vrot.slane %v5150_v49, 1  ;;  %v5184_v2 = vld [vmem:[%s4959_s24 + $0xc0] sm:$0xff]  ;;  %v959_v40 = vrot.slane %v4992_v36, 2  ;;  %v962_v36 = vrot.slane %v5008_v42, 2 }
  0x21   : > { %4131 = vmatmul.mubr.msk.f32.vlgmr.msra.gmra.mrb[0].mxu0 %vm371_vm1, %v291_v56  ;;  %4453 = vmatpush3.bf16.msra.mxu1 %v4450_v43  ;;  %v5141_v43 = vsel %vm281_vm0, %v303_v11, %v305_v25  ;;  %v5173_v58 = vsel %vm281_vm0, %v312_v47, %v313_v48  ;;  %v317_v59 = vrot.slane %v5157_v53, 1  ;;  %v5187_v3 = vld [vmem:[%s4959_s24 + $0xc8] sm:$0xff]  ;;  %v322_v10 = vrot.slane %v5184_v2, 1  ;;  %v3214_v17 = vld [vmem:[%s6308_s1 + $0x80] sm:$0xff] }
  0x22   : > { %4517 = vmatpush3.bf16.msra.mxu0 %v4514_v45  ;;  %3877 = vmatprep.mubr.msk.f32.mxu1 %vm371_vm1, %v289_v37  ;;  %v3374_v37 = vld [vmem:[%s6308_s1 + $0x180] sm:$0xff]  ;;  %6395 = vst [vmem:[#allocation11_spill] sm:$0xff] %v5141_v43  ;;  %v5145_v45 = vsel %vm281_vm0, %v307_v28, %v308_v29  ;;  %6398 = vst [vmem:[#allocation14_spill] sm:$0xff] %v5173_v58  ;;  %v5196_v4 = vsel %vm281_vm0, %v313_v48, %v315_v57  ;;  %v323_v11 = vrot.slane %v5187_v3, 1  ;;  %v3215_v19 = vld [vmem:[%s6308_s1 + $0x88] sm:$0xff] }
  0x23   : > { %4133 = vmatprep.mubr.msk.f32.mxu0 %vm371_vm1, %v5050_v63  ;;  %4519 = vmatprep.subr.bf16.mxu0 %v4518_v61  ;;  %6396 = vst [vmem:[#allocation12_spill] sm:$0xff] %v5145_v45  ;;  %v5152_v52 = vpack.c.bf16 %v3375_v38, %v3374_v37  ;;  %6399 = vst [vmem:[#allocation15_spill] sm:$0xff] %v5196_v4  ;;  %v5225_v28 = vpack.c.bf16 %v3215_v19, %v3214_v17  ;;  %v957_v37 = vrot.slane %v4973_v27, 2  ;;  %v5233_v38 = vld [vmem:[%s4959_s24 + $0xd8] sm:$0xff]  ;;  %v5236_v39 = vld [vmem:[%s4959_s24 + $0xe0] sm:$0xff] }
  0x24   : > { %3878 = vmatmul.mubr.msk.f32.gmra.mrb[2].mxu1 %vm371_vm1, %v291_v56  ;;  %4455 = vmatprep.subr.bf16.mxu1 %v4454_v1  ;;  %v5169_v56 = vsel %vm281_vm0, %v308_v29, %v310_v44  ;;  %v5228_v29 = vsel %vm281_vm0, %v322_v10, %v323_v11  ;;  %v327_v47 = vrot.slane %v5233_v38, 1  ;;  %v328_v48 = vrot.slane %v5236_v39, 1  ;;  %v3376_v10 = vld [vmem:[%s6308_s1 + $0x190] sm:$0xff]  ;;  %v5292_v12 = vld [vmem:[%s4959_s24 + $0x100] sm:$0x3] }
  0x25   : > { %4134 = vmatmul.mubr.msk.f32.gmra.mrb[2].mxu0 %vm371_vm1, %v5070_v6  ;;  %3880 = vmatprep.mubr.msk.f32.mxu1 %vm371_vm1, %v5050_v63  ;;  %6397 = vst [vmem:[#allocation13_spill] sm:$0xff] %v5169_v56  ;;  %6402 = vst [vmem:[#allocation18_spill] sm:$0xff] %v5228_v29  ;;  %v964_v19 = vrot.slane %v5014_v46, 2  ;;  %v966_v46 = vrot.slane %v5022_v50, 2  ;;  %v979_v63 = vrot.slane %v5112_v30, 2 }
  0x26   : > { %4136 = vmatprep.mubr.msk.f32.mxu0 %vm371_vm1, %v5076_v9  ;;  %4521 = vmatpush3.bf16.msra.mxu0 %v4518_v61  ;;  %v318_v61 = vrot.slane %v5160_v54, 1 }
  0x27   : > { %4523 = vmatprep.subr.bf16.mxu0 %v4522_v15  ;;  %4457 = vmatpush3.bf16.msra.mxu1 %v4454_v1  ;;  %v5178_v1 = vld [vmem:[%s4959_s24 + $0xb8] sm:$0x3] }
  0x28   : > { %3881 = vmatmul.mubr.msk.f32.gmra.mrb[4].mxu1 %vm371_vm1, %v5070_v6  ;;  %4459 = vmatprep.subr.bf16.mxu1 %v4458_v20  ;;  %v320_v5 = vrot.slane %v5178_v1, 1  ;;  %v5200_v8 = vsel %vm281_vm0, %v317_v59, %v318_v61  ;;  %v961_v59 = vrot.slane %v5005_v41, 2  ;;  %v5383_v6 = vld [vmem:[%s4959_s24 + $0x138] sm:$0xff] }
  0x29   : > { %4137 = vmatmul.mubr.msk.f32.gmra.mrb[4].mxu0 %vm371_vm1, %v5103_v21  ;;  %3883 = vmatprep.mubr.msk.f32.mxu1 %vm371_vm1, %v5076_v9  ;;  %6400 = vst [vmem:[#allocation16_spill] sm:$0xff] %v5200_v8  ;;  %v5375_v9 = vld [vmem:[%s4959_s24 + $0x130] sm:$0x3]  ;;  %v347_v7 = vrot.slane %v5383_v6, 1 }
  0x2a   : > { %4139 = vmatprep.mubr.msk.f32.mxu0 %vm371_vm1, %v5107_v26  ;;  %4525 = vmatpush3.bf16.msra.mxu0 %v4522_v15  ;;  %v5205_v15 = vld [vmem:[%s4959_s24 + $0xd0] sm:$0x3] }
  0x2b   : > { %4527 = vmatprep.subr.bf16.mxu0 %v4526_v34  ;;  %4461 = vmatpush3.bf16.msra.mxu1 %v4458_v20  ;;  %v5222_v20 = vsel %vm281_vm0, %v318_v61, %v320_v5  ;;  %v325_v25 = vrot.slane %v5205_v15, 1  ;;  %v5262_v61 = vld [vmem:[%s4959_s24 + $0xf0] sm:$0xff]  ;;  %v5265_v5 = vld [vmem:[%s4959_s24 + $0xf8] sm:$0xff] }
  0x2c   : > { %3884 = vmatmul.mubr.msk.f32.gmra.mrb[6].mxu1 %vm371_vm1, %v5103_v21  ;;  %4463 = vmatprep.subr.bf16.mxu1 %v4462_v55  ;;  %6401 = vst [vmem:[#allocation17_spill] sm:$0xff] %v5222_v20  ;;  %v332_v32 = vrot.slane %v5262_v61, 1  ;;  %v333_v18 = vrot.slane %v5265_v5, 1 }
  0x2d   : > { %4140 = vmatmul.mubr.msk.f32.gmra.mrb[6].mxu0 %vm371_vm1, %v5141_v43  ;;  %3886 = vmatprep.mubr.msk.f32.mxu1 %vm371_vm1, %v5107_v26  ;;  %v5249_v44 = vsel %vm281_vm0, %v323_v11, %v325_v25  ;;  %v3377_v11 = vld [vmem:[%s6308_s1 + $0x198] sm:$0xff]  ;;  %v5284_v25 = vsel %vm950_vm2, %v957_v37, %v959_v40 }
  0x2e   : > { %4142 = vmatprep.mubr.msk.f32.mxu0 %vm371_vm1, %v5145_v45  ;;  %4529 = vmatpush3.bf16.msra.mxu0 %v4526_v34  ;;  %v956_v34 = vrot.slane %v4968_v24, 2  ;;  %6403 = vst [vmem:[#allocation19_spill] sm:$0xff] %v5249_v44  ;;  %v4534_v40 = vpack.c.bf16 %v3377_v11, %v3376_v10  ;;  %v5321_v11 = vsel %vm950_vm2, %v962_v36, %v964_v19  ;;  %v971_v19 = vrot.slane %v5046_v62, 2 }
  0x2f   : > { %4531 = vmatprep.subr.bf16.mxu0 %v5152_v52  ;;  %4465 = vmatpush3.bf16.msra.mxu1 %v4462_v55  ;;  %v5254_v55 = vld [vmem:[%s4959_s24 + $0xe8] sm:$0x3] }
  0x30   : > { %3887 = vmatmul.mubr.msk.f32.gmra.mrb[8].mxu1 %vm371_vm1, %v5141_v43  ;;  %4467 = vmatprep.subr.bf16.mxu1 %v5225_v28  ;;  %v5257_v57 = vsel %vm950_vm2, %v956_v34, %v957_v37  ;;  %v330_v17 = vrot.slane %v5254_v55, 1  ;;  %v5287_v34 = vsel %vm281_vm0, %v327_v47, %v328_v48  ;;  %v5303_v37 = vld [vmem:[%s4959_s24 + $0x110] sm:$0xff]  ;;  %v3378_v47 = vld [vmem:[%s6308_s1 + $0x1a0] sm:$0xff] }
  0x31   : > { %4143 = vmatmul.mubr.msk.f32.gmra.mrb[8].mxu0 %vm371_vm1, %v5169_v56  ;;  %3889 = vmatprep.mubr.msk.f32.mxu1 %vm371_vm1, %v5145_v45  ;;  %6404 = vst [vmem:[#allocation20_spill] sm:$0xff] %v5287_v34  ;;  %v5345_v45 = vld [vmem:[%s4959_s24 + $0x128] sm:$0xff] }
  0x32   : > { %4145 = vmatprep.mubr.msk.f32.mxu0 %vm371_vm1, %v5173_v58  ;;  %v5318_v10 = vsel %vm281_vm0, %v328_v48, %v330_v17  ;;  %v338_v48 = vrot.slane %v5303_v37, 1  ;;  %v5334_v17 = vld [vmem:[%s4959_s24 + $0x118] sm:$0x3] }
  0x33   : > { %6405 = vst [vmem:[#allocation21_spill] sm:$0xff] %v5318_v10 }
  0x34   : > { %3890 = vmatmul.mubr.msk.f32.gmra.mrb[10].mxu1 %vm371_vm1, %v5169_v56  ;;  %v5342_v56 = vld [vmem:[%s4959_s24 + $0x120] sm:$0xff] }
  0x35   : > { %4146 = vmatmul.mubr.msk.f32.gmra.mrb[10].mxu0 %vm371_vm1, %v5196_v4  ;;  %3892 = vmatprep.mubr.msk.f32.mxu1 %vm371_vm1, %v5173_v58  ;;  %v969_v58 = vrot.slane %v5043_v60, 2  ;;  %v3380_v60 = vld [vmem:[%s6308_s1 + $0x1b0] sm:$0xff]  ;;  %v342_v21 = vrot.slane %v5342_v56, 1 }
  0x36   : > { %4148 = vmatprep.mubr.msk.f32.mxu0 %vm371_vm1, %v5200_v8 }
  0x38   : > { %3893 = vmatmul.mubr.msk.f32.gmra.mrb[12].mxu1 %vm371_vm1, %v5196_v4  ;;  %v5328_v4 = vsel %vm281_vm0, %v332_v32, %v333_v18 }
  0x39   : > { %4149 = vmatmul.mubr.msk.f32.gmra.mrb[12].mxu0 %vm371_vm1, %v5222_v20  ;;  %3895 = vmatprep.mubr.msk.f32.mxu1 %vm371_vm1, %v5200_v8  ;;  %v5300_v8 = vld [vmem:[%s4959_s24 + $0x108] sm:$0xff]  ;;  %6406 = vst [vmem:[#allocation22_spill] sm:$0xff] %v5328_v4 }
  0x3a   : > { %4151 = vmatprep.mubr.msk.f32.mxu0 %vm371_vm1, %v5228_v29 }
  0x3c   : > { %3896 = vmatmul.mubr.msk.f32.gmra.mrb[14].mxu1 %vm371_vm1, %v5222_v20  ;;  %v967_v20 = vrot.slane %v5025_v51, 2 }
  0x3d   : > { %4152 = vmatmul.mubr.msk.f32.gmra.mrb[14].mxu0 %vm371_vm1, %v5249_v44  ;;  %3898 = vmatprep.mubr.msk.f32.mxu1 %vm371_vm1, %v5228_v29  ;;  %v5295_v29 = vsel %vm950_vm2, %v961_v59, %v962_v36  ;;  %v3379_v59 = vld [vmem:[%s6308_s1 + $0x1a8] sm:$0xff] }
  0x3e   : > { %4194 = vmatprep.mubr.msk.f32.mxu0 %vm371_vm1, %v5257_v57  ;;  %v5337_v36 = vsel %vm950_vm2, %v966_v46, %v967_v20  ;;  %v4538_v32 = vpack.c.bf16 %v3379_v59, %v3378_v47  ;;  %v3381_v46 = vld [vmem:[%s6308_s1 + $0x1b8] sm:$0xff]  ;;  %v340_v59 = vrot.slane %v5334_v17, 1  ;;  %v5367_v43 = vsel %vm950_vm2, %v967_v20, %v969_v58  ;;  %v5386_v58 = vld [vmem:[%s4959_s24 + $0x140] sm:$0xff] }
  0x3f   : > { %6407 = vst [vmem:[#allocation23_spill] sm:$0xff] %v5337_v36  ;;  %6409 = vst [vmem:[#allocation25_spill] sm:$0xff] %v5367_v43  ;;  %v4542_v20 = vpack.c.bf16 %v3381_v46, %v3380_v60  ;;  %v345_v46 = vrot.slane %v5375_v9, 1 }
  0x40   : > { %3899 = vmatmul.mubr.msk.f32.gmra.mrb[16].mxu1 %vm371_vm1, %v5249_v44  ;;  %v335_v44 = vrot.slane %v5292_v12, 1 }
  0x41   : > { %4195 = vmatmul.mubr.msk.f32.vlgmr.msra.gmra.mrb[0].mxu0 %vm371_vm1, %v5284_v25  ;;  %3901 = vmatprep.mubr.msk.f32.mxu1 %vm371_vm1, %v5287_v34  ;;  %v337_v34 = vrot.slane %v5300_v8, 1 }
  0x42   : > { %4533 = vmatpush3.bf16.msra.mxu0 %v5152_v52  ;;  %4197 = vmatprep.mubr.msk.f32.mxu0 %vm371_vm1, %v5295_v29  ;;  %v972_v52 = vrot.slane %v5053_v0, 2  ;;  %v5360_v47 = vsel %vm281_vm0, %v333_v18, %v335_v44  ;;  %v977_v44 = vrot.slane %v5088_v16, 2 }
  0x43   : > { %4535 = vmatprep.subr.bf16.mxu0 %v4534_v40  ;;  %6408 = vst [vmem:[#allocation24_spill] sm:$0xff] %v5360_v47  ;;  %v5370_v26 = vsel %vm281_vm0, %v337_v34, %v338_v48  ;;  %v3414_v34 = vld [vmem:[%s6308_s1 + $0x1c0] sm:$0xff] }
  0x44   : > { %3902 = vmatmul.mubr.msk.f32.gmra.mrb[18].mxu1 %vm371_vm1, %v5318_v10  ;;  %v974_v10 = vrot.slane %v5081_v13, 2  ;;  %6410 = vst [vmem:[#allocation26_spill] sm:$0xff] %v5370_v26  ;;  %v5378_v18 = vsel %vm950_vm2, %v971_v19, %v972_v52  ;;  %v976_v13 = vrot.slane %v5084_v14, 2  ;;  %v5401_v19 = vsel %vm281_vm0, %v338_v48, %v340_v59  ;;  %v5424_v59 = vld [vmem:[%s4959_s24 + $0x150] sm:$0xff] }
  0x45   : > { %4198 = vmatmul.mubr.msk.f32.gmra.mrb[2].mxu0 %vm371_vm1, %v5321_v11  ;;  %3904 = vmatprep.mubr.msk.f32.mxu1 %vm371_vm1, %v5328_v4  ;;  %v343_v4 = vrot.slane %v5345_v45, 1  ;;  %6411 = vst [vmem:[#allocation27_spill] sm:$0xff] %v5378_v18  ;;  %6412 = vst [vmem:[#allocation28_spill] sm:$0xff] %v5401_v19  ;;  %v981_v48 = vrot.slane %v5115_v33, 2 }
  0x46   : > { %4200 = vmatprep.mubr.msk.f32.mxu0 %vm371_vm1, %v5337_v36  ;;  %4537 = vmatpush3.bf16.msra.mxu0 %v4534_v40  ;;  %v3415_v40 = vld [vmem:[%s6308_s1 + $0x1c8] sm:$0xff]  ;;  %v5404_v60 = vsel %vm950_vm2, %v972_v52, %v974_v10  ;;  %v5419_v10 = vsel %vm950_vm2, %v976_v13, %v977_v44  ;;  %v982_v52 = vrot.slane %v5120_v35, 2  ;;  %v5489_v36 = vld [vmem:[%s4959_s24 + $0x178] sm:$0x3] }
  0x47   : > { %4539 = vmatprep.subr.bf16.mxu0 %v4538_v32  ;;  %6413 = vst [vmem:[#allocation29_spill] sm:$0xff] %v5404_v60  ;;  %6415 = vst [vmem:[#allocation31_spill] sm:$0xff] %v5419_v10  ;;  %v5429_v30 = vpack.c.bf16 %v3415_v40, %v3414_v34  ;;  %v5445_v34 = vsel %vm950_vm2, %v977_v44, %v979_v63  ;;  %v5461_v63 = vld [vmem:[%s4959_s24 + $0x168] sm:$0xff]  ;;  %v5464_v44 = vld [vmem:[%s4959_s24 + $0x170] sm:$0xff] }
  0x48   : > { %3905 = vmatmul.mubr.msk.f32.gmra.mrb[20].mxu1 %vm371_vm1, %v5360_v47  ;;  %v5410_v47 = vsel %vm281_vm0, %v342_v21, %v343_v4  ;;  %v5427_v21 = vld [vmem:[%s4959_s24 + $0x158] sm:$0xff]  ;;  %6417 = vst [vmem:[#allocation33_spill] sm:$0xff] %v5445_v34 }
  0x49   : > { %4201 = vmatmul.mubr.msk.f32.gmra.mrb[4].mxu0 %vm371_vm1, %v5367_v43  ;;  %3907 = vmatprep.mubr.msk.f32.mxu1 %vm371_vm1, %v5370_v26  ;;  %6414 = vst [vmem:[#allocation30_spill] sm:$0xff] %v5410_v47  ;;  %v348_v26 = vrot.slane %v5386_v58, 1  ;;  %v5416_v43 = vld [vmem:[%s4959_s24 + $0x148] sm:$0x3] }
  0x4a   : > { %4203 = vmatprep.mubr.msk.f32.mxu0 %vm371_vm1, %v5378_v18  ;;  %4541 = vmatpush3.bf16.msra.mxu0 %v4538_v32  ;;  %v5438_v32 = vsel %vm281_vm0, %v343_v4, %v345_v46  ;;  %v350_v13 = vrot.slane %v5416_v43, 1  ;;  %v984_v18 = vrot.slane %v5150_v49, 2  ;;  %v5456_v4 = vsel %vm950_vm2, %v981_v48, %v982_v52 }
  0x4b   : > { %4543 = vmatprep.subr.bf16.mxu0 %v4542_v20  ;;  %6416 = vst [vmem:[#allocation32_spill] sm:$0xff] %v5438_v32  ;;  %v5448_v40 = vsel %vm281_vm0, %v347_v7, %v348_v26  ;;  %v986_v49 = vrot.slane %v5157_v53, 2  ;;  %v987_v46 = vrot.slane %v5160_v54, 2 }
  0x4c   : > { %3908 = vmatmul.mubr.msk.f32.gmra.mrb[22].mxu1 %vm371_vm1, %v5401_v19  ;;  %6418 = vst [vmem:[#allocation34_spill] sm:$0xff] %v5448_v40  ;;  %v352_v19 = vrot.slane %v5424_v59, 1  ;;  %v5474_v7 = vsel %vm281_vm0, %v348_v26, %v350_v13 }
  0x4d   : > { %4204 = vmatmul.mubr.msk.f32.gmra.mrb[6].mxu0 %vm371_vm1, %v5404_v60  ;;  %3910 = vmatprep.mubr.msk.f32.mxu1 %vm371_vm1, %v5410_v47  ;;  %v353_v47 = vrot.slane %v5427_v21, 1  ;;  %v5453_v60 = vld [vmem:[%s4959_s24 + $0x160] sm:$0x3]  ;;  %6419 = vst [vmem:[#allocation35_spill] sm:$0xff] %v5474_v7  ;;  %v5492_v26 = vsel %vm950_vm2, %v986_v49, %v987_v46 }
  0x4e   : > { %4206 = vmatprep.mubr.msk.f32.mxu0 %vm371_vm1, %v5419_v10  ;;  %4545 = vmatpush3.bf16.msra.mxu0 %v4542_v20  ;;  %v5477_v20 = vsel %vm950_vm2, %v982_v52, %v984_v18  ;;  %v355_v48 = vrot.slane %v5453_v60, 1  ;;  %v991_v18 = vrot.slane %v5184_v2, 2  ;;  %v992_v52 = vrot.slane %v5187_v3, 2 }
  0x4f   : > { %4547 = vmatprep.subr.bf16.mxu0 %v5429_v30  ;;  %6420 = vst [vmem:[#allocation36_spill] sm:$0xff] %v5477_v20  ;;  %v5483_v10 = vsel %vm281_vm0, %v352_v19, %v353_v47  ;;  %v360_v19 = vrot.slane %v5489_v36, 1 }
  0x50   : > { %3911 = vmatmul.mubr.msk.f32.gmra.mrb[24].mxu1 %vm371_vm1, %v5438_v32  ;;  %6421 = vst [vmem:[#allocation37_spill] sm:$0xff] %v5483_v10  ;;  %v989_v32 = vrot.slane %v5178_v1, 2  ;;  %v5503_v1 = vsel %vm281_vm0, %v353_v47, %v355_v48  ;;  %v997_v47 = vrot.slane %v5236_v39, 2  ;;  %v1001_v48 = vrot.slane %v5262_v61, 2 }
  0x51   : > { %4207 = vmatmul.mubr.msk.f32.gmra.mrb[8].mxu0 %vm371_vm1, %v5445_v34  ;;  %3913 = vmatprep.mubr.msk.f32.mxu1 %vm371_vm1, %v5448_v40  ;;  %v357_v34 = vrot.slane %v5461_v63, 1  ;;  %v358_v40 = vrot.slane %v5464_v44, 1  ;;  %6422 = vst [vmem:[#allocation38_spill] sm:$0xff] %v5503_v1 }
  0x52   : > { %4209 = vmatprep.mubr.msk.f32.mxu0 %vm371_vm1, %v5456_v4  ;;  %v5509_v13 = vsel %vm950_vm2, %v987_v46, %v989_v32 }
  0x53   : > { %v5512_v49 = vsel %vm281_vm0, %v357_v34, %v358_v40  ;;  %v5527_v32 = vsel %vm281_vm0, %v358_v40, %v360_v19  ;;  %v999_v34 = vrot.slane %v5254_v55, 2  ;;  %v3216_v40 = vld [vmem:[%s6308_s1 + $0x90] sm:$0xff]  ;;  %v1006_v19 = vrot.slane %v5300_v8, 2 }
  0x54   : > { %3914 = vmatmul.mubr.msk.f32.gmra.mrb[26].mxu1 %vm371_vm1, %v5474_v7  ;;  %6423 = vst [vmem:[#allocation39_spill] sm:$0xff] %v5512_v49  ;;  %v994_v7 = vrot.slane %v5205_v15, 2  ;;  %6424 = vst [vmem:[#allocation40_spill] sm:$0xff] %v5527_v32 }
  0x55   : > { %4210 = vmatmul.mubr.msk.f32.gmra.mrb[10].mxu0 %vm371_vm1, %v5477_v20  ;;  %3916 = vmatprep.mubr.msk.f32.mxu1 %vm371_vm1, %v5483_v10  ;;  %v5516_v20 = vsel %vm950_vm2, %v991_v18, %v992_v52  ;;  %v996_v10 = vrot.slane %v5233_v38, 2  ;;  %v1002_v18 = vrot.slane %v5265_v5, 2  ;;  %v5555_v55 = vsel %vm950_vm2, %v997_v47, %v999_v34 }
  0x56   : > { %4212 = vmatprep.mubr.msk.f32.mxu0 %vm371_vm1, %v5492_v26  ;;  %v5532_v15 = vsel %vm950_vm2, %v992_v52, %v994_v7  ;;  %v3217_v7 = vld [vmem:[%s6308_s1 + $0x98] sm:$0xff]  ;;  %v1009_v34 = vrot.slane %v5334_v17, 2 }
  0x57   : > { %v5536_v46 = vsel %vm950_vm2, %v996_v10, %v997_v47  ;;  %v1004_v10 = vrot.slane %v5292_v12, 2  ;;  %v5559_v52 = vsel %vm950_vm2, %v1001_v48, %v1002_v18  ;;  %v3219_v47 = vld [vmem:[%s6308_s1 + $0xa8] sm:$0xff]  ;;  %v3221_v17 = vld [vmem:[%s6308_s1 + $0xb8] sm:$0xff] }
  0x58   : > { %3917 = vmatmul.mubr.msk.f32.gmra.mrb[28].mxu1 %vm371_vm1, %v5503_v1  ;;  %v3218_v1 = vld [vmem:[%s6308_s1 + $0xa0] sm:$0xff] }
  0x59   : > { %4213 = vmatmul.mubr.msk.f32.gmra.mrb[12].mxu0 %vm371_vm1, %v5509_v13  ;;  %3919 = vmatprep.mubr.msk.f32.mxu1 %vm371_vm1, %v5512_v49  ;;  %v4470_v49 = vpack.c.bf16 %v3217_v7, %v3216_v40  ;;  %v5579_v12 = vsel %vm950_vm2, %v1002_v18, %v1004_v10  ;;  %v1011_v40 = vrot.slane %v5342_v56, 2  ;;  %v1012_v7 = vrot.slane %v5345_v45, 2 }
  0x5a   : > { %4215 = vmatprep.mubr.msk.f32.mxu0 %vm371_vm1, %v5516_v20  ;;  %v1016_v10 = vrot.slane %v5383_v6, 2 }
  0x5b   : > { %v5606_v18 = vsel %vm950_vm2, %v1011_v40, %v1012_v7 }
  0x5c   : > { %3920 = vmatmul.mubr.msk.f32.gmra.mrb[30].mxu1 %vm371_vm1, %v5527_v32  ;;  %v1007_v32 = vrot.slane %v5303_v37, 2 }
  0x5d   : > { %4216 = vmatmul.mubr.msk.f32.gmra.mrb[14].mxu0 %vm371_vm1, %v5532_v15  ;;  %3938 = vmatprep.mubr.msk.f32.mxu1 %vm371_vm1, %v4962_v22 }
  0x5e   : > { %4218 = vmatprep.mubr.msk.f32.mxu0 %vm371_vm1, %v5536_v46  ;;  %v5583_v48 = vsel %vm950_vm2, %v1006_v19, %v1007_v32  ;;  %v1017_v19 = vrot.slane %v5386_v58, 2 }
  0x60   : > { %3939 = vmatmul.mubr.msk.f32.vlgmr.msra.gmra.mrb[0].mxu1 %vm371_vm1, %v4965_v23  ;;  %v5629_v40 = vsel %vm950_vm2, %v1016_v10, %v1017_v19  ;;  %v1027_v10 = vrot.slane %v5464_v44, 2 }
  0x61   : > { %4219 = vmatmul.mubr.msk.f32.gmra.mrb[16].mxu0 %vm371_vm1, %v5555_v55  ;;  %4469 = vmatpush3.bf16.msra.mxu1 %v5225_v28  ;;  %v4474_v28 = vpack.c.bf16 %v3219_v47, %v3218_v1  ;;  %v5602_v1 = vsel %vm950_vm2, %v1007_v32, %v1009_v34  ;;  %v3254_v32 = vld [vmem:[%s6308_s1 + $0xc0] sm:$0xff]  ;;  %v1019_v34 = vrot.slane %v5416_v43, 2  ;;  %6426 = vst [vmem:[#allocation42_spill] sm:$0xff] %v5629_v40 }
  0x62   : > { %3941 = vmatprep.mubr.msk.f32.mxu1 %vm371_vm1, %v4968_v24  ;;  %4221 = vmatprep.mubr.msk.f32.mxu0 %vm371_vm1, %v5559_v52  ;;  %v3220_v24 = vld [vmem:[%s6308_s1 + $0xb0] sm:$0xff]  ;;  %6425 = vst [vmem:[#allocation41_spill] sm:$0xff] %v5602_v1 }
  0x63   : > { %4471 = vmatprep.subr.bf16.mxu1 %v4470_v49  ;;  %v4478_v47 = vpack.c.bf16 %v3221_v17, %v3220_v24  ;;  %v1021_v24 = vrot.slane %v5424_v59, 2  ;;  %v1022_v17 = vrot.slane %v5427_v21, 2  ;;  %v5644_v43 = vsel %vm950_vm2, %v1017_v19, %v1019_v34  ;;  %v5659_v19 = vld [vmem:[%s4959_s24 + $0x188] sm:$0xff] }
  0x64   : > { %3942 = vmatmul.mubr.msk.f32.gmra.mrb[2].mxu1 %vm371_vm1, %v4973_v27  ;;  %v1014_v27 = vrot.slane %v5375_v9, 2  ;;  %v3255_v9 = vld [vmem:[%s6308_s1 + $0xc8] sm:$0xff]  ;;  %6427 = vst [vmem:[#allocation43_spill] sm:$0xff] %v5644_v43 }
  0x65   : > { %4222 = vmatmul.mubr.msk.f32.gmra.mrb[18].mxu0 %vm371_vm1, %v5579_v12  ;;  %3944 = vmatprep.mubr.msk.f32.mxu1 %vm371_vm1, %v5005_v41 }
  0x66   : > { %4224 = vmatprep.mubr.msk.f32.mxu0 %vm371_vm1, %v5583_v48  ;;  %4473 = vmatpush3.bf16.msra.mxu1 %v4470_v49  ;;  %v5625_v49 = vsel %vm950_vm2, %v1012_v7, %v1014_v27  ;;  %v1024_v7 = vrot.slane %v5453_v60, 2  ;;  %v1026_v27 = vrot.slane %v5461_v63, 2 }
  0x67   : > { %4475 = vmatprep.subr.bf16.mxu1 %v4474_v28 }
  0x68   : > { %3945 = vmatmul.mubr.msk.f32.gmra.mrb[4].mxu1 %vm371_vm1, %v5008_v42  ;;  %v5668_v60 = vsel %vm950_vm2, %v1022_v17, %v1024_v7 }
  0x69   : > { %4225 = vmatmul.mubr.msk.f32.gmra.mrb[20].mxu0 %vm371_vm1, %v5602_v1  ;;  %3947 = vmatprep.mubr.msk.f32.mxu1 %vm371_vm1, %v5022_v50  ;;  %v5633_v1 = vpack.c.bf16 %v3255_v9, %v3254_v32  ;;  %v5656_v32 = vld [vmem:[%s4959_s24 + $0x180] sm:$0xff]  ;;  %6429 = vst [vmem:[#allocation45_spill] sm:$0xff] %v5668_v60  ;;  %v5672_v9 = vsel %vm950_vm2, %v1026_v27, %v1027_v10 }
  0x6a   : > { %4227 = vmatprep.mubr.msk.f32.mxu0 %vm371_vm1, %v5606_v18  ;;  %4477 = vmatpush3.bf16.msra.mxu1 %v4474_v28  ;;  %v5648_v28 = vsel %vm950_vm2, %v1021_v24, %v1022_v17  ;;  %6430 = vst [vmem:[#allocation46_spill] sm:$0xff] %v5672_v9  ;;  %v1909_v34 = vrot.slane %v5656_v32, 2  ;;  %v1910_v24 = vrot.slane %v5659_v19, 2 }
  0x6b   : > { %4479 = vmatprep.subr.bf16.mxu1 %v4478_v47  ;;  %6428 = vst [vmem:[#allocation44_spill] sm:$0xff] %v5648_v28 }
  0x6c   : > { %3948 = vmatmul.mubr.msk.f32.gmra.mrb[6].mxu1 %vm371_vm1, %v5025_v51  ;;  %v5692_v7 = vsel %vm950_vm2, %v1909_v34, %v1910_v24 }
  0x6d   : > { %4228 = vmatmul.mubr.msk.f32.gmra.mrb[22].mxu0 %vm371_vm1, %v5625_v49  ;;  %3950 = vmatprep.mubr.msk.f32.mxu1 %vm371_vm1, %v5046_v62  ;;  %6432 = vst [vmem:[#allocation48_spill] sm:$0xff] %v5692_v7 }
  0x6e   : > { %4230 = vmatprep.mubr.msk.f32.mxu0 %vm371_vm1, %v5629_v40  ;;  %4481 = vmatpush3.bf16.msra.mxu1 %v4478_v47  ;;  %v1029_v47 = vrot.slane %v5489_v36, 2  ;;  %v5677_v40 = vld [vmem:[%s4959_s24 + $0x190] sm:$0x3] }
  0x6f   : > { %4483 = vmatprep.subr.bf16.mxu1 %v5633_v1  ;;  %v1912_v17 = vrot.slane %v5677_v40, 2 }
  0x70   : > { %3951 = vmatmul.mubr.msk.f32.gmra.mrb[8].mxu1 %vm371_vm1, %v5053_v0  ;;  %v5688_v36 = vsel %vm950_vm2, %v1027_v10, %v1029_v47  ;;  %v3416_v10 = vld [vmem:[%s6308_s1 + $0x1d0] sm:$0xff]  ;;  %v3417_v47 = vld [vmem:[%s6308_s1 + $0x1d8] sm:$0xff] }
  0x71   : > { %4231 = vmatmul.mubr.msk.f32.gmra.mrb[24].mxu0 %vm371_vm1, %v5644_v43  ;;  %3953 = vmatprep.mubr.msk.f32.mxu1 %vm371_vm1, %v5084_v14  ;;  %6431 = vst [vmem:[#allocation47_spill] sm:$0xff] %v5688_v36  ;;  %v5703_v27 = vsel %vm950_vm2, %v1910_v24, %v1912_v17  ;;  %v4550_v34 = vpack.c.bf16 %v3417_v47, %v3416_v10  ;;  %v3418_v24 = vld [vmem:[%s6308_s1 + $0x1e0] sm:$0xff]  ;;  %v3419_v17 = vld [vmem:[%s6308_s1 + $0x1e8] sm:$0xff]  ;;  %v3420_v10 = vld [vmem:[%s6308_s1 + $0x1f0] sm:$0xff]  ;;  %v954_v47 = vrot.slane %v4979_v31, 2 }
  0x72   : > { %4233 = vmatprep.mubr.msk.f32.mxu0 %vm371_vm1, %v5648_v28  ;;  %6433 = vst [vmem:[#allocation49_spill] sm:$0xff] %v5703_v27 }
  0x74   : > { %3954 = vmatmul.mubr.msk.f32.gmra.mrb[10].mxu1 %vm371_vm1, %v5088_v16 }
  0x75   : > { %4234 = vmatmul.mubr.msk.f32.gmra.mrb[26].mxu0 %vm371_vm1, %v5668_v60  ;;  %3956 = vmatprep.mubr.msk.f32.mxu1 %vm371_vm1, %v5115_v33 }
  0x76   : > { %4236 = vmatprep.mubr.msk.f32.mxu0 %vm371_vm1, %v5672_v9 }
  0x78   : > { %3957 = vmatmul.mubr.msk.f32.gmra.mrb[12].mxu1 %vm371_vm1, %v5120_v35 }
  0x79   : > { %4237 = vmatmul.mubr.msk.f32.gmra.mrb[28].mxu0 %vm371_vm1, %v5688_v36  ;;  %3959 = vmatprep.mubr.msk.f32.mxu1 %vm371_vm1, %v5157_v53 }
  0x7a   : > { %4239 = vmatprep.mubr.msk.f32.mxu0 %vm371_vm1, %v5692_v7  ;;  %v4854_v7 = vld [vmem:[%s4959_s24 + $0x38] sm:$0xff] }
  0x7c   : > { %3960 = vmatmul.mubr.msk.f32.gmra.mrb[14].mxu1 %vm371_vm1, %v5160_v54 }
  0x7d   : > { %4240 = vmatmul.mubr.msk.f32.gmra.mrb[30].mxu0 %vm371_vm1, %v5703_v27  ;;  %3962 = vmatprep.mubr.msk.f32.mxu1 %vm371_vm1, %v5184_v2  ;;  %v6462_v27 = vld [vmem:[#allocation26_spill] sm:$0xff] }
  0x7e   : > { %4258 = vmatprep.mubr.msk.f32.mxu0 %vm371_vm1, %v5005_v41  ;;  %v4554_v41 = vpack.c.bf16 %v3419_v17, %v3418_v24  ;;  %v3258_v17 = vld [vmem:[%s6308_s1 + $0xe0] sm:$0xff] }
  0x80   : > { %3963 = vmatmul.mubr.msk.f32.gmra.mrb[16].mxu1 %vm371_vm1, %v5187_v3 }
  0x81   : > { %4259 = vmatmul.mubr.msk.f32.vlgmr.msra.gmra.mrb[0].mxu0 %vm371_vm1, %v5008_v42  ;;  %3965 = vmatprep.mubr.msk.f32.mxu1 %vm371_vm1, %v5233_v38  ;;  %v3421_v42 = vld [vmem:[%s6308_s1 + $0x1f8] sm:$0xff] }
  0x82   : > { %4549 = vmatpush3.bf16.msra.mxu0 %v5429_v30  ;;  %4261 = vmatprep.mubr.msk.f32.mxu0 %vm371_vm1, %v5022_v50  ;;  %v4558_v50 = vpack.c.bf16 %v3421_v42, %v3420_v10  ;;  %v3454_v30 = vld [vmem:[%s6308_s1 + $0x200] sm:$0xff]  ;;  %v3260_v42 = vld [vmem:[%s6308_s1 + $0xf0] sm:$0xff] }
  0x83   : > { %4551 = vmatprep.subr.bf16.mxu0 %v4550_v34 }
  0x84   : > { %3966 = vmatmul.mubr.msk.f32.gmra.mrb[18].mxu1 %vm371_vm1, %v5236_v39 }
  0x85   : > { %4262 = vmatmul.mubr.msk.f32.gmra.mrb[2].mxu0 %vm371_vm1, %v5025_v51  ;;  %3968 = vmatprep.mubr.msk.f32.mxu1 %vm371_vm1, %v5262_v61  ;;  %v3455_v51 = vld [vmem:[%s6308_s1 + $0x208] sm:$0xff] }
  0x86   : > { %4264 = vmatprep.mubr.msk.f32.mxu0 %vm371_vm1, %v5046_v62  ;;  %4553 = vmatpush3.bf16.msra.mxu0 %v4550_v34  ;;  %v5762_v62 = vpack.c.bf16 %v3455_v51, %v3454_v30  ;;  %v6436_v30 = vld [vmem:[#allocation27_spill] sm:$0xff]  ;;  %v6437_v51 = vld [vmem:[#allocation2_spill] sm:$0xff] }
  0x87   : > { %4555 = vmatprep.subr.bf16.mxu0 %v4554_v41 }
  0x88   : > { %3969 = vmatmul.mubr.msk.f32.gmra.mrb[20].mxu1 %vm371_vm1, %v5265_v5 }
  0x89   : > { %4265 = vmatmul.mubr.msk.f32.gmra.mrb[4].mxu0 %vm371_vm1, %v5053_v0  ;;  %3971 = vmatprep.mubr.msk.f32.mxu1 %vm371_vm1, %v5300_v8  ;;  %v951_v0 = vrot.slane %v4962_v22, 2  ;;  %v3256_v22 = vld [vmem:[%s6308_s1 + $0xd0] sm:$0xff] }
  0x8a   : > { %4267 = vmatprep.mubr.msk.f32.mxu0 %vm371_vm1, %v5084_v14  ;;  %4557 = vmatpush3.bf16.msra.mxu0 %v4554_v41  ;;  %v3259_v41 = vld [vmem:[%s6308_s1 + $0xe8] sm:$0xff] }
  0x8b   : > { %4559 = vmatprep.subr.bf16.mxu0 %v4558_v50  ;;  %v4490_v10 = vpack.c.bf16 %v3259_v41, %v3258_v17  ;;  %v6442_v17 = vld [vmem:[#allocation6_spill] sm:$0xff] }
  0x8c   : > { %3972 = vmatmul.mubr.msk.f32.gmra.mrb[22].mxu1 %vm371_vm1, %v5303_v37 }
  0x8d   : > { %4268 = vmatmul.mubr.msk.f32.gmra.mrb[6].mxu0 %vm371_vm1, %v5088_v16  ;;  %3974 = vmatprep.mubr.msk.f32.mxu1 %vm371_vm1, %v5342_v56  ;;  %v952_v16 = vrot.slane %v4965_v23, 2  ;;  %v3257_v23 = vld [vmem:[%s6308_s1 + $0xd8] sm:$0xff] }
  0x8e   : > { %4270 = vmatprep.mubr.msk.f32.mxu0 %vm371_vm1, %v5115_v33  ;;  %4561 = vmatpush3.bf16.msra.mxu0 %v4558_v50  ;;  %v4486_v24 = vpack.c.bf16 %v3257_v23, %v3256_v22  ;;  %v3261_v50 = vld [vmem:[%s6308_s1 + $0xf8] sm:$0xff]  ;;  %v6441_v22 = vld [vmem:[#allocation36_spill] sm:$0xff]  ;;  %v5888_v23 = vld [vmem:[%s4959_s24 + $0x1a0] sm:$0xff] }
  0x8f   : > { %4563 = vmatprep.subr.bf16.mxu0 %v5762_v62  ;;  %v953_v34 = vsel %vm950_vm2, %v951_v0, %v952_v16  ;;  %v955_v31 = vsel %vm950_vm2, %v952_v16, %v954_v47  ;;  %v6438_v0 = vld [vmem:[#allocation29_spill] sm:$0xff]  ;;  %v6439_v16 = vld [vmem:[#allocation31_spill] sm:$0xff] }
  0x90   : > { %3975 = vmatmul.mubr.msk.f32.gmra.mrb[24].mxu1 %vm371_vm1, %v5345_v45  ;;  %v6440_v47 = vld [vmem:[#allocation33_spill] sm:$0xff] }
  0x91   : > { %4271 = vmatmul.mubr.msk.f32.gmra.mrb[8].mxu0 %vm371_vm1, %v5120_v35  ;;  %3977 = vmatprep.mubr.msk.f32.mxu1 %vm371_vm1, %v5383_v6 }
  0x92   : > { %4273 = vmatprep.mubr.msk.f32.mxu0 %vm371_vm1, %v5157_v53 }
  0x94   : > { %3978 = vmatmul.mubr.msk.f32.gmra.mrb[26].mxu1 %vm371_vm1, %v5386_v58 }
  0x95   : > { %4274 = vmatmul.mubr.msk.f32.gmra.mrb[10].mxu0 %vm371_vm1, %v5160_v54  ;;  %3980 = vmatprep.mubr.msk.f32.mxu1 %vm371_vm1, %v5424_v59 }
  0x96   : > { %4276 = vmatprep.mubr.msk.f32.mxu0 %vm371_vm1, %v5184_v2 }
  0x98   : > { %3981 = vmatmul.mubr.msk.f32.gmra.mrb[28].mxu1 %vm371_vm1, %v5427_v21 }
  0x99   : > { %4277 = vmatmul.mubr.msk.f32.gmra.mrb[12].mxu0 %vm371_vm1, %v5187_v3  ;;  %3983 = vmatprep.mubr.msk.f32.mxu1 %vm371_vm1, %v5461_v63 }
  0x9a   : > { %4279 = vmatprep.mubr.msk.f32.mxu0 %vm371_vm1, %v5233_v38 }
  0x9c   : > { %3984 = vmatmul.mubr.msk.f32.gmra.mrb[30].mxu1 %vm371_vm1, %v5464_v44 }
  0x9d   : > { %4280 = vmatmul.mubr.msk.f32.gmra.mrb[14].mxu0 %vm371_vm1, %v5236_v39  ;;  %4002 = vmatprep.mubr.msk.f32.mxu1 %vm371_vm1, %v953_v34  ;;  %v5877_v34 = vld [vmem:[%s4959_s24 + $0x198] sm:$0xff] }
  0x9e   : > { %4282 = vmatprep.mubr.msk.f32.mxu0 %vm371_vm1, %v5262_v61 }
  0xa0   : > { %4003 = vmatmul.mubr.msk.f32.vlgmr.msra.gmra.mrb[0].mxu1 %vm371_vm1, %v955_v31  ;;  %v3456_v31 = vld [vmem:[%s6308_s1 + $0x210] sm:$0xff] }
  0xa1   : > { %4283 = vmatmul.mubr.msk.f32.gmra.mrb[16].mxu0 %vm371_vm1, %v5265_v5  ;;  %4485 = vmatpush3.bf16.msra.mxu1 %v5633_v1  ;;  %v6435_v1 = vld [vmem:[#allocation25_spill] sm:$0xff] }
  0xa2   : > { %4005 = vmatprep.mubr.msk.f32.mxu1 %vm371_vm1, %v5257_v57  ;;  %4285 = vmatprep.mubr.msk.f32.mxu0 %vm371_vm1, %v5300_v8  ;;  %v4494_v57 = vpack.c.bf16 %v3261_v50, %v3260_v42  ;;  %v3459_v42 = vld [vmem:[%s6308_s1 + $0x228] sm:$0xff] }
  0xa3   : > { %4487 = vmatprep.subr.bf16.mxu1 %v4486_v24  ;;  %v6443_v50 = vld [vmem:[#allocation7_spill] sm:$0xff] }
  0xa4   : > { %4006 = vmatmul.mubr.msk.f32.gmra.mrb[2].mxu1 %vm371_vm1, %v5284_v25  ;;  %v6434_v25 = vld [vmem:[#allocation23_spill] sm:$0xff] }
  0xa5   : > { %4286 = vmatmul.mubr.msk.f32.gmra.mrb[18].mxu0 %vm371_vm1, %v5303_v37  ;;  %4008 = vmatprep.mubr.msk.f32.mxu1 %vm371_vm1, %v5295_v29 }
  0xa6   : > { %4288 = vmatprep.mubr.msk.f32.mxu0 %vm371_vm1, %v5342_v56  ;;  %4489 = vmatpush3.bf16.msra.mxu1 %v4486_v24  ;;  %v3457_v24 = vld [vmem:[%s6308_s1 + $0x218] sm:$0xff] }
  0xa7   : > { %4491 = vmatprep.subr.bf16.mxu1 %v4490_v10  ;;  %v4566_v41 = vpack.c.bf16 %v3457_v24, %v3456_v31  ;;  %v3460_v24 = vld [vmem:[%s6308_s1 + $0x230] sm:$0xff] }
  0xa8   : > { %4009 = vmatmul.mubr.msk.f32.gmra.mrb[4].mxu1 %vm371_vm1, %v5321_v11 }
  0xa9   : > { %4289 = vmatmul.mubr.msk.f32.gmra.mrb[20].mxu0 %vm371_vm1, %v5345_v45  ;;  %4011 = vmatprep.mubr.msk.f32.mxu1 %vm371_vm1, %v6434_v25 }
  0xaa   : > { %4291 = vmatprep.mubr.msk.f32.mxu0 %vm371_vm1, %v5383_v6  ;;  %4493 = vmatpush3.bf16.msra.mxu1 %v4490_v10  ;;  %v3458_v10 = vld [vmem:[%s6308_s1 + $0x220] sm:$0xff] }
  0xab   : > { %4495 = vmatprep.subr.bf16.mxu1 %v4494_v57  ;;  %v4570_v31 = vpack.c.bf16 %v3459_v42, %v3458_v10  ;;  %v6447_v42 = vld [vmem:[#allocation11_spill] sm:$0xff] }
  0xac   : > { %4012 = vmatmul.mubr.msk.f32.gmra.mrb[6].mxu1 %vm371_vm1, %v6435_v1 }
  0xad   : > { %4292 = vmatmul.mubr.msk.f32.gmra.mrb[22].mxu0 %vm371_vm1, %v5386_v58  ;;  %4014 = vmatprep.mubr.msk.f32.mxu1 %vm371_vm1, %v6436_v30 }
  0xae   : > { %4294 = vmatprep.mubr.msk.f32.mxu0 %vm371_vm1, %v5424_v59  ;;  %4497 = vmatpush3.bf16.msra.mxu1 %v4494_v57  ;;  %v6444_v57 = vld [vmem:[#allocation8_spill] sm:$0xff] }
  0xaf   : > { %4578 = vmatprep.subr.bf16.mxu1 %v6437_v51 }
  0xb0   : > { %4015 = vmatmul.mubr.msk.f32.gmra.mrb[8].mxu1 %vm371_vm1, %v6438_v0 }
  0xb1   : > { %4295 = vmatmul.mubr.msk.f32.gmra.mrb[24].mxu0 %vm371_vm1, %v5427_v21  ;;  %4017 = vmatprep.mubr.msk.f32.mxu1 %vm371_vm1, %v6439_v16 }
  0xb2   : > { %4297 = vmatprep.mubr.msk.f32.mxu0 %vm371_vm1, %v5461_v63 }
  0xb4   : > { %4018 = vmatmul.mubr.msk.f32.gmra.mrb[10].mxu1 %vm371_vm1, %v6440_v47 }
  0xb5   : > { %4298 = vmatmul.mubr.msk.f32.gmra.mrb[26].mxu0 %vm371_vm1, %v5464_v44  ;;  %4020 = vmatprep.mubr.msk.f32.mxu1 %vm371_vm1, %v5456_v4 }
  0xb6   : > { %4300 = vmatprep.mubr.msk.f32.mxu0 %vm371_vm1, %v5656_v32 }
  0xb8   : > { %4021 = vmatmul.mubr.msk.f32.gmra.mrb[12].mxu1 %vm371_vm1, %v6441_v22 }
  0xb9   : > { %4301 = vmatmul.mubr.msk.f32.gmra.mrb[28].mxu0 %vm371_vm1, %v5659_v19  ;;  %4023 = vmatprep.mubr.msk.f32.mxu1 %vm371_vm1, %v5492_v26 }
  0xba   : > { %4303 = vmatprep.mubr.msk.f32.mxu0 %vm371_vm1, %v5877_v34 }
  0xbc   : > { %4024 = vmatmul.mubr.msk.f32.gmra.mrb[14].mxu1 %vm371_vm1, %v5509_v13 }
  0xbd   : > { %4304 = vmatmul.mubr.msk.f32.gmra.mrb[30].mxu0 %vm371_vm1, %v5888_v23  ;;  %4026 = vmatprep.mubr.msk.f32.mxu1 %vm371_vm1, %v5516_v20 }
  0xbe   : > { %4322 = vmatprep.mubr.msk.f32.mxu0 %vm371_vm1, %v6442_v17  ;;  %v3461_v17 = vld [vmem:[%s6308_s1 + $0x238] sm:$0xff] }
  0xbf   : > { %v4574_v10 = vpack.c.bf16 %v3461_v17, %v3460_v24  ;;  %v6451_v24 = vld [vmem:[#allocation14_spill] sm:$0xff]  ;;  %v6452_v17 = vld [vmem:[#allocation15_spill] sm:$0xff] }
  0xc0   : > { %4027 = vmatmul.mubr.msk.f32.gmra.mrb[16].mxu1 %vm371_vm1, %v5532_v15 }
  0xc1   : > { %4323 = vmatmul.mubr.msk.f32.vlgmr.msra.gmra.mrb[0].mxu0 %vm371_vm1, %v6443_v50  ;;  %4029 = vmatprep.mubr.msk.f32.mxu1 %vm371_vm1, %v5536_v46  ;;  %v6445_v50 = vld [vmem:[#allocation9_spill] sm:$0xff] }
  0xc2   : > { %4565 = vmatpush3.bf16.msra.mxu0 %v5762_v62  ;;  %4325 = vmatprep.mubr.msk.f32.mxu0 %vm371_vm1, %v6444_v57  ;;  %v6446_v62 = vld [vmem:[#allocation10_spill] sm:$0xff]  ;;  %v6448_v57 = vld [vmem:[#allocation12_spill] sm:$0xff] }
  0xc3   : > { %4567 = vmatprep.subr.bf16.mxu0 %v4566_v41 }
  0xc4   : > { %4030 = vmatmul.mubr.msk.f32.gmra.mrb[18].mxu1 %vm371_vm1, %v5555_v55 }
  0xc5   : > { %4326 = vmatmul.mubr.msk.f32.gmra.mrb[2].mxu0 %vm371_vm1, %v6445_v50  ;;  %4032 = vmatprep.mubr.msk.f32.mxu1 %vm371_vm1, %v5559_v52  ;;  %v6449_v50 = vld [vmem:[#allocation41_spill] sm:$0xff] }
  0xc6   : > { %4328 = vmatprep.mubr.msk.f32.mxu0 %vm371_vm1, %v6446_v62  ;;  %4569 = vmatpush3.bf16.msra.mxu0 %v4566_v41  ;;  %v6450_v41 = vld [vmem:[#allocation13_spill] sm:$0xff]  ;;  %v6454_v62 = vld [vmem:[#allocation16_spill] sm:$0xff] }
  0xc7   : > { %4571 = vmatprep.subr.bf16.mxu0 %v4570_v31 }
  0xc8   : > { %4033 = vmatmul.mubr.msk.f32.gmra.mrb[20].mxu1 %vm371_vm1, %v5579_v12 }
  0xc9   : > { %4329 = vmatmul.mubr.msk.f32.gmra.mrb[4].mxu0 %vm371_vm1, %v6447_v42  ;;  %4035 = vmatprep.mubr.msk.f32.mxu1 %vm371_vm1, %v5583_v48  ;;  %v6455_v42 = vld [vmem:[#allocation17_spill] sm:$0xff] }
  0xca   : > { %4331 = vmatprep.mubr.msk.f32.mxu0 %vm371_vm1, %v6448_v57  ;;  %4573 = vmatpush3.bf16.msra.mxu0 %v4570_v31  ;;  %v6453_v31 = vld [vmem:[#allocation42_spill] sm:$0xff]  ;;  %v6457_v57 = vld [vmem:[#allocation19_spill] sm:$0xff] }
  0xcb   : > { %4575 = vmatprep.subr.bf16.mxu0 %v4574_v10 }
  0xcc   : > { %4036 = vmatmul.mubr.msk.f32.gmra.mrb[22].mxu1 %vm371_vm1, %v6449_v50 }
  0xcd   : > { %4332 = vmatmul.mubr.msk.f32.gmra.mrb[6].mxu0 %vm371_vm1, %v6450_v41  ;;  %4038 = vmatprep.mubr.msk.f32.mxu1 %vm371_vm1, %v5606_v18  ;;  %v6458_v41 = vld [vmem:[#allocation20_spill] sm:$0xff] }
  0xce   : > { %4334 = vmatprep.mubr.msk.f32.mxu0 %vm371_vm1, %v6451_v24  ;;  %4577 = vmatpush3.bf16.msra.mxu0 %v4574_v10  ;;  %v6456_v10 = vld [vmem:[#allocation18_spill] sm:$0xff]  ;;  %v6459_v24 = vld [vmem:[#allocation21_spill] sm:$0xff] }
  0xd0   : > { %4039 = vmatmul.mubr.msk.f32.gmra.mrb[24].mxu1 %vm371_vm1, %v5625_v49 }
  0xd1   : > { %4335 = vmatmul.mubr.msk.f32.gmra.mrb[8].mxu0 %vm371_vm1, %v6452_v17  ;;  %4041 = vmatprep.mubr.msk.f32.mxu1 %vm371_vm1, %v6453_v31  ;;  %v4851_v17 = vld [vmem:[%s4959_s24 + $0x18] sm:$0xff]  ;;  %v6037_v31 = vld [vmem:[%s4959_s24 + $0x1a8] sm:$0x3] }
  0xd2   : > { %4337 = vmatprep.mubr.msk.f32.mxu0 %vm371_vm1, %v6454_v62  ;;  %v6460_v62 = vld [vmem:[#allocation22_spill] sm:$0xff] }
  0xd4   : > { %4042 = vmatmul.mubr.msk.f32.gmra.mrb[26].mxu1 %vm371_vm1, %v5644_v43  ;;  %v6470_v43 = vld [vmem:[#allocation35_spill] sm:$0xff] }
  0xd5   : > { %4338 = vmatmul.mubr.msk.f32.gmra.mrb[10].mxu0 %vm371_vm1, %v6455_v42  ;;  %4044 = vmatprep.mubr.msk.f32.mxu1 %vm371_vm1, %v5648_v28  ;;  %v4852_v42 = vld [vmem:[%s4959_s24 + $0x20] sm:$0xff] }
  0xd6   : > { %4340 = vmatprep.mubr.msk.f32.mxu0 %vm371_vm1, %v6456_v10  ;;  %v6461_v10 = vld [vmem:[#allocation24_spill] sm:$0xff]  ;;  %v6468_v28 = vld [vmem:[#allocation34_spill] sm:$0xff] }
  0xd8   : > { %4045 = vmatmul.mubr.msk.f32.gmra.mrb[28].mxu1 %vm371_vm1, %v5668_v60  ;;  %v6467_v60 = vld [vmem:[#allocation32_spill] sm:$0xff] }
  0xd9   : > { %4341 = vmatmul.mubr.msk.f32.gmra.mrb[12].mxu0 %vm371_vm1, %v6457_v57  ;;  %4047 = vmatprep.mubr.msk.f32.mxu1 %vm371_vm1, %v5672_v9  ;;  %v4853_v57 = vld [vmem:[%s4959_s24 + $0x30] sm:$0xff] }
  0xda   : > { %4343 = vmatprep.mubr.msk.f32.mxu0 %vm371_vm1, %v6458_v41  ;;  %v4856_v9 = vld [vmem:[%s4959_s24 + $0x50] sm:$0xff] }
  0xdc   : > { %4048 = vmatmul.mubr.msk.f32.gmra.mrb[30].mxu1 %vm371_vm1, %v5688_v36  ;;  %v6464_v36 = vld [vmem:[#allocation28_spill] sm:$0xff] }
  0xdd   : > { %4344 = vmatmul.mubr.msk.f32.gmra.mrb[14].mxu0 %vm371_vm1, %v6459_v24  ;;  %4066 = vmatprep.mubr.msk.f32.mxu1 %vm371_vm1, %v4851_v17  ;;  %v6463_v17 = vld [vmem:[#allocation3_spill] sm:$0xff] }
  0xde   : > { %4346 = vmatprep.mubr.msk.f32.mxu0 %vm371_vm1, %v6460_v62 }
  0xe0   : > { %4067 = vmatmul.mubr.msk.f32.vlgmr.msra.gmra.mrb[0].mxu1 %vm371_vm1, %v4852_v42  ;;  %v4855_v42 = vld [vmem:[%s4959_s24 + $0x48] sm:$0xff] }
  0xe1   : > { %4347 = vmatmul.mubr.msk.f32.gmra.mrb[16].mxu0 %vm371_vm1, %v6461_v10  ;;  %4582 = vmatpush3.bf16.msra.mxu1 %v6437_v51  ;;  %v6465_v51 = vld [vmem:[#allocation30_spill] sm:$0xff] }
  0xe2   : > { %4069 = vmatprep.mubr.msk.f32.mxu1 %vm371_vm1, %v4853_v57  ;;  %4349 = vmatprep.mubr.msk.f32.mxu0 %vm371_vm1, %v6462_v27  ;;  %v6466_v57 = vld [vmem:[#allocation4_spill] sm:$0xff] }
  0xe3   : > { %4579 = vmatprep.subr.bf16.mxu1 %v6463_v17 }
  0xe4   : > { %4070 = vmatmul.mubr.msk.f32.gmra.mrb[2].mxu1 %vm371_vm1, %v4854_v7  ;;  %v4857_v7 = vld [vmem:[%s4959_s24 + $0x60] sm:$0xff] }
  0xe5   : > { %4350 = vmatmul.mubr.msk.f32.gmra.mrb[18].mxu0 %vm371_vm1, %v6464_v36  ;;  %4072 = vmatprep.mubr.msk.f32.mxu1 %vm371_vm1, %v4855_v42  ;;  %v6469_v42 = vld [vmem:[#allocation5_spill] sm:$0xff] }
  0xe6   : > { %4352 = vmatprep.mubr.msk.f32.mxu0 %vm371_vm1, %v6465_v51  ;;  %4583 = vmatpush3.bf16.msra.mxu1 %v6463_v17  ;;  %v4858_v17 = vld [vmem:[%s4959_s24 + $0x68] sm:$0xff] }
  0xe7   : > { %4580 = vmatprep.subr.bf16.mxu1 %v6466_v57 }
  0xe8   : > { %4073 = vmatmul.mubr.msk.f32.gmra.mrb[4].mxu1 %vm371_vm1, %v4856_v9  ;;  %v6471_v9 = vld [vmem:[#allocation37_spill] sm:$0xff] }
  0xe9   : > { %4353 = vmatmul.mubr.msk.f32.gmra.mrb[20].mxu0 %vm371_vm1, %v6467_v60  ;;  %4075 = vmatprep.mubr.msk.f32.mxu1 %vm371_vm1, %v4857_v7  ;;  %v1634_v7 = vrot.slane %v5656_v32, 1 }
  0xea   : > { %4355 = vmatprep.mubr.msk.f32.mxu0 %vm371_vm1, %v6468_v28  ;;  %4584 = vmatpush3.bf16.msra.mxu1 %v6466_v57  ;;  %v1635_v57 = vrot.slane %v5659_v19, 1  ;;  %v4859_v28 = vld [vmem:[%s4959_s24 + $0x80] sm:$0xff]  ;;  %s3497_s24 = sshll.u32 %s6488_s13, 8 }
  0xeb   : > { %4581 = vmatprep.subr.bf16.mxu1 %v6469_v42  ;;  %s6205_s20 = scalar_lea.vmem %s6310_s3, %s3497_s24 }
  0xec   : > { %4076 = vmatmul.mubr.msk.f32.gmra.mrb[6].mxu1 %vm371_vm1, %v4858_v17  ;;  %v6472_v17 = vld [vmem:[#allocation38_spill] sm:$0xff]  ;;  %v6034_v60 = vsel %vm281_vm0, %v1634_v7, %v1635_v57 }
  0xed   : > { %4356 = vmatmul.mubr.msk.f32.gmra.mrb[22].mxu0 %vm371_vm1, %v6470_v43  ;;  %4078 = vmatprep.mubr.msk.f32.mxu1 %vm371_vm1, %v5084_v14  ;;  %v6473_v43 = vld [vmem:[#allocation39_spill] sm:$0xff]  ;;  %v1637_v14 = vrot.slane %v5677_v40, 1  ;;  %v2460_v40 = vrot.slane %v6037_v31, 1 }
  0xee   : > { %4358 = vmatprep.mubr.msk.f32.mxu0 %vm371_vm1, %v6471_v9  ;;  %4585 = vmatpush3.bf16.msra.mxu1 %v6469_v42  ;;  %v2457_v42 = vrot.slane %v5877_v34, 1  ;;  %v2458_v9 = vrot.slane %v5888_v23, 1 }
  0xf0   : > { %4079 = vmatmul.mubr.msk.f32.gmra.mrb[8].mxu1 %vm371_vm1, %v4859_v28  ;;  %v6474_v28 = vld [vmem:[#allocation40_spill] sm:$0xff]  ;;  %v2459_v7 = vsel %vm281_vm0, %v2457_v42, %v2458_v9 }
  0xf1   : > { %4359 = vmatmul.mubr.msk.f32.gmra.mrb[24].mxu0 %vm371_vm1, %v6472_v17  ;;  %4081 = vmatprep.mubr.msk.f32.mxu1 %vm371_vm1, %v5115_v33  ;;  %v6048_v33 = vsel %vm281_vm0, %v1635_v57, %v1637_v14 }
  0xf2   : > { %4361 = vmatprep.mubr.msk.f32.mxu0 %vm371_vm1, %v6473_v43 }
  0xf4   : > { %4082 = vmatmul.mubr.msk.f32.gmra.mrb[10].mxu1 %vm371_vm1, %v5120_v35  ;;  %v2461_v35 = vsel %vm281_vm0, %v2458_v9, %v2460_v40 }
  0xf5   : > { %4362 = vmatmul.mubr.msk.f32.gmra.mrb[26].mxu0 %vm371_vm1, %v6474_v28  ;;  %4084 = vmatprep.mubr.msk.f32.mxu1 %vm371_vm1, %v5157_v53  ;;  %v6477_v53 = vld [vmem:[#allocation43_spill] sm:$0xff] }
  0xf6   : > { %4364 = vmatprep.mubr.msk.f32.mxu0 %vm371_vm1, %v6034_v60 }
  0xf8   : > { %4085 = vmatmul.mubr.msk.f32.gmra.mrb[12].mxu1 %vm371_vm1, %v5160_v54  ;;  %v6478_v54 = vld [vmem:[#allocation34_spill] sm:$0xff] }
  0xf9   : > { %4365 = vmatmul.mubr.msk.f32.gmra.mrb[28].mxu0 %vm371_vm1, %v6048_v33  ;;  %4087 = vmatprep.mubr.msk.f32.mxu1 %vm371_vm1, %v5184_v2  ;;  %v6480_v2 = vld [vmem:[#allocation35_spill] sm:$0xff] }
  0xfa   : > { %4367 = vmatprep.mubr.msk.f32.mxu0 %vm371_vm1, %v2459_v7 }
  0xfc   : > { %4088 = vmatmul.mubr.msk.f32.gmra.mrb[14].mxu1 %vm371_vm1, %v5187_v3  ;;  %v6481_v3 = vld [vmem:[#allocation45_spill] sm:$0xff] }
  0xfd   : > { %4368 = vmatmul.mubr.msk.f32.gmra.mrb[30].mxu0 %vm371_vm1, %v2461_v35  ;;  %4090 = vmatprep.mubr.msk.f32.mxu1 %vm371_vm1, %v5233_v38  ;;  %v2732_v38 = vrot.slane %v5877_v34, 2 }
  0xfe   : > { %4386 = vmatprep.mubr.msk.f32.mxu0 %vm371_vm1, %v5295_v29  ;;  %v6483_v29 = vld [vmem:[#allocation46_spill] sm:$0xff] }
 0x100   : > { %4091 = vmatmul.mubr.msk.f32.gmra.mrb[16].mxu1 %vm371_vm1, %v5236_v39  ;;  %v2733_v39 = vrot.slane %v5888_v23, 2 }
 0x101   : > { %4387 = vmatmul.mubr.msk.f32.vlgmr.msra.gmra.mrb[0].mxu0 %vm371_vm1, %v5321_v11  ;;  %4093 = vmatprep.mubr.msk.f32.mxu1 %vm371_vm1, %v5262_v61  ;;  %v6484_v61 = vld [vmem:[#allocation47_spill] sm:$0xff] }
 0x102   : > { %4389 = vmatprep.mubr.msk.f32.mxu0 %vm371_vm1, %v6434_v25  ;;  %v2734_v11 = vsel %vm950_vm2, %v2732_v38, %v2733_v39 }
 0x104   : > { %4094 = vmatmul.mubr.msk.f32.gmra.mrb[18].mxu1 %vm371_vm1, %v5265_v5  ;;  %v6485_v5 = vld [vmem:[#allocation48_spill] sm:$0xff] }
 0x105   : > { %4390 = vmatmul.mubr.msk.f32.gmra.mrb[2].mxu0 %vm371_vm1, %v6435_v1  ;;  %4096 = vmatprep.mubr.msk.f32.mxu1 %vm371_vm1, %v5300_v8  ;;  %v6482_v8 = vld [vmem:[#allocation37_spill] sm:$0xff] }
 0x106   : > { %4392 = vmatprep.mubr.msk.f32.mxu0 %vm371_vm1, %v6436_v30 }
 0x108   : > { %4097 = vmatmul.mubr.msk.f32.gmra.mrb[20].mxu1 %vm371_vm1, %v5303_v37  ;;  %v2735_v37 = vrot.slane %v6037_v31, 2 }
 0x109   : > { %4393 = vmatmul.mubr.msk.f32.gmra.mrb[4].mxu0 %vm371_vm1, %v6438_v0  ;;  %4099 = vmatprep.mubr.msk.f32.mxu1 %vm371_vm1, %v5342_v56  ;;  %v6479_v56 = vld [vmem:[#allocation44_spill] sm:$0xff] }
 0x10a   : > { %4395 = vmatprep.mubr.msk.f32.mxu0 %vm371_vm1, %v6439_v16 }
 0x10c   : > { %4100 = vmatmul.mubr.msk.f32.gmra.mrb[22].mxu1 %vm371_vm1, %v5345_v45  ;;  %v6476_v45 = vld [vmem:[#allocation32_spill] sm:$0xff] }
 0x10d   : > { %4396 = vmatmul.mubr.msk.f32.gmra.mrb[6].mxu0 %vm371_vm1, %v6440_v47  ;;  %4102 = vmatprep.mubr.msk.f32.mxu1 %vm371_vm1, %v5383_v6  ;;  %v6475_v6 = vld [vmem:[#allocation42_spill] sm:$0xff] }
 0x10e   : > { %4398 = vmatprep.mubr.msk.f32.mxu0 %vm371_vm1, %v5456_v4 }
 0x110   : > { %4103 = vmatmul.mubr.msk.f32.gmra.mrb[24].mxu1 %vm371_vm1, %v5386_v58  ;;  %v6486_v58 = vld [vmem:[#allocation49_spill] sm:$0xff] }
 0x111   : > { %4399 = vmatmul.mubr.msk.f32.gmra.mrb[8].mxu0 %vm371_vm1, %v6441_v22  ;;  %4105 = vmatprep.mubr.msk.f32.mxu1 %vm371_vm1, %v5424_v59  ;;  %v2736_v59 = vsel %vm950_vm2, %v2733_v39, %v2735_v37 }
 0x112   : > { %4401 = vmatprep.mubr.msk.f32.mxu0 %vm371_vm1, %v5492_v26 }
 0x114   : > { %4106 = vmatmul.mubr.msk.f32.gmra.mrb[26].mxu1 %vm371_vm1, %v5427_v21 }
 0x115   : > { %4402 = vmatmul.mubr.msk.f32.gmra.mrb[10].mxu0 %vm371_vm1, %v5509_v13  ;;  %4108 = vmatprep.mubr.msk.f32.mxu1 %vm371_vm1, %v5461_v63 }
 0x116   : > { %4404 = vmatprep.mubr.msk.f32.mxu0 %vm371_vm1, %v5516_v20 }
 0x118   : > { %4109 = vmatmul.mubr.msk.f32.gmra.mrb[28].mxu1 %vm371_vm1, %v5464_v44 }
 0x119   : > { %4405 = vmatmul.mubr.msk.f32.gmra.mrb[12].mxu0 %vm371_vm1, %v5532_v15  ;;  %4111 = vmatprep.mubr.msk.f32.mxu1 %vm371_vm1, %v5656_v32 }
 0x11a   : > { %4407 = vmatprep.mubr.msk.f32.mxu0 %vm371_vm1, %v5536_v46 }
 0x11c   : > { %4112 = vmatmul.mubr.msk.f32.gmra.mrb[30].mxu1 %vm371_vm1, %v5659_v19  ;;  %v6200_v19 = vld [vmem:[%s6309_s2] ss:$0 sm:$0xff] }
 0x11d   : > { %4408 = vmatmul.mubr.msk.f32.gmra.mrb[14].mxu0 %vm371_vm1, %v5555_v55  ;;  %4154 = vmatprep.mubr.msk.f32.mxu1 %vm371_vm1, %v6458_v41 }
 0x11e   : > { %4410 = vmatprep.mubr.msk.f32.mxu0 %vm371_vm1, %v5559_v52 }
 0x120   : > { %4155 = vmatmul.mubr.msk.f32.vlgmr.msra.gmra.mrb[16].mxu1 %vm371_vm1, %v6459_v24 }
 0x121   : > { %4411 = vmatmul.mubr.msk.f32.gmra.mrb[16].mxu0 %vm371_vm1, %v5579_v12  ;;  %4157 = vmatprep.mubr.msk.f32.mxu1 %vm371_vm1, %v6460_v62 }
 0x122   : > { %4413 = vmatprep.mubr.msk.f32.mxu0 %vm371_vm1, %v5583_v48 }
 0x124   : > { %4158 = vmatmul.mubr.msk.f32.gmra.mrb[18].mxu1 %vm371_vm1, %v6461_v10 }
 0x125   : > { %4414 = vmatmul.mubr.msk.f32.gmra.mrb[18].mxu0 %vm371_vm1, %v6449_v50  ;;  %4160 = vmatprep.mubr.msk.f32.mxu1 %vm371_vm1, %v6462_v27 }
 0x126   : > { %4416 = vmatprep.mubr.msk.f32.mxu0 %vm371_vm1, %v5606_v18 }
 0x128   : > { %4161 = vmatmul.mubr.msk.f32.gmra.mrb[20].mxu1 %vm371_vm1, %v6464_v36 }
 0x129   : > { %4417 = vmatmul.mubr.msk.f32.gmra.mrb[20].mxu0 %vm371_vm1, %v5625_v49  ;;  %4163 = vmatprep.mubr.msk.f32.mxu1 %vm371_vm1, %v6465_v51 }
 0x12a   : > { %4419 = vmatprep.mubr.msk.f32.mxu0 %vm371_vm1, %v6475_v6 }
 0x12c   : > { %4164 = vmatmul.mubr.msk.f32.gmra.mrb[22].mxu1 %vm371_vm1, %v6476_v45 }
 0x12d   : > { %4420 = vmatmul.mubr.msk.f32.gmra.mrb[22].mxu0 %vm371_vm1, %v6477_v53  ;;  %4166 = vmatprep.mubr.msk.f32.mxu1 %vm371_vm1, %v6478_v54 }
 0x12e   : > { %4422 = vmatprep.mubr.msk.f32.mxu0 %vm371_vm1, %v6479_v56 }
 0x130   : > { %4167 = vmatmul.mubr.msk.f32.gmra.mrb[24].mxu1 %vm371_vm1, %v6480_v2 }
 0x131   : > { %4423 = vmatmul.mubr.msk.f32.gmra.mrb[24].mxu0 %vm371_vm1, %v6481_v3  ;;  %4169 = vmatprep.mubr.msk.f32.mxu1 %vm371_vm1, %v6482_v8 }
 0x132   : > { %4425 = vmatprep.mubr.msk.f32.mxu0 %vm371_vm1, %v6483_v29 }
 0x134   : > { %4170 = vmatmul.mubr.msk.f32.gmra.mrb[26].mxu1 %vm371_vm1, %v6472_v17 }
 0x135   : > { %4426 = vmatmul.mubr.msk.f32.gmra.mrb[26].mxu0 %vm371_vm1, %v6484_v61  ;;  %4172 = vmatprep.mubr.msk.f32.mxu1 %vm371_vm1, %v6473_v43 }
 0x136   : > { %4428 = vmatprep.mubr.msk.f32.mxu0 %vm371_vm1, %v6485_v5 }
 0x138   : > { %4173 = vmatmul.mubr.msk.f32.gmra.mrb[28].mxu1 %vm371_vm1, %v6474_v28 }
 0x139   : > { %4429 = vmatmul.mubr.msk.f32.gmra.mrb[28].mxu0 %vm371_vm1, %v6486_v58  ;;  %4175 = vmatprep.mubr.msk.f32.mxu1 %vm371_vm1, %v6034_v60 }
 0x13a   : > { %4431 = vmatprep.mubr.msk.f32.mxu0 %vm371_vm1, %v2734_v11 }
 0x13c   : > { %4176 = vmatmul.mubr.msk.f32.gmra.mrb[30].mxu1 %vm371_vm1, %v6048_v33 }
 0x13d   : > { %4432 = vmatmul.mubr.msk.f32.gmra.mrb[30].mxu0 %vm371_vm1, %v2736_v59 }
 0x1b3   : > { %v4068_v21 = vpop.f32.mrb[0].mxu1 }
 0x1b4   : > { %v1442_v4 = vpop.f32.mrb[1].mxu1 }
 0x1b7   : > { %v4071_v63 = vpop.f32.mrb[2].mxu1 }
 0x1b8   : > { %v1452_v44 = vpop.f32.mrb[3].mxu1 }
 0x1bb   : > { %v4074_v20 = vpop.f32.mrb[4].mxu1 }
 0x1bc   : > { %v1462_v26 = vpop.f32.mrb[5].mxu1 }
 0x1bf   : > { %v4077_v13 = vpop.f32.mrb[6].mxu1 }
 0x1c0   : > { %v1472_v15 = vpop.f32.mrb[7].mxu1 }
 0x1c3   : > { %v4080_v46 = vpop.f32.mrb[8].mxu1 }
 0x1c4   : > { %v1482_v55 = vpop.f32.mrb[9].mxu1 }
 0x1c7   : > { %v4083_v52 = vpop.f32.mrb[10].mxu1 }
 0x1c8   : > { %v1492_v12 = vpop.f32.mrb[11].mxu1 }
 0x1cb   : > { %v4086_v48 = vpop.f32.mrb[12].mxu1 }
 0x1cc   : > { %v1502_v18 = vpop.f32.mrb[13].mxu1 }
 0x1cf   : > { %v4089_v49 = vpop.f32.mrb[14].mxu1 }
 0x1d0   : > { %v6194_v43 = vpop.f32.mrb[15].mxu1 }
 0x1d4   : > { %v4388_v32 = vpop.f32.mrb[0].mxu0 }
 0x1d5   : > { %v4586_v60 = vadd.f32 %v4388_v32, %v4068_v21  ;;  %v2816_v36 = vpop.f32.mrb[1].mxu0 }
 0x1d6   : > { %v4587_v27 = vadd.f32 %v2816_v36, %v1442_v4 }
 0x1d7   : > { %v3015_v25 = vadd.f32 %v4586_v60, %v6200_v19 }
 0x1d8   : > { %v3014_v1 = vadd.f32 %v4587_v27, %v6200_v19  ;;  %v4391_v30 = vpop.f32.mrb[2].mxu0 }
 0x1d9   : > { %3048 = vst.msk [vmem:[%s6205_s20 + $0x8] sm:$0xff] %vm3046_vm3, %v3015_v25  ;;  %v4588_v0 = vadd.f32 %v4391_v30, %v4071_v63  ;;  %v2826_v16 = vpop.f32.mrb[3].mxu0 }
 0x1da   : > { %3047 = vst.msk [vmem:[%s6205_s20] sm:$0xff] %vm3046_vm3, %v3014_v1  ;;  %v4589_v47 = vadd.f32 %v2826_v16, %v1452_v44 }
 0x1db   : > { %v3017_v34 = vadd.f32 %v4588_v0, %v6200_v19 }
 0x1dc   : > { %v3016_v22 = vadd.f32 %v4589_v47, %v6200_v19  ;;  %v4394_v23 = vpop.f32.mrb[4].mxu0 }
 0x1dd   : > { %3050 = vst.msk [vmem:[%s6205_s20 + $0x18] sm:$0xff] %vm3046_vm3, %v3017_v34  ;;  %v4590_v50 = vadd.f32 %v4394_v23, %v4074_v20  ;;  %v2836_v31 = vpop.f32.mrb[5].mxu0 }
 0x1de   : > { %3049 = vst.msk [vmem:[%s6205_s20 + $0x10] sm:$0xff] %vm3046_vm3, %v3016_v22  ;;  %v4591_v41 = vadd.f32 %v2836_v31, %v1462_v26 }
 0x1df   : > { %v3019_v24 = vadd.f32 %v4590_v50, %v6200_v19 }
 0x1e0   : > { %v3018_v62 = vadd.f32 %v4591_v41, %v6200_v19  ;;  %v4397_v10 = vpop.f32.mrb[6].mxu0 }
 0x1e1   : > { %3052 = vst.msk [vmem:[%s6205_s20 + $0x28] sm:$0xff] %vm3046_vm3, %v3019_v24  ;;  %v4592_v51 = vadd.f32 %v4397_v10, %v4077_v13  ;;  %v2846_v9 = vpop.f32.mrb[7].mxu0 }
 0x1e2   : > { %3051 = vst.msk [vmem:[%s6205_s20 + $0x20] sm:$0xff] %vm3046_vm3, %v3018_v62  ;;  %v4593_v57 = vadd.f32 %v2846_v9, %v1472_v15 }
 0x1e3   : > { %v3021_v17 = vadd.f32 %v4592_v51, %v6200_v19 }
 0x1e4   : > { %v3020_v14 = vadd.f32 %v4593_v57, %v6200_v19  ;;  %v4400_v42 = vpop.f32.mrb[8].mxu0 }
 0x1e5   : > { %3054 = vst.msk [vmem:[%s6205_s20 + $0x38] sm:$0xff] %vm3046_vm3, %v3021_v17  ;;  %v4594_v28 = vadd.f32 %v4400_v42, %v4080_v46  ;;  %v2856_v33 = vpop.f32.mrb[9].mxu0 }
 0x1e6   : > { %3053 = vst.msk [vmem:[%s6205_s20 + $0x30] sm:$0xff] %vm3046_vm3, %v3020_v14  ;;  %v4595_v40 = vadd.f32 %v2856_v33, %v1482_v55 }
 0x1e7   : > { %v3023_v7 = vadd.f32 %v4594_v28, %v6200_v19 }
 0x1e8   : > { %v3022_v35 = vadd.f32 %v4595_v40, %v6200_v19  ;;  %v4403_v6 = vpop.f32.mrb[10].mxu0 }
 0x1e9   : > { %3056 = vst.msk [vmem:[%s6205_s20 + $0x48] sm:$0xff] %vm3046_vm3, %v3023_v7  ;;  %v4596_v45 = vadd.f32 %v4403_v6, %v4083_v52  ;;  %v2866_v53 = vpop.f32.mrb[11].mxu0 }
 0x1ea   : > { %3055 = vst.msk [vmem:[%s6205_s20 + $0x40] sm:$0xff] %vm3046_vm3, %v3022_v35  ;;  %v4597_v54 = vadd.f32 %v2866_v53, %v1492_v12 }
 0x1eb   : > { %v3025_v56 = vadd.f32 %v4596_v45, %v6200_v19 }
 0x1ec   : > { %v3024_v2 = vadd.f32 %v4597_v54, %v6200_v19  ;;  %v4406_v3 = vpop.f32.mrb[12].mxu0 }
 0x1ed   : > { %3058 = vst.msk [vmem:[%s6205_s20 + $0x58] sm:$0xff] %vm3046_vm3, %v3025_v56  ;;  %v4598_v8 = vadd.f32 %v4406_v3, %v4086_v48  ;;  %v2876_v29 = vpop.f32.mrb[13].mxu0 }
 0x1ee   : > { %3057 = vst.msk [vmem:[%s6205_s20 + $0x50] sm:$0xff] %vm3046_vm3, %v3024_v2  ;;  %v4599_v38 = vadd.f32 %v2876_v29, %v1502_v18 }
 0x1ef   : > { %v3027_v39 = vadd.f32 %v4598_v8, %v6200_v19 }
 0x1f0   : > { %v3026_v61 = vadd.f32 %v4599_v38, %v6200_v19  ;;  %v4409_v5 = vpop.f32.mrb[14].mxu0 }
 0x1f1   : > { %3060 = vst.msk [vmem:[%s6205_s20 + $0x68] sm:$0xff] %vm3046_vm3, %v3027_v39  ;;  %v4600_v37 = vadd.f32 %v4409_v5, %v4089_v49  ;;  %v2886_v11 = vpop.f32.mrb[15].mxu0 }
 0x1f2   : > { %3059 = vst.msk [vmem:[%s6205_s20 + $0x60] sm:$0xff] %vm3046_vm3, %v3026_v61  ;;  %v4601_v58 = vadd.f32 %v2886_v11, %v6194_v43 }
 0x1f3   : > { %v3029_v59 = vadd.f32 %v4600_v37, %v6200_v19  ;;  %v4156_v21 = vpop.f32.mrb[16].mxu1 }
 0x1f4   : > { %v3028_v4 = vadd.f32 %v4601_v58, %v6200_v19  ;;  %v4412_v63 = vpop.f32.mrb[16].mxu0  ;;  %v1798_v44 = vpop.f32.mrb[17].mxu1 }
 0x1f5   : > { %3062 = vst.msk [vmem:[%s6205_s20 + $0x78] sm:$0xff] %vm3046_vm3, %v3029_v59  ;;  %v4602_v20 = vadd.f32 %v4412_v63, %v4156_v21  ;;  %v2896_v26 = vpop.f32.mrb[17].mxu0 }
 0x1f6   : > { %3061 = vst.msk [vmem:[%s6205_s20 + $0x70] sm:$0xff] %vm3046_vm3, %v3028_v4  ;;  %v4603_v13 = vadd.f32 %v2896_v26, %v1798_v44 }
 0x1f7   : > { %v3031_v15 = vadd.f32 %v4602_v20, %v6200_v19  ;;  %v4159_v46 = vpop.f32.mrb[18].mxu1 }
 0x1f8   : > { %v3030_v55 = vadd.f32 %v4603_v13, %v6200_v19  ;;  %v4415_v52 = vpop.f32.mrb[18].mxu0  ;;  %v1808_v12 = vpop.f32.mrb[19].mxu1 }
 0x1f9   : > { %3064 = vst.msk [vmem:[%s6205_s20 + $0x88] sm:$0xff] %vm3046_vm3, %v3031_v15  ;;  %v4604_v48 = vadd.f32 %v4415_v52, %v4159_v46  ;;  %v2906_v18 = vpop.f32.mrb[19].mxu0 }
 0x1fa   : > { %3063 = vst.msk [vmem:[%s6205_s20 + $0x80] sm:$0xff] %vm3046_vm3, %v3030_v55  ;;  %v4605_v49 = vadd.f32 %v2906_v18, %v1808_v12 }
 0x1fb   : > { %v3033_v43 = vadd.f32 %v4604_v48, %v6200_v19  ;;  %v4162_v32 = vpop.f32.mrb[20].mxu1 }
 0x1fc   : > { %v3032_v60 = vadd.f32 %v4605_v49, %v6200_v19  ;;  %v4418_v36 = vpop.f32.mrb[20].mxu0  ;;  %v1818_v27 = vpop.f32.mrb[21].mxu1 }
 0x1fd   : > { %3066 = vst.msk [vmem:[%s6205_s20 + $0x98] sm:$0xff] %vm3046_vm3, %v3033_v43  ;;  %v4606_v25 = vadd.f32 %v4418_v36, %v4162_v32  ;;  %v2916_v1 = vpop.f32.mrb[21].mxu0 }
 0x1fe   : > { %3065 = vst.msk [vmem:[%s6205_s20 + $0x90] sm:$0xff] %vm3046_vm3, %v3032_v60  ;;  %v4607_v30 = vadd.f32 %v2916_v1, %v1818_v27 }
 0x1ff   : > { %v3035_v0 = vadd.f32 %v4606_v25, %v6200_v19  ;;  %v4165_v16 = vpop.f32.mrb[22].mxu1 }
 0x200   : > { %v3034_v47 = vadd.f32 %v4607_v30, %v6200_v19  ;;  %v4421_v34 = vpop.f32.mrb[22].mxu0  ;;  %v1828_v22 = vpop.f32.mrb[23].mxu1 }
 0x201   : > { %3068 = vst.msk [vmem:[%s6205_s20 + $0xa8] sm:$0xff] %vm3046_vm3, %v3035_v0  ;;  %v4608_v23 = vadd.f32 %v4421_v34, %v4165_v16  ;;  %v2926_v50 = vpop.f32.mrb[23].mxu0 }
 0x202   : > { %3067 = vst.msk [vmem:[%s6205_s20 + $0xa0] sm:$0xff] %vm3046_vm3, %v3034_v47  ;;  %v4609_v31 = vadd.f32 %v2926_v50, %v1828_v22 }
 0x203   : > { %v3037_v41 = vadd.f32 %v4608_v23, %v6200_v19  ;;  %v4168_v24 = vpop.f32.mrb[24].mxu1 }
 0x204   : > { %v3036_v62 = vadd.f32 %v4609_v31, %v6200_v19  ;;  %v4424_v10 = vpop.f32.mrb[24].mxu0  ;;  %v1838_v51 = vpop.f32.mrb[25].mxu1 }
 0x205   : > { %3070 = vst.msk [vmem:[%s6205_s20 + $0xb8] sm:$0xff] %vm3046_vm3, %v3037_v41  ;;  %v4610_v9 = vadd.f32 %v4424_v10, %v4168_v24  ;;  %v2936_v57 = vpop.f32.mrb[25].mxu0 }
 0x206   : > { %3069 = vst.msk [vmem:[%s6205_s20 + $0xb0] sm:$0xff] %vm3046_vm3, %v3036_v62  ;;  %v4611_v17 = vadd.f32 %v2936_v57, %v1838_v51 }
 0x207   : > { %v3039_v14 = vadd.f32 %v4610_v9, %v6200_v19  ;;  %v4171_v42 = vpop.f32.mrb[26].mxu1 }
 0x208   : > { %v3038_v28 = vadd.f32 %v4611_v17, %v6200_v19  ;;  %v4427_v33 = vpop.f32.mrb[26].mxu0  ;;  %v1848_v40 = vpop.f32.mrb[27].mxu1 }
 0x209   : > { %3072 = vst.msk [vmem:[%s6205_s20 + $0xc8] sm:$0xff] %vm3046_vm3, %v3039_v14  ;;  %v4612_v7 = vadd.f32 %v4427_v33, %v4171_v42  ;;  %v2946_v35 = vpop.f32.mrb[27].mxu0 }
 0x20a   : > { %3071 = vst.msk [vmem:[%s6205_s20 + $0xc0] sm:$0xff] %vm3046_vm3, %v3038_v28  ;;  %v4613_v6 = vadd.f32 %v2946_v35, %v1848_v40 }
 0x20b   : > { %v3041_v45 = vadd.f32 %v4612_v7, %v6200_v19  ;;  %v4174_v53 = vpop.f32.mrb[28].mxu1 }
 0x20c   : > { %v3040_v54 = vadd.f32 %v4613_v6, %v6200_v19  ;;  %v4430_v56 = vpop.f32.mrb[28].mxu0  ;;  %v1858_v2 = vpop.f32.mrb[29].mxu1 }
 0x20d   : > { %3074 = vst.msk [vmem:[%s6205_s20 + $0xd8] sm:$0xff] %vm3046_vm3, %v3041_v45  ;;  %v4614_v3 = vadd.f32 %v4430_v56, %v4174_v53  ;;  %v2956_v8 = vpop.f32.mrb[29].mxu0 }
 0x20e   : > { %3073 = vst.msk [vmem:[%s6205_s20 + $0xd0] sm:$0xff] %vm3046_vm3, %v3040_v54  ;;  %v4615_v29 = vadd.f32 %v2956_v8, %v1858_v2 }
 0x20f   : > { %v3043_v38 = vadd.f32 %v4614_v3, %v6200_v19  ;;  %v4177_v39 = vpop.f32.mrb[30].mxu1 }
 0x210   : > { %v3042_v61 = vadd.f32 %v4615_v29, %v6200_v19  ;;  %v4433_v5 = vpop.f32.mrb[30].mxu0  ;;  %v1868_v37 = vpop.f32.mrb[31].mxu1 }
 0x211   : > { %3076 = vst.msk [vmem:[%s6205_s20 + $0xe8] sm:$0xff] %vm3046_vm3, %v3043_v38  ;;  %v4616_v11 = vadd.f32 %v4433_v5, %v4177_v39  ;;  %v2966_v58 = vpop.f32.mrb[31].mxu0 }
 0x212   : > { %3075 = vst.msk [vmem:[%s6205_s20 + $0xe0] sm:$0xff] %vm3046_vm3, %v3042_v61  ;;  %v4617_v59 = vadd.f32 %v2966_v58, %v1868_v37 }
 0x213   : > { %v3045_v21 = vadd.f32 %v4616_v11, %v6200_v19 }
 0x214   : > { %v3044_v4 = vadd.f32 %v4617_v59, %v6200_v19 }
 0x215   : > { %3078 = vst.msk [vmem:[%s6205_s20 + $0xf8] sm:$0xff] %vm3046_vm3, %v3045_v21 }
 0x216   : > { %3077 = vst.msk [vmem:[%s6205_s20 + $0xf0] sm:$0xff] %vm3046_vm3, %v3044_v4 }
 0x217 PF: > { %s13_s12 = sadd.s32 1, %s4866_s12  }
 0x218   : > { %p10_p4 = scmp.ge.s32.totalorder %s13_s12, 4  }
 0x21a   :  { %12 = sbr.rel (!%p10_p4) target bundleno = 1 (0x1), region = 70 }

// kernel: vit_forward.7
= control target key start
LH: loop header
LB: loop body
LE: loop exit
PB: predicated region body
PF: predicated region fallthrough
CT: control target
= control target key end

     0   :  { %s4458_s12 = smov 0   ;;  %s5690_s0 = inlined_call_operand.vmem [shape: f32[2,18,18,3], index: 0, kind: input, shape index: {}]   ;;  %s5691_s1 = inlined_call_operand.vmem [shape: f32[9,3,64], index: 1, kind: input, shape index: {}]   ;;  %s5692_s2 = inlined_call_operand.vmem [shape: f32[1,64], index: 2, kind: input, shape index: {}]   ;;  %s5693_s3 = inlined_call_operand.vmem [shape: f32[2,256,64], index: 3, kind: output, shape index: {}]  }
   0x1 LB: > { %s3099_s13 = sadd.s32 4294967295, %s4436_s12   ;;  %p3103_p0 = scmp.ge.s32.totalorder %s4436_s12, 1  ;;  %s4436_s12 = sphi %s4458_s12, %s13_s12  }
   0x2   : > { %p137_p1 = scmp.lt.s32.totalorder %s4436_s12, 3 }
   0x4   : > { %p138_p2 = pnand %p3103_p0, %p137_p1 }
   0x6   : > { %141 = sbr.rel (%p138_p2) target bundleno = 527 (0x20f), region = 32 }
   0xd   : > { %v3107_v0 = vld [vmem:[%s5691_s1 + $0x4] sm:$0x7]  ;;  %vm422_vm0 = vcmask 1042432   ;;  %v4472_v1 = vld [vmem:[%s5691_s1 + $0x10] sm:$0x7]  ;;  %p161_p3 = scmp.lt.s32.totalorder %s3099_s13, 1 }
   0xe   : > { %3713 = vmatprep.subr.msk.mxu1 %vm422_vm0, %v3107_v0  ;;  %3913 = vmatprep.subr.msk.mxu0 %vm422_vm0, %v4472_v1  ;;  %v225_v2 = vld [vmem:[%s5691_s1] sm:$0x7]  ;;  %v3276_v3 = vld [vmem:[%s5691_s1 + $0x14] sm:$0x7]  ;;  %vm274_vm1 = vcmask 1046528   ;;  %vm357_vm2 = vcmask 23552  }
   0xf   : > { %3714 = vmatpush3.msk.msra.mxu1 %vm422_vm0, %v3107_v0  ;;  %3914 = vmatpush3.msk.msra.mxu0 %vm422_vm0, %v4472_v1  ;;  %s5869_s13 = smov (!%p161_p3, %s3099_s13), 1  ;;  %v4559_v33 = vld [vmem:[%s5691_s1 + $0x18] sm:$0x7]  ;;  %v4569_v35 = vld [vmem:[%s5691_s1 + $0x8] sm:$0x7]  ;;  %vm943_vm3 = vcmask 1045504  }
  0x10   : > { %3763 = vmatprep.subr.msk.mxu1 %vm422_vm0, %v225_v2  ;;  %3963 = vmatprep.subr.msk.mxu0 %vm422_vm0, %v3276_v3  ;;  %s4421_s22 = smul.u32 432, %s5869_s13  ;;  %s3415_s9 = sshll.u32 %s5869_s13, 8  ;;  %vm3011_vm4 = vcmask 523264  }
  0x11   : > { %s5588_s16 = scalar_lea.vmem %s5693_s3, %s3415_s9 }
  0x12   : > { %s4494_s25 = scalar_lea.vmem %s5690_s0, %s4421_s22 }
  0x13   : > { %v4497_v4 = vld [vmem:[%s4494_s25] sm:$0xff]  ;;  %v4500_v5 = vld [vmem:[%s4494_s25 + $0x8] sm:$0xff]  ;;  %v4503_v6 = vld [vmem:[%s4494_s25 + $0x18] sm:$0xff] }
  0x14   : > { %5767 = vst [vmem:[#allocation2_spill] sm:$0xff] %v4503_v6  ;;  %v275_v7 = vrot.slane %v4497_v4, 1  ;;  %v276_v8 = vrot.slane %v4500_v5, 1  ;;  %v4508_v9 = vld [vmem:[%s4494_s25 + $0x20] sm:$0xff]  ;;  %v280_v10 = vrot.slane %v4503_v6, 1  ;;  %v4520_v15 = vld [vmem:[%s4494_s25 + $0x30] sm:$0xff] }
  0x15   : > { %5768 = vst [vmem:[#allocation3_spill] sm:$0xff] %v4508_v9  ;;  %v4512_v11 = vld [vmem:[%s4494_s25 + $0x10] sm:$0x3]  ;;  %v281_v12 = vrot.slane %v4508_v9, 1  ;;  %v4517_v14 = vld [vmem:[%s4494_s25 + $0x28] sm:$0x3] }
  0x16   : > { %v278_v13 = vrot.slane %v4512_v11, 1  ;;  %v277_v16 = vsel %vm274_vm1, %v275_v7, %v276_v8  ;;  %v283_v17 = vrot.slane %v4517_v14, 1  ;;  %v4525_v18 = vld [vmem:[%s4494_s25 + $0x38] sm:$0xff]  ;;  %v285_v19 = vrot.slane %v4520_v15, 1  ;;  %v4529_v20 = vld [vmem:[%s4494_s25 + $0x40] sm:$0x3] }
  0x17   : > { %3715 = vmatprep.mubr.msk.f32.mxu1 %vm357_vm2, %v277_v16  ;;  %v282_v21 = vsel %vm274_vm1, %v280_v10, %v281_v12  ;;  %v286_v23 = vrot.slane %v4525_v18, 1  ;;  %v288_v24 = vrot.slane %v4529_v20, 1  ;;  %v4537_v25 = vld [vmem:[%s4494_s25 + $0x48] sm:$0xff]  ;;  %v4540_v26 = vld [vmem:[%s4494_s25 + $0x50] sm:$0xff]  ;;  %v4543_v27 = vld [vmem:[%s4494_s25 + $0x58] sm:$0x3] }
  0x18   : > { %v279_v22 = vsel %vm274_vm1, %v276_v8, %v278_v13  ;;  %3915 = vmatprep.mubr.msk.f32.mxu0 %vm357_vm2, %v282_v21  ;;  %v284_v28 = vsel %vm274_vm1, %v281_v12, %v283_v17  ;;  %v290_v29 = vrot.slane %v4537_v25, 1  ;;  %v291_v30 = vrot.slane %v4540_v26, 1  ;;  %v4551_v31 = vld [vmem:[%s4494_s25 + $0x60] sm:$0xff]  ;;  %v4554_v32 = vld [vmem:[%s4494_s25 + $0x68] sm:$0xff]  ;;  %v4585_v41 = vld [vmem:[%s4494_s25 + $0x70] sm:$0x3] }
  0x19   : > { %3716 = vmatmul.mubr.msk.f32.vlgmr.msra.gmra.mrb[0].mxu1 %vm357_vm2, %v279_v22  ;;  %3916 = vmatmul.mubr.msk.f32.vlgmr.msra.gmra.mrb[0].mxu0 %vm357_vm2, %v284_v28  ;;  %v4564_v34 = vsel %vm274_vm1, %v285_v19, %v286_v23  ;;  %v4574_v36 = vsel %vm274_vm1, %v286_v23, %v288_v24  ;;  %v293_v37 = vrot.slane %v4543_v27, 1  ;;  %v295_v39 = vrot.slane %v4551_v31, 1  ;;  %v4591_v42 = vld [vmem:[%s4494_s25 + $0x78] sm:$0xff]  ;;  %v4594_v43 = vld [vmem:[%s4494_s25 + $0x80] sm:$0xff]  ;;  %v4614_v49 = vld [vmem:[%s4494_s25 + $0x88] sm:$0x3] }
  0x1a   : > { %3764 = vmatpush3.msk.msra.mxu1 %vm422_vm0, %v225_v2  ;;  %5769 = vst [vmem:[#allocation4_spill] sm:$0xff] %v4564_v34  ;;  %3964 = vmatpush3.msk.msra.mxu0 %vm422_vm0, %v3276_v3  ;;  %5770 = vst [vmem:[#allocation5_spill] sm:$0xff] %v4574_v36  ;;  %v4580_v38 = vsel %vm274_vm1, %v290_v29, %v291_v30  ;;  %v296_v40 = vrot.slane %v4554_v32, 1  ;;  %v298_v45 = vrot.slane %v4585_v41, 1  ;;  %v300_v47 = vrot.slane %v4591_v42, 1  ;;  %v4619_v50 = vld [vmem:[%s4494_s25 + $0x90] sm:$0xff] }
  0x1b   : > { %3718 = vmatprep.mubr.msk.f32.mxu1 %vm357_vm2, %v282_v21  ;;  %3918 = vmatprep.mubr.msk.f32.mxu0 %vm357_vm2, %v4564_v34  ;;  %5771 = vst [vmem:[#allocation6_spill] sm:$0xff] %v4580_v38  ;;  %v4605_v44 = vsel %vm274_vm1, %v291_v30, %v293_v37  ;;  %v301_v48 = vrot.slane %v4594_v43, 1  ;;  %v4622_v51 = vld [vmem:[%s4494_s25 + $0x98] sm:$0xff]  ;;  %v303_v53 = vrot.slane %v4614_v49, 1  ;;  %v305_v55 = vrot.slane %v4619_v50, 1  ;;  %v4645_v58 = vld [vmem:[%s4494_s25 + $0xa8] sm:$0xff] }
  0x1c   : > { %4013 = vmatprep.subr.msk.mxu0 %vm422_vm0, %v4559_v33  ;;  %3813 = vmatprep.subr.msk.mxu1 %vm422_vm0, %v4569_v35  ;;  %5772 = vst [vmem:[#allocation7_spill] sm:$0xff] %v4605_v44  ;;  %v4609_v46 = vsel %vm274_vm1, %v295_v39, %v296_v40  ;;  %v4631_v52 = vsel %vm274_vm1, %v296_v40, %v298_v45  ;;  %v306_v56 = vrot.slane %v4622_v51, 1  ;;  %v4640_v57 = vld [vmem:[%s4494_s25 + $0xa0] sm:$0x3]  ;;  %v4648_v59 = vld [vmem:[%s4494_s25 + $0xb0] sm:$0xff]  ;;  %v310_v63 = vrot.slane %v4645_v58, 1 }
  0x1d   : > { %3719 = vmatmul.mubr.msk.f32.gmra.mrb[2].mxu1 %vm357_vm2, %v284_v28  ;;  %3919 = vmatmul.mubr.msk.f32.gmra.mrb[2].mxu0 %vm357_vm2, %v4574_v36  ;;  %5773 = vst [vmem:[#allocation8_spill] sm:$0xff] %v4609_v46  ;;  %5774 = vst [vmem:[#allocation9_spill] sm:$0xff] %v4631_v52  ;;  %v4635_v54 = vsel %vm274_vm1, %v300_v47, %v301_v48  ;;  %v4657_v60 = vsel %vm274_vm1, %v301_v48, %v303_v53  ;;  %v308_v61 = vrot.slane %v4640_v57, 1  ;;  %v4666_v2 = vld [vmem:[%s4494_s25 + $0xb8] sm:$0x3]  ;;  %v4671_v3 = vld [vmem:[%s4494_s25 + $0xc0] sm:$0xff] }
  0x1e   : > { %3721 = vmatprep.mubr.msk.f32.mxu1 %vm357_vm2, %v4564_v34  ;;  %3921 = vmatprep.mubr.msk.f32.mxu0 %vm357_vm2, %v4580_v38  ;;  %5775 = vst [vmem:[#allocation10_spill] sm:$0xff] %v4635_v54  ;;  %5776 = vst [vmem:[#allocation11_spill] sm:$0xff] %v4657_v60  ;;  %v4661_v62 = vsel %vm274_vm1, %v305_v55, %v306_v56  ;;  %v311_v0 = vrot.slane %v4648_v59, 1  ;;  %v4674_v7 = vld [vmem:[%s4494_s25 + $0xc8] sm:$0xff]  ;;  %v313_v10 = vrot.slane %v4666_v2, 1  ;;  %v315_v13 = vrot.slane %v4671_v3, 1 }
  0x1f   : > { %5777 = vst [vmem:[#allocation12_spill] sm:$0xff] %v4661_v62  ;;  %v4683_v8 = vsel %vm274_vm1, %v306_v56, %v308_v61  ;;  %v316_v16 = vrot.slane %v4674_v7, 1  ;;  %v4692_v17 = vld [vmem:[%s4494_s25 + $0xd0] sm:$0x3]  ;;  %v949_v23 = vrot.slane %v4503_v6, 2  ;;  %v950_v24 = vrot.slane %v4508_v9, 2 }
  0x20   : > { %5778 = vst [vmem:[#allocation13_spill] sm:$0xff] %v4683_v8  ;;  %v4687_v12 = vsel %vm274_vm1, %v310_v63, %v311_v0  ;;  %v4703_v19 = vsel %vm274_vm1, %v311_v0, %v313_v10  ;;  %v318_v21 = vrot.slane %v4692_v17, 1  ;;  %v4712_v28 = vld [vmem:[%s4494_s25 + $0xd8] sm:$0xff]  ;;  %v4715_v29 = vld [vmem:[%s4494_s25 + $0xe0] sm:$0xff]  ;;  %v952_v30 = vrot.slane %v4517_v14, 2  ;;  %v4740_v53 = vld [vmem:[%s4494_s25 + $0xf0] sm:$0xff] }
  0x21   : > { %3722 = vmatmul.mubr.msk.f32.gmra.mrb[4].mxu1 %vm357_vm2, %v4574_v36  ;;  %3922 = vmatmul.mubr.msk.f32.gmra.mrb[4].mxu0 %vm357_vm2, %v4605_v44  ;;  %5779 = vst [vmem:[#allocation14_spill] sm:$0xff] %v4687_v12  ;;  %5780 = vst [vmem:[#allocation15_spill] sm:$0xff] %v4703_v19  ;;  %v4707_v22 = vsel %vm274_vm1, %v315_v13, %v316_v16  ;;  %v320_v39 = vrot.slane %v4712_v28, 1  ;;  %v321_v40 = vrot.slane %v4715_v29, 1  ;;  %v4732_v45 = vld [vmem:[%s4494_s25 + $0xe8] sm:$0x3] }
  0x22   : > { %3724 = vmatprep.mubr.msk.f32.mxu1 %vm357_vm2, %v4580_v38  ;;  %3924 = vmatprep.mubr.msk.f32.mxu0 %vm357_vm2, %v4609_v46  ;;  %5781 = vst [vmem:[#allocation16_spill] sm:$0xff] %v4707_v22  ;;  %v4727_v37 = vsel %vm274_vm1, %v316_v16, %v318_v21  ;;  %v4735_v47 = vsel %vm943_vm3, %v949_v23, %v950_v24  ;;  %v954_v48 = vrot.slane %v4520_v15, 2  ;;  %v955_v14 = vrot.slane %v4525_v18, 2  ;;  %v4743_v55 = vld [vmem:[%s4494_s25 + $0xf8] sm:$0xff]  ;;  %v4764_v16 = vld [vmem:[%s4494_s25 + $0x100] sm:$0x3] }
  0x23   : > { %5782 = vst [vmem:[#allocation17_spill] sm:$0xff] %v4727_v37  ;;  %v323_v56 = vrot.slane %v4732_v45, 1  ;;  %v957_v61 = vrot.slane %v4529_v20, 2  ;;  %v4756_v63 = vsel %vm943_vm3, %v950_v24, %v952_v30  ;;  %v4759_v0 = vsel %vm274_vm1, %v320_v39, %v321_v40  ;;  %v4775_v24 = vld [vmem:[%s4494_s25 + $0x110] sm:$0xff]  ;;  %v4782_v30 = vld [vmem:[%s5691_s1 + $0x1c] sm:$0x7] }
  0x24   : > { %5783 = vst [vmem:[#allocation18_spill] sm:$0xff] %v4759_v0  ;;  %v325_v10 = vrot.slane %v4740_v53, 1  ;;  %v326_v13 = vrot.slane %v4743_v55, 1  ;;  %v4767_v21 = vsel %vm943_vm3, %v954_v48, %v955_v14  ;;  %v959_v20 = vrot.slane %v4537_v25, 2  ;;  %v4878_v36 = vld [vmem:[%s4494_s25 + $0x148] sm:$0x3] }
  0x25   : > { %3725 = vmatmul.mubr.msk.f32.gmra.mrb[6].mxu1 %vm357_vm2, %v4605_v44  ;;  %3925 = vmatmul.mubr.msk.f32.gmra.mrb[6].mxu0 %vm357_vm2, %v4631_v52  ;;  %v960_v23 = vrot.slane %v4540_v26, 2  ;;  %v4789_v39 = vsel %vm274_vm1, %v321_v40, %v323_v56  ;;  %v4792_v48 = vsel %vm943_vm3, %v955_v14, %v957_v61  ;;  %v331_v40 = vrot.slane %v4775_v24, 1  ;;  %v4806_v56 = vld [vmem:[%s4494_s25 + $0x118] sm:$0x3] }
  0x26   : > { %3727 = vmatprep.mubr.msk.f32.mxu1 %vm357_vm2, %v4609_v46  ;;  %3927 = vmatprep.mubr.msk.f32.mxu0 %vm357_vm2, %v4635_v54  ;;  %5784 = vst [vmem:[#allocation19_spill] sm:$0xff] %v4789_v39  ;;  %5785 = vst [vmem:[#allocation20_spill] sm:$0xff] %v4792_v48  ;;  %v964_v61 = vrot.slane %v4551_v31, 2  ;;  %v4851_v46 = vld [vmem:[%s4494_s25 + $0x138] sm:$0xff]  ;;  %v972_v44 = vrot.slane %v4614_v49, 2  ;;  %v977_v34 = vrot.slane %v4640_v57, 2 }
  0x27   : > { %v4809_v14 = vsel %vm943_vm3, %v959_v20, %v960_v23  ;;  %v333_v20 = vrot.slane %v4806_v56, 1  ;;  %v340_v38 = vrot.slane %v4851_v46, 1  ;;  %v979_v57 = vrot.slane %v4645_v58, 2 }
  0x28   : > { %5787 = vst [vmem:[#allocation22_spill] sm:$0xff] %v4809_v14 }
  0x29   : > { %3728 = vmatmul.mubr.msk.f32.gmra.mrb[8].mxu1 %vm357_vm2, %v4631_v52  ;;  %3928 = vmatmul.mubr.msk.f32.gmra.mrb[8].mxu0 %vm357_vm2, %v4657_v60  ;;  %v4843_v52 = vld [vmem:[%s4494_s25 + $0x130] sm:$0x3] }
  0x2a   : > { %3730 = vmatprep.mubr.msk.f32.mxu1 %vm357_vm2, %v4635_v54  ;;  %3930 = vmatprep.mubr.msk.f32.mxu0 %vm357_vm2, %v4661_v62 }
  0x2d   : > { %3731 = vmatmul.mubr.msk.f32.gmra.mrb[10].mxu1 %vm357_vm2, %v4657_v60  ;;  %3931 = vmatmul.mubr.msk.f32.gmra.mrb[10].mxu0 %vm357_vm2, %v4683_v8 }
  0x2e   : > { %3733 = vmatprep.mubr.msk.f32.mxu1 %vm357_vm2, %v4661_v62  ;;  %3933 = vmatprep.mubr.msk.f32.mxu0 %vm357_vm2, %v4687_v12  ;;  %v967_v62 = vrot.slane %v4585_v41, 2  ;;  %v969_v41 = vrot.slane %v4591_v42, 2 }
  0x31   : > { %3734 = vmatmul.mubr.msk.f32.gmra.mrb[12].mxu1 %vm357_vm2, %v4683_v8  ;;  %3934 = vmatmul.mubr.msk.f32.gmra.mrb[12].mxu0 %vm357_vm2, %v4703_v19  ;;  %v4814_v8 = vld [vmem:[%s4494_s25 + $0x120] sm:$0xff] }
  0x32   : > { %3736 = vmatprep.mubr.msk.f32.mxu1 %vm357_vm2, %v4687_v12  ;;  %3936 = vmatprep.mubr.msk.f32.mxu0 %vm357_vm2, %v4707_v22  ;;  %v962_v12 = vrot.slane %v4543_v27, 2  ;;  %v335_v54 = vrot.slane %v4814_v8, 1 }
  0x34   : > { %v4835_v60 = vsel %vm943_vm3, %v960_v23, %v962_v12  ;;  %v4854_v12 = vld [vmem:[%s4494_s25 + $0x140] sm:$0xff] }
  0x35   : > { %3737 = vmatmul.mubr.msk.f32.gmra.mrb[14].mxu1 %vm357_vm2, %v4703_v19  ;;  %3937 = vmatmul.mubr.msk.f32.gmra.mrb[14].mxu0 %vm357_vm2, %v4727_v37  ;;  %v4800_v19 = vsel %vm274_vm1, %v325_v10, %v326_v13  ;;  %v4817_v10 = vld [vmem:[%s4494_s25 + $0x128] sm:$0xff]  ;;  %5789 = vst [vmem:[#allocation24_spill] sm:$0xff] %v4835_v60 }
  0x36   : > { %3739 = vmatprep.mubr.msk.f32.mxu1 %vm357_vm2, %v4707_v22  ;;  %3965 = vmatprep.mubr.msk.f32.mxu0 %vm357_vm2, %v4735_v47  ;;  %v4772_v22 = vld [vmem:[%s4494_s25 + $0x108] sm:$0xff]  ;;  %5786 = vst [vmem:[#allocation21_spill] sm:$0xff] %v4800_v19 }
  0x39   : > { %3740 = vmatmul.mubr.msk.f32.gmra.mrb[16].mxu1 %vm357_vm2, %v4727_v37  ;;  %3966 = vmatmul.mubr.msk.f32.vlgmr.msra.gmra.mrb[0].mxu0 %vm357_vm2, %v4756_v63  ;;  %v328_v37 = vrot.slane %v4764_v16, 1 }
  0x3a   : > { %3742 = vmatprep.mubr.msk.f32.mxu1 %vm357_vm2, %v4759_v0  ;;  %4014 = vmatpush3.msk.msra.mxu0 %vm422_vm0, %v4559_v33  ;;  %v330_v0 = vrot.slane %v4772_v22, 1  ;;  %v965_v33 = vrot.slane %v4554_v32, 2 }
  0x3b   : > { %3968 = vmatprep.mubr.msk.f32.mxu0 %vm357_vm2, %v4767_v21  ;;  %4063 = vmatprep.subr.msk.mxu0 %vm422_vm0, %v4782_v30  ;;  %v4828_v27 = vsel %vm274_vm1, %v326_v13, %v328_v37  ;;  %v970_v13 = vrot.slane %v4594_v43, 2 }
  0x3c   : > { %5788 = vst [vmem:[#allocation23_spill] sm:$0xff] %v4828_v27  ;;  %v4846_v37 = vsel %vm943_vm3, %v964_v61, %v965_v33  ;;  %v4866_v23 = vsel %vm943_vm3, %v965_v33, %v967_v62  ;;  %v338_v61 = vrot.slane %v4843_v52, 1  ;;  %v974_v62 = vrot.slane %v4619_v50, 2 }
  0x3d   : > { %3743 = vmatmul.mubr.msk.f32.gmra.mrb[18].mxu1 %vm357_vm2, %v4789_v39  ;;  %3969 = vmatmul.mubr.msk.f32.gmra.mrb[2].mxu0 %vm357_vm2, %v4792_v48  ;;  %v4838_v39 = vsel %vm274_vm1, %v330_v0, %v331_v40  ;;  %5791 = vst [vmem:[#allocation26_spill] sm:$0xff] %v4846_v37  ;;  %v4863_v0 = vsel %vm274_vm1, %v331_v40, %v333_v20  ;;  %5793 = vst [vmem:[#allocation28_spill] sm:$0xff] %v4866_v23  ;;  %v975_v33 = vrot.slane %v4622_v51, 2  ;;  %v4886_v20 = vld [vmem:[%s4494_s25 + $0x150] sm:$0xff]  ;;  %v4948_v48 = vld [vmem:[%s4494_s25 + $0x178] sm:$0x3] }
  0x3e   : > { %3745 = vmatprep.mubr.msk.f32.mxu1 %vm357_vm2, %v4800_v19  ;;  %3971 = vmatprep.mubr.msk.f32.mxu0 %vm357_vm2, %v4809_v14  ;;  %5790 = vst [vmem:[#allocation25_spill] sm:$0xff] %v4838_v39  ;;  %v336_v19 = vrot.slane %v4817_v10, 1  ;;  %5792 = vst [vmem:[#allocation27_spill] sm:$0xff] %v4863_v0  ;;  %v4881_v40 = vsel %vm943_vm3, %v969_v41, %v970_v13  ;;  %v343_v41 = vrot.slane %v4878_v36, 1 }
  0x3f   : > { %5795 = vst [vmem:[#allocation30_spill] sm:$0xff] %v4881_v40 }
  0x40   : > { %v4898_v49 = vsel %vm274_vm1, %v336_v19, %v338_v61  ;;  %v980_v61 = vrot.slane %v4648_v59, 2 }
  0x41   : > { %3746 = vmatmul.mubr.msk.f32.gmra.mrb[20].mxu1 %vm357_vm2, %v4828_v27  ;;  %3972 = vmatmul.mubr.msk.f32.gmra.mrb[4].mxu0 %vm357_vm2, %v4835_v60  ;;  %v4872_v27 = vsel %vm274_vm1, %v335_v54, %v336_v19  ;;  %v4889_v54 = vld [vmem:[%s4494_s25 + $0x158] sm:$0xff]  ;;  %5796 = vst [vmem:[#allocation31_spill] sm:$0xff] %v4898_v49  ;;  %v4913_v60 = vld [vmem:[%s4494_s25 + $0x160] sm:$0x3]  ;;  %v4916_v19 = vsel %vm943_vm3, %v974_v62, %v975_v33 }
  0x42   : > { %3748 = vmatprep.mubr.msk.f32.mxu1 %vm357_vm2, %v4838_v39  ;;  %3974 = vmatprep.mubr.msk.f32.mxu0 %vm357_vm2, %v4846_v37  ;;  %5794 = vst [vmem:[#allocation29_spill] sm:$0xff] %v4872_v27  ;;  %v341_v39 = vrot.slane %v4854_v12, 1  ;;  %v4905_v37 = vsel %vm943_vm3, %v970_v13, %v972_v44  ;;  %v4924_v44 = vld [vmem:[%s4494_s25 + $0x170] sm:$0xff]  ;;  %v4936_v13 = vsel %vm943_vm3, %v975_v33, %v977_v34  ;;  %v348_v62 = vrot.slane %v4913_v60, 1 }
  0x43   : > { %5797 = vst [vmem:[#allocation32_spill] sm:$0xff] %v4905_v37  ;;  %5799 = vst [vmem:[#allocation34_spill] sm:$0xff] %v4924_v44  ;;  %v984_v34 = vrot.slane %v4671_v3, 2  ;;  %v985_v33 = vrot.slane %v4674_v7, 2 }
  0x44   : > { %5801 = vst [vmem:[#allocation36_spill] sm:$0xff] %v4936_v13 }
  0x45   : > { %3749 = vmatmul.mubr.msk.f32.gmra.mrb[22].mxu1 %vm357_vm2, %v4863_v0  ;;  %3975 = vmatmul.mubr.msk.f32.gmra.mrb[6].mxu0 %vm357_vm2, %v4866_v23  ;;  %v4908_v0 = vsel %vm274_vm1, %v340_v38, %v341_v39  ;;  %v345_v23 = vrot.slane %v4886_v20, 1  ;;  %v4933_v38 = vsel %vm274_vm1, %v341_v39, %v343_v41  ;;  %v4951_v39 = vsel %vm943_vm3, %v979_v57, %v980_v61 }
  0x46   : > { %3751 = vmatprep.mubr.msk.f32.mxu1 %vm357_vm2, %v4872_v27  ;;  %3977 = vmatprep.mubr.msk.f32.mxu0 %vm357_vm2, %v4881_v40  ;;  %5798 = vst [vmem:[#allocation33_spill] sm:$0xff] %v4908_v0  ;;  %v346_v27 = vrot.slane %v4889_v54, 1  ;;  %v4921_v40 = vld [vmem:[%s4494_s25 + $0x168] sm:$0xff]  ;;  %5800 = vst [vmem:[#allocation35_spill] sm:$0xff] %v4933_v38 }
  0x48   : > { %v4942_v14 = vsel %vm274_vm1, %v345_v23, %v346_v27  ;;  %v353_v23 = vrot.slane %v4948_v48, 1 }
  0x49   : > { %3752 = vmatmul.mubr.msk.f32.gmra.mrb[24].mxu1 %vm357_vm2, %v4898_v49  ;;  %3978 = vmatmul.mubr.msk.f32.gmra.mrb[8].mxu0 %vm357_vm2, %v4905_v37  ;;  %5802 = vst [vmem:[#allocation37_spill] sm:$0xff] %v4942_v14  ;;  %v982_v49 = vrot.slane %v4666_v2, 2  ;;  %v350_v37 = vrot.slane %v4921_v40, 1  ;;  %v4962_v2 = vsel %vm274_vm1, %v346_v27, %v348_v62  ;;  %v990_v27 = vrot.slane %v4715_v29, 2 }
  0x4a   : > { %3754 = vmatprep.mubr.msk.f32.mxu1 %vm357_vm2, %v4908_v0  ;;  %3980 = vmatprep.mubr.msk.f32.mxu0 %vm357_vm2, %v4916_v19  ;;  %v351_v0 = vrot.slane %v4924_v44, 1  ;;  %5803 = vst [vmem:[#allocation38_spill] sm:$0xff] %v4962_v2  ;;  %v994_v62 = vrot.slane %v4740_v53, 2 }
  0x4b   : > { %v4968_v41 = vsel %vm943_vm3, %v980_v61, %v982_v49  ;;  %v992_v49 = vrot.slane %v4732_v45, 2 }
  0x4c   : > { %v4971_v57 = vsel %vm274_vm1, %v350_v37, %v351_v0  ;;  %v4986_v37 = vsel %vm274_vm1, %v351_v0, %v353_v23  ;;  %v5021_v23 = vld [vmem:[%s5691_s1 + $0xc] sm:$0x7] }
  0x4d   : > { %3755 = vmatmul.mubr.msk.f32.gmra.mrb[26].mxu1 %vm357_vm2, %v4933_v38  ;;  %3981 = vmatmul.mubr.msk.f32.gmra.mrb[10].mxu0 %vm357_vm2, %v4936_v13  ;;  %5804 = vst [vmem:[#allocation39_spill] sm:$0xff] %v4971_v57  ;;  %v987_v38 = vrot.slane %v4692_v17, 2  ;;  %v4975_v13 = vsel %vm943_vm3, %v984_v34, %v985_v33  ;;  %5805 = vst [vmem:[#allocation40_spill] sm:$0xff] %v4986_v37  ;;  %v995_v34 = vrot.slane %v4743_v55, 2 }
  0x4e   : > { %3757 = vmatprep.mubr.msk.f32.mxu1 %vm357_vm2, %v4942_v14  ;;  %3983 = vmatprep.mubr.msk.f32.mxu0 %vm357_vm2, %v4951_v39  ;;  %v989_v14 = vrot.slane %v4712_v28, 2  ;;  %v5008_v45 = vsel %vm943_vm3, %v990_v27, %v992_v49 }
  0x4f   : > { %v4991_v17 = vsel %vm943_vm3, %v985_v33, %v987_v38  ;;  %v5012_v0 = vsel %vm943_vm3, %v994_v62, %v995_v34  ;;  %v999_v38 = vrot.slane %v4772_v22, 2  ;;  %v1000_v33 = vrot.slane %v4775_v24, 2 }
  0x50   : > { %v4995_v61 = vsel %vm943_vm3, %v989_v14, %v990_v27  ;;  %v997_v14 = vrot.slane %v4764_v16, 2  ;;  %v1002_v27 = vrot.slane %v4806_v56, 2  ;;  %v1004_v62 = vrot.slane %v4814_v8, 2 }
  0x51   : > { %3758 = vmatmul.mubr.msk.f32.gmra.mrb[28].mxu1 %vm357_vm2, %v4962_v2  ;;  %3984 = vmatmul.mubr.msk.f32.gmra.mrb[12].mxu0 %vm357_vm2, %v4968_v41  ;;  %v5036_v49 = vsel %vm943_vm3, %v999_v38, %v1000_v33  ;;  %v1009_v38 = vrot.slane %v4851_v46, 2  ;;  %v1020_v2 = vrot.slane %v4924_v44, 2 }
  0x52   : > { %3760 = vmatprep.mubr.msk.f32.mxu1 %vm357_vm2, %v4971_v57  ;;  %3986 = vmatprep.mubr.msk.f32.mxu0 %vm357_vm2, %v4975_v13  ;;  %v5032_v16 = vsel %vm943_vm3, %v995_v34, %v997_v14  ;;  %5806 = vst [vmem:[#allocation41_spill] sm:$0xff] %v5036_v49  ;;  %v5051_v56 = vsel %vm943_vm3, %v1000_v33, %v1002_v27  ;;  %v1007_v34 = vrot.slane %v4843_v52, 2  ;;  %v1012_v33 = vrot.slane %v4878_v36, 2 }
  0x53   : > { %v1015_v57 = vrot.slane %v4889_v54, 2 }
  0x55   : > { %3761 = vmatmul.mubr.msk.f32.gmra.mrb[30].mxu1 %vm357_vm2, %v4986_v37  ;;  %3987 = vmatmul.mubr.msk.f32.gmra.mrb[14].mxu0 %vm357_vm2, %v4991_v17  ;;  %v1010_v37 = vrot.slane %v4854_v12, 2 }
  0x56   : > { %3765 = vmatprep.mubr.msk.f32.mxu1 %vm357_vm2, %v4497_v4  ;;  %3989 = vmatprep.mubr.msk.f32.mxu0 %vm357_vm2, %v4995_v61 }
  0x57   : > { %v5072_v27 = vsel %vm943_vm3, %v1009_v38, %v1010_v37  ;;  %v5085_v36 = vsel %vm943_vm3, %v1010_v37, %v1012_v33  ;;  %v1019_v38 = vrot.slane %v4921_v40, 2  ;;  %v1022_v37 = vrot.slane %v4948_v48, 2 }
  0x58   : > { %5808 = vst [vmem:[#allocation43_spill] sm:$0xff] %v5072_v27  ;;  %5809 = vst [vmem:[#allocation44_spill] sm:$0xff] %v5085_v36 }
  0x59   : > { %3766 = vmatmul.mubr.msk.f32.vlgmr.msra.gmra.mrb[0].mxu1 %vm357_vm2, %v4500_v5  ;;  %3990 = vmatmul.mubr.msk.f32.gmra.mrb[16].mxu0 %vm357_vm2, %v5008_v45  ;;  %v5112_v33 = vsel %vm943_vm3, %v1019_v38, %v1020_v2  ;;  %v5128_v48 = vsel %vm943_vm3, %v1020_v2, %v1022_v37  ;;  %v945_v38 = vrot.slane %v4500_v5, 2  ;;  %v947_v37 = vrot.slane %v4512_v11, 2  ;;  %v5816_v5 = vld [vmem:[#allocation20_spill] sm:$0xff]  ;;  %v5817_v11 = vld [vmem:[#allocation22_spill] sm:$0xff] }
  0x5a   : > { %3814 = vmatpush3.msk.msra.mxu1 %vm422_vm0, %v4569_v35  ;;  %3768 = vmatprep.mubr.msk.f32.mxu1 %vm357_vm2, %v4503_v6  ;;  %v1005_v35 = vrot.slane %v4817_v10, 2  ;;  %v5099_v6 = vld [vmem:[%s4494_s25 + $0x188] sm:$0xff]  ;;  %5812 = vst [vmem:[#allocation47_spill] sm:$0xff] %v5112_v33  ;;  %5813 = vst [vmem:[#allocation48_spill] sm:$0xff] %v5128_v48 }
  0x5b   : > { %3992 = vmatprep.mubr.msk.f32.mxu0 %vm357_vm2, %v5012_v0  ;;  %3863 = vmatprep.subr.msk.mxu1 %vm422_vm0, %v5021_v23 }
  0x5c   : > { %v5055_v14 = vsel %vm943_vm3, %v1004_v62, %v1005_v35  ;;  %v5068_v52 = vsel %vm943_vm3, %v1005_v35, %v1007_v34  ;;  %v1014_v62 = vrot.slane %v4886_v20, 2  ;;  %v1017_v35 = vrot.slane %v4913_v60, 2 }
  0x5d   : > { %3769 = vmatmul.mubr.msk.f32.gmra.mrb[2].mxu1 %vm357_vm2, %v4508_v9  ;;  %3993 = vmatmul.mubr.msk.f32.gmra.mrb[18].mxu0 %vm357_vm2, %v5032_v16  ;;  %5807 = vst [vmem:[#allocation42_spill] sm:$0xff] %v5068_v52  ;;  %v5096_v9 = vld [vmem:[%s4494_s25 + $0x180] sm:$0xff] }
  0x5e   : > { %3771 = vmatprep.mubr.msk.f32.mxu1 %vm357_vm2, %v4520_v15  ;;  %3995 = vmatprep.mubr.msk.f32.mxu0 %vm357_vm2, %v5036_v49  ;;  %v5089_v34 = vsel %vm943_vm3, %v1014_v62, %v1015_v57  ;;  %v5108_v60 = vsel %vm943_vm3, %v1015_v57, %v1017_v35  ;;  %v1890_v62 = vrot.slane %v5096_v9, 2 }
  0x5f   : > { %5810 = vst [vmem:[#allocation45_spill] sm:$0xff] %v5089_v34  ;;  %5811 = vst [vmem:[#allocation46_spill] sm:$0xff] %v5108_v60 }
  0x61   : > { %3772 = vmatmul.mubr.msk.f32.gmra.mrb[4].mxu1 %vm357_vm2, %v4525_v18  ;;  %3996 = vmatmul.mubr.msk.f32.gmra.mrb[20].mxu0 %vm357_vm2, %v5051_v56 }
  0x62   : > { %3774 = vmatprep.mubr.msk.f32.mxu1 %vm357_vm2, %v4537_v25  ;;  %3998 = vmatprep.mubr.msk.f32.mxu0 %vm357_vm2, %v5055_v14 }
  0x65   : > { %3775 = vmatmul.mubr.msk.f32.gmra.mrb[6].mxu1 %vm357_vm2, %v4540_v26  ;;  %3999 = vmatmul.mubr.msk.f32.gmra.mrb[22].mxu0 %vm357_vm2, %v5068_v52  ;;  %v5117_v52 = vld [vmem:[%s4494_s25 + $0x190] sm:$0x3] }
  0x66   : > { %3777 = vmatprep.mubr.msk.f32.mxu1 %vm357_vm2, %v4551_v31  ;;  %4001 = vmatprep.mubr.msk.f32.mxu0 %vm357_vm2, %v5072_v27  ;;  %v1891_v27 = vrot.slane %v5099_v6, 2  ;;  %v1893_v57 = vrot.slane %v5117_v52, 2 }
  0x68   : > { %v5132_v35 = vsel %vm943_vm3, %v1890_v62, %v1891_v27  ;;  %v5143_v2 = vsel %vm943_vm3, %v1891_v27, %v1893_v57  ;;  %v5158_v27 = vld [vmem:[%s5691_s1 + $0x20] sm:$0x7] }
  0x69   : > { %3778 = vmatmul.mubr.msk.f32.gmra.mrb[8].mxu1 %vm357_vm2, %v4554_v32  ;;  %4002 = vmatmul.mubr.msk.f32.gmra.mrb[24].mxu0 %vm357_vm2, %v5085_v36  ;;  %5814 = vst [vmem:[#allocation49_spill] sm:$0xff] %v5132_v35  ;;  %5815 = vst [vmem:[#allocation50_spill] sm:$0xff] %v5143_v2  ;;  %v5821_v57 = vld [vmem:[#allocation30_spill] sm:$0xff] }
  0x6a   : > { %3780 = vmatprep.mubr.msk.f32.mxu1 %vm357_vm2, %v4591_v42  ;;  %4004 = vmatprep.mubr.msk.f32.mxu0 %vm357_vm2, %v5089_v34 }
  0x6d   : > { %3781 = vmatmul.mubr.msk.f32.gmra.mrb[10].mxu1 %vm357_vm2, %v4594_v43  ;;  %4005 = vmatmul.mubr.msk.f32.gmra.mrb[26].mxu0 %vm357_vm2, %v5108_v60 }
  0x6e   : > { %3783 = vmatprep.mubr.msk.f32.mxu1 %vm357_vm2, %v4619_v50  ;;  %4007 = vmatprep.mubr.msk.f32.mxu0 %vm357_vm2, %v5112_v33 }
  0x71   : > { %3784 = vmatmul.mubr.msk.f32.gmra.mrb[12].mxu1 %vm357_vm2, %v4622_v51  ;;  %4008 = vmatmul.mubr.msk.f32.gmra.mrb[28].mxu0 %vm357_vm2, %v5128_v48 }
  0x72   : > { %3786 = vmatprep.mubr.msk.f32.mxu1 %vm357_vm2, %v4645_v58  ;;  %4010 = vmatprep.mubr.msk.f32.mxu0 %vm357_vm2, %v5132_v35  ;;  %v5826_v35 = vld [vmem:[#allocation6_spill] sm:$0xff] }
  0x75   : > { %3787 = vmatmul.mubr.msk.f32.gmra.mrb[14].mxu1 %vm357_vm2, %v4648_v59  ;;  %4011 = vmatmul.mubr.msk.f32.gmra.mrb[30].mxu0 %vm357_vm2, %v5143_v2  ;;  %v5825_v2 = vld [vmem:[#allocation5_spill] sm:$0xff] }
  0x76   : > { %3789 = vmatprep.mubr.msk.f32.mxu1 %vm357_vm2, %v4671_v3  ;;  %4015 = vmatprep.mubr.msk.f32.mxu0 %vm357_vm2, %v4520_v15 }
  0x79   : > { %3790 = vmatmul.mubr.msk.f32.gmra.mrb[16].mxu1 %vm357_vm2, %v4674_v7  ;;  %4016 = vmatmul.mubr.msk.f32.vlgmr.msra.gmra.mrb[0].mxu0 %vm357_vm2, %v4525_v18 }
  0x7a   : > { %3792 = vmatprep.mubr.msk.f32.mxu1 %vm357_vm2, %v4712_v28  ;;  %4064 = vmatpush3.msk.msra.mxu0 %vm422_vm0, %v4782_v30  ;;  %v944_v30 = vrot.slane %v4497_v4, 2  ;;  %v948_v4 = vsel %vm943_vm3, %v945_v38, %v947_v37  ;;  %v5823_v37 = vld [vmem:[#allocation36_spill] sm:$0xff] }
  0x7b   : > { %4018 = vmatprep.mubr.msk.f32.mxu0 %vm357_vm2, %v4537_v25  ;;  %4113 = vmatprep.subr.msk.mxu0 %vm422_vm0, %v5158_v27 }
  0x7c   : > { %v946_v62 = vsel %vm943_vm3, %v944_v30, %v945_v38  ;;  %v5822_v30 = vld [vmem:[#allocation32_spill] sm:$0xff]  ;;  %v5282_v38 = vld [vmem:[%s4494_s25 + $0x198] sm:$0xff] }
  0x7d   : > { %3793 = vmatmul.mubr.msk.f32.gmra.mrb[18].mxu1 %vm357_vm2, %v4715_v29  ;;  %4019 = vmatmul.mubr.msk.f32.gmra.mrb[2].mxu0 %vm357_vm2, %v4540_v26 }
  0x7e   : > { %3795 = vmatprep.mubr.msk.f32.mxu1 %vm357_vm2, %v4740_v53  ;;  %4021 = vmatprep.mubr.msk.f32.mxu0 %vm357_vm2, %v4551_v31 }
  0x81   : > { %3796 = vmatmul.mubr.msk.f32.gmra.mrb[20].mxu1 %vm357_vm2, %v4743_v55  ;;  %4022 = vmatmul.mubr.msk.f32.gmra.mrb[4].mxu0 %vm357_vm2, %v4554_v32 }
  0x82   : > { %3798 = vmatprep.mubr.msk.f32.mxu1 %vm357_vm2, %v4772_v22  ;;  %4024 = vmatprep.mubr.msk.f32.mxu0 %vm357_vm2, %v4591_v42 }
  0x85   : > { %3799 = vmatmul.mubr.msk.f32.gmra.mrb[22].mxu1 %vm357_vm2, %v4775_v24  ;;  %4025 = vmatmul.mubr.msk.f32.gmra.mrb[6].mxu0 %vm357_vm2, %v4594_v43 }
  0x86   : > { %3801 = vmatprep.mubr.msk.f32.mxu1 %vm357_vm2, %v4814_v8  ;;  %4027 = vmatprep.mubr.msk.f32.mxu0 %vm357_vm2, %v4619_v50 }
  0x89   : > { %3802 = vmatmul.mubr.msk.f32.gmra.mrb[24].mxu1 %vm357_vm2, %v4817_v10  ;;  %4028 = vmatmul.mubr.msk.f32.gmra.mrb[8].mxu0 %vm357_vm2, %v4622_v51 }
  0x8a   : > { %3804 = vmatprep.mubr.msk.f32.mxu1 %vm357_vm2, %v4851_v46  ;;  %4030 = vmatprep.mubr.msk.f32.mxu0 %vm357_vm2, %v4645_v58 }
  0x8d   : > { %3805 = vmatmul.mubr.msk.f32.gmra.mrb[26].mxu1 %vm357_vm2, %v4854_v12  ;;  %4031 = vmatmul.mubr.msk.f32.gmra.mrb[10].mxu0 %vm357_vm2, %v4648_v59 }
  0x8e   : > { %3807 = vmatprep.mubr.msk.f32.mxu1 %vm357_vm2, %v4886_v20  ;;  %4033 = vmatprep.mubr.msk.f32.mxu0 %vm357_vm2, %v4671_v3 }
  0x91   : > { %3808 = vmatmul.mubr.msk.f32.gmra.mrb[28].mxu1 %vm357_vm2, %v4889_v54  ;;  %4034 = vmatmul.mubr.msk.f32.gmra.mrb[12].mxu0 %vm357_vm2, %v4674_v7 }
  0x92   : > { %3810 = vmatprep.mubr.msk.f32.mxu1 %vm357_vm2, %v4921_v40  ;;  %4036 = vmatprep.mubr.msk.f32.mxu0 %vm357_vm2, %v4712_v28 }
  0x95   : > { %3811 = vmatmul.mubr.msk.f32.gmra.mrb[30].mxu1 %vm357_vm2, %v4924_v44  ;;  %4037 = vmatmul.mubr.msk.f32.gmra.mrb[14].mxu0 %vm357_vm2, %v4715_v29 }
  0x96   : > { %3815 = vmatprep.mubr.msk.f32.mxu1 %vm357_vm2, %v946_v62  ;;  %4039 = vmatprep.mubr.msk.f32.mxu0 %vm357_vm2, %v4740_v53  ;;  %v5293_v62 = vld [vmem:[%s4494_s25 + $0x1a0] sm:$0xff] }
  0x99   : > { %3816 = vmatmul.mubr.msk.f32.vlgmr.msra.gmra.mrb[0].mxu1 %vm357_vm2, %v948_v4  ;;  %4040 = vmatmul.mubr.msk.f32.gmra.mrb[16].mxu0 %vm357_vm2, %v4743_v55  ;;  %v5824_v4 = vld [vmem:[#allocation4_spill] sm:$0xff] }
  0x9a   : > { %3864 = vmatpush3.msk.msra.mxu1 %vm422_vm0, %v5021_v23  ;;  %3818 = vmatprep.mubr.msk.f32.mxu1 %vm357_vm2, %v4735_v47  ;;  %v5818_v47 = vld [vmem:[#allocation24_spill] sm:$0xff] }
  0x9b   : > { %4042 = vmatprep.mubr.msk.f32.mxu0 %vm357_vm2, %v4772_v22  ;;  %4163 = vmatprep.subr.msk.mxu1 %vm422_vm0, %v4472_v1  ;;  %v5820_v23 = vld [vmem:[#allocation28_spill] sm:$0xff] }
  0x9d   : > { %3819 = vmatmul.mubr.msk.f32.gmra.mrb[2].mxu1 %vm357_vm2, %v4756_v63  ;;  %4043 = vmatmul.mubr.msk.f32.gmra.mrb[18].mxu0 %vm357_vm2, %v4775_v24  ;;  %v5819_v63 = vld [vmem:[#allocation26_spill] sm:$0xff] }
  0x9e   : > { %3821 = vmatprep.mubr.msk.f32.mxu1 %vm357_vm2, %v4767_v21  ;;  %4045 = vmatprep.mubr.msk.f32.mxu0 %vm357_vm2, %v4814_v8 }
  0xa1   : > { %3822 = vmatmul.mubr.msk.f32.gmra.mrb[4].mxu1 %vm357_vm2, %v5816_v5  ;;  %4046 = vmatmul.mubr.msk.f32.gmra.mrb[20].mxu0 %vm357_vm2, %v4817_v10 }
  0xa2   : > { %3824 = vmatprep.mubr.msk.f32.mxu1 %vm357_vm2, %v5817_v11  ;;  %4048 = vmatprep.mubr.msk.f32.mxu0 %vm357_vm2, %v4851_v46 }
  0xa5   : > { %3825 = vmatmul.mubr.msk.f32.gmra.mrb[6].mxu1 %vm357_vm2, %v5818_v47  ;;  %4049 = vmatmul.mubr.msk.f32.gmra.mrb[22].mxu0 %vm357_vm2, %v4854_v12 }
  0xa6   : > { %3827 = vmatprep.mubr.msk.f32.mxu1 %vm357_vm2, %v5819_v63  ;;  %4051 = vmatprep.mubr.msk.f32.mxu0 %vm357_vm2, %v4886_v20 }
  0xa9   : > { %3828 = vmatmul.mubr.msk.f32.gmra.mrb[8].mxu1 %vm357_vm2, %v5820_v23  ;;  %4052 = vmatmul.mubr.msk.f32.gmra.mrb[24].mxu0 %vm357_vm2, %v4889_v54 }
  0xaa   : > { %3830 = vmatprep.mubr.msk.f32.mxu1 %vm357_vm2, %v5821_v57  ;;  %4054 = vmatprep.mubr.msk.f32.mxu0 %vm357_vm2, %v4921_v40 }
  0xad   : > { %3831 = vmatmul.mubr.msk.f32.gmra.mrb[10].mxu1 %vm357_vm2, %v5822_v30  ;;  %4055 = vmatmul.mubr.msk.f32.gmra.mrb[26].mxu0 %vm357_vm2, %v4924_v44  ;;  %v5827_v44 = vld [vmem:[#allocation7_spill] sm:$0xff] }
  0xae   : > { %3833 = vmatprep.mubr.msk.f32.mxu1 %vm357_vm2, %v4916_v19  ;;  %4057 = vmatprep.mubr.msk.f32.mxu0 %vm357_vm2, %v5096_v9 }
  0xb1   : > { %3834 = vmatmul.mubr.msk.f32.gmra.mrb[12].mxu1 %vm357_vm2, %v5823_v37  ;;  %4058 = vmatmul.mubr.msk.f32.gmra.mrb[28].mxu0 %vm357_vm2, %v5099_v6 }
  0xb2   : > { %3836 = vmatprep.mubr.msk.f32.mxu1 %vm357_vm2, %v4951_v39  ;;  %4060 = vmatprep.mubr.msk.f32.mxu0 %vm357_vm2, %v5282_v38 }
  0xb5   : > { %3837 = vmatmul.mubr.msk.f32.gmra.mrb[14].mxu1 %vm357_vm2, %v4968_v41  ;;  %4061 = vmatmul.mubr.msk.f32.gmra.mrb[30].mxu0 %vm357_vm2, %v5293_v62 }
  0xb6   : > { %3839 = vmatprep.mubr.msk.f32.mxu1 %vm357_vm2, %v4975_v13  ;;  %4065 = vmatprep.mubr.msk.f32.mxu0 %vm357_vm2, %v5824_v4  ;;  %v5828_v4 = vld [vmem:[#allocation8_spill] sm:$0xff] }
  0xb9   : > { %3840 = vmatmul.mubr.msk.f32.gmra.mrb[16].mxu1 %vm357_vm2, %v4991_v17  ;;  %4066 = vmatmul.mubr.msk.f32.vlgmr.msra.gmra.mrb[0].mxu0 %vm357_vm2, %v5825_v2  ;;  %v5829_v2 = vld [vmem:[#allocation9_spill] sm:$0xff] }
  0xba   : > { %3842 = vmatprep.mubr.msk.f32.mxu1 %vm357_vm2, %v4995_v61  ;;  %4114 = vmatpush3.msk.msra.mxu0 %vm422_vm0, %v5158_v27  ;;  %v5832_v27 = vld [vmem:[#allocation12_spill] sm:$0xff] }
  0xbb   : > { %4068 = vmatprep.mubr.msk.f32.mxu0 %vm357_vm2, %v5826_v35  ;;  %v5830_v35 = vld [vmem:[#allocation10_spill] sm:$0xff] }
  0xbd   : > { %3843 = vmatmul.mubr.msk.f32.gmra.mrb[18].mxu1 %vm357_vm2, %v5008_v45  ;;  %4069 = vmatmul.mubr.msk.f32.gmra.mrb[2].mxu0 %vm357_vm2, %v5827_v44  ;;  %v5831_v44 = vld [vmem:[#allocation11_spill] sm:$0xff] }
  0xbe   : > { %3845 = vmatprep.mubr.msk.f32.mxu1 %vm357_vm2, %v5012_v0  ;;  %4071 = vmatprep.mubr.msk.f32.mxu0 %vm357_vm2, %v5828_v4  ;;  %v5833_v4 = vld [vmem:[#allocation42_spill] sm:$0xff] }
  0xc1   : > { %3846 = vmatmul.mubr.msk.f32.gmra.mrb[20].mxu1 %vm357_vm2, %v5032_v16  ;;  %4072 = vmatmul.mubr.msk.f32.gmra.mrb[4].mxu0 %vm357_vm2, %v5829_v2  ;;  %v5834_v2 = vld [vmem:[#allocation13_spill] sm:$0xff] }
  0xc2   : > { %3848 = vmatprep.mubr.msk.f32.mxu1 %vm357_vm2, %v5036_v49  ;;  %4074 = vmatprep.mubr.msk.f32.mxu0 %vm357_vm2, %v5830_v35  ;;  %v5835_v49 = vld [vmem:[#allocation43_spill] sm:$0xff]  ;;  %v5836_v35 = vld [vmem:[#allocation14_spill] sm:$0xff] }
  0xc5   : > { %3849 = vmatmul.mubr.msk.f32.gmra.mrb[22].mxu1 %vm357_vm2, %v5051_v56  ;;  %4075 = vmatmul.mubr.msk.f32.gmra.mrb[6].mxu0 %vm357_vm2, %v5831_v44  ;;  %v5837_v44 = vld [vmem:[#allocation15_spill] sm:$0xff] }
  0xc6   : > { %3851 = vmatprep.mubr.msk.f32.mxu1 %vm357_vm2, %v5055_v14  ;;  %4077 = vmatprep.mubr.msk.f32.mxu0 %vm357_vm2, %v5832_v27  ;;  %v5838_v27 = vld [vmem:[#allocation16_spill] sm:$0xff] }
  0xc9   : > { %3852 = vmatmul.mubr.msk.f32.gmra.mrb[24].mxu1 %vm357_vm2, %v5833_v4  ;;  %4078 = vmatmul.mubr.msk.f32.gmra.mrb[8].mxu0 %vm357_vm2, %v5834_v2  ;;  %v5839_v2 = vld [vmem:[#allocation17_spill] sm:$0xff] }
  0xca   : > { %3854 = vmatprep.mubr.msk.f32.mxu1 %vm357_vm2, %v5835_v49  ;;  %4080 = vmatprep.mubr.msk.f32.mxu0 %vm357_vm2, %v5836_v35  ;;  %v5840_v35 = vld [vmem:[#allocation18_spill] sm:$0xff] }
  0xcd   : > { %3855 = vmatmul.mubr.msk.f32.gmra.mrb[26].mxu1 %vm357_vm2, %v5085_v36  ;;  %4081 = vmatmul.mubr.msk.f32.gmra.mrb[10].mxu0 %vm357_vm2, %v5837_v44  ;;  %v5841_v44 = vld [vmem:[#allocation19_spill] sm:$0xff] }
  0xce   : > { %3857 = vmatprep.mubr.msk.f32.mxu1 %vm357_vm2, %v5089_v34  ;;  %4083 = vmatprep.mubr.msk.f32.mxu0 %vm357_vm2, %v5838_v27  ;;  %v5842_v34 = vld [vmem:[#allocation2_spill] sm:$0xff]  ;;  %v5843_v27 = vld [vmem:[#allocation21_spill] sm:$0xff]  ;;  %v5420_v36 = vld [vmem:[%s4494_s25 + $0x1a8] sm:$0x3] }
  0xd1   : > { %3858 = vmatmul.mubr.msk.f32.gmra.mrb[28].mxu1 %vm357_vm2, %v5108_v60  ;;  %4084 = vmatmul.mubr.msk.f32.gmra.mrb[12].mxu0 %vm357_vm2, %v5839_v2  ;;  %v5844_v60 = vld [vmem:[#allocation3_spill] sm:$0xff] }
  0xd2   : > { %3860 = vmatprep.mubr.msk.f32.mxu1 %vm357_vm2, %v5112_v33  ;;  %4086 = vmatprep.mubr.msk.f32.mxu0 %vm357_vm2, %v5840_v35  ;;  %v5845_v2 = vld [vmem:[#allocation23_spill] sm:$0xff]  ;;  %v5853_v33 = vld [vmem:[#allocation38_spill] sm:$0xff] }
  0xd5   : > { %3861 = vmatmul.mubr.msk.f32.gmra.mrb[30].mxu1 %vm357_vm2, %v5128_v48  ;;  %4087 = vmatmul.mubr.msk.f32.gmra.mrb[14].mxu0 %vm357_vm2, %v5841_v44  ;;  %v5846_v48 = vld [vmem:[#allocation25_spill] sm:$0xff] }
  0xd6   : > { %3865 = vmatprep.mubr.msk.f32.mxu1 %vm357_vm2, %v5842_v34  ;;  %4089 = vmatprep.mubr.msk.f32.mxu0 %vm357_vm2, %v5843_v27  ;;  %v5847_v34 = vld [vmem:[#allocation27_spill] sm:$0xff] }
  0xd9   : > { %3866 = vmatmul.mubr.msk.f32.vlgmr.msra.gmra.mrb[0].mxu1 %vm357_vm2, %v5844_v60  ;;  %4090 = vmatmul.mubr.msk.f32.gmra.mrb[16].mxu0 %vm357_vm2, %v5845_v2  ;;  %v5848_v60 = vld [vmem:[#allocation29_spill] sm:$0xff] }
  0xda   : > { %4164 = vmatpush3.msk.msra.mxu1 %vm422_vm0, %v4472_v1  ;;  %3868 = vmatprep.mubr.msk.f32.mxu1 %vm357_vm2, %v4520_v15  ;;  %v5849_v1 = vld [vmem:[#allocation31_spill] sm:$0xff]  ;;  %v5850_v15 = vld [vmem:[#allocation33_spill] sm:$0xff] }
  0xdb   : > { %4092 = vmatprep.mubr.msk.f32.mxu0 %vm357_vm2, %v5846_v48 }
  0xdd   : > { %3869 = vmatmul.mubr.msk.f32.gmra.mrb[2].mxu1 %vm357_vm2, %v4525_v18  ;;  %4093 = vmatmul.mubr.msk.f32.gmra.mrb[18].mxu0 %vm357_vm2, %v5847_v34  ;;  %v5851_v18 = vld [vmem:[#allocation35_spill] sm:$0xff] }
  0xde   : > { %3871 = vmatprep.mubr.msk.f32.mxu1 %vm357_vm2, %v4537_v25  ;;  %4095 = vmatprep.mubr.msk.f32.mxu0 %vm357_vm2, %v5848_v60  ;;  %v5852_v25 = vld [vmem:[#allocation37_spill] sm:$0xff] }
  0xe1   : > { %3872 = vmatmul.mubr.msk.f32.gmra.mrb[4].mxu1 %vm357_vm2, %v4540_v26  ;;  %4096 = vmatmul.mubr.msk.f32.gmra.mrb[20].mxu0 %vm357_vm2, %v5849_v1  ;;  %v1619_v26 = vrot.slane %v5096_v9, 1 }
  0xe2   : > { %3874 = vmatprep.mubr.msk.f32.mxu1 %vm357_vm2, %v4551_v31  ;;  %4098 = vmatprep.mubr.msk.f32.mxu0 %vm357_vm2, %v5850_v15  ;;  %v1620_v31 = vrot.slane %v5099_v6, 1 }
  0xe4   : > { %v5417_v15 = vsel %vm274_vm1, %v1619_v26, %v1620_v31 }
  0xe5   : > { %3875 = vmatmul.mubr.msk.f32.gmra.mrb[6].mxu1 %vm357_vm2, %v4554_v32  ;;  %4099 = vmatmul.mubr.msk.f32.gmra.mrb[22].mxu0 %vm357_vm2, %v5851_v18  ;;  %v5854_v32 = vld [vmem:[#allocation39_spill] sm:$0xff]  ;;  %v2431_v18 = vrot.slane %v5293_v62, 1 }
  0xe6   : > { %3877 = vmatprep.mubr.msk.f32.mxu1 %vm357_vm2, %v4591_v42  ;;  %4101 = vmatprep.mubr.msk.f32.mxu0 %vm357_vm2, %v5852_v25  ;;  %v1622_v42 = vrot.slane %v5117_v52, 1  ;;  %v2430_v25 = vrot.slane %v5282_v38, 1  ;;  %v2433_v52 = vrot.slane %v5420_v36, 1 }
  0xe8   : > { %v2432_v26 = vsel %vm274_vm1, %v2430_v25, %v2431_v18 }
  0xe9   : > { %3878 = vmatmul.mubr.msk.f32.gmra.mrb[8].mxu1 %vm357_vm2, %v4594_v43  ;;  %4102 = vmatmul.mubr.msk.f32.gmra.mrb[24].mxu0 %vm357_vm2, %v5853_v33  ;;  %v5855_v43 = vld [vmem:[#allocation40_spill] sm:$0xff] }
  0xea   : > { %3880 = vmatprep.mubr.msk.f32.mxu1 %vm357_vm2, %v4619_v50  ;;  %4104 = vmatprep.mubr.msk.f32.mxu0 %vm357_vm2, %v5854_v32  ;;  %v5431_v50 = vsel %vm274_vm1, %v1620_v31, %v1622_v42 }
  0xed   : > { %3881 = vmatmul.mubr.msk.f32.gmra.mrb[10].mxu1 %vm357_vm2, %v4622_v51  ;;  %4105 = vmatmul.mubr.msk.f32.gmra.mrb[26].mxu0 %vm357_vm2, %v5855_v43  ;;  %v2434_v51 = vsel %vm274_vm1, %v2431_v18, %v2433_v52 }
  0xee   : > { %3883 = vmatprep.mubr.msk.f32.mxu1 %vm357_vm2, %v4645_v58  ;;  %4107 = vmatprep.mubr.msk.f32.mxu0 %vm357_vm2, %v5417_v15  ;;  %v5859_v58 = vld [vmem:[#allocation33_spill] sm:$0xff] }
  0xf1   : > { %3884 = vmatmul.mubr.msk.f32.gmra.mrb[12].mxu1 %vm357_vm2, %v4648_v59  ;;  %4108 = vmatmul.mubr.msk.f32.gmra.mrb[28].mxu0 %vm357_vm2, %v5431_v50  ;;  %v5860_v59 = vld [vmem:[#allocation45_spill] sm:$0xff] }
  0xf2   : > { %3886 = vmatprep.mubr.msk.f32.mxu1 %vm357_vm2, %v4671_v3  ;;  %4110 = vmatprep.mubr.msk.f32.mxu0 %vm357_vm2, %v2432_v26  ;;  %v5861_v3 = vld [vmem:[#allocation35_spill] sm:$0xff] }
  0xf5   : > { %3887 = vmatmul.mubr.msk.f32.gmra.mrb[14].mxu1 %vm357_vm2, %v4674_v7  ;;  %4111 = vmatmul.mubr.msk.f32.gmra.mrb[30].mxu0 %vm357_vm2, %v2434_v51  ;;  %v5862_v7 = vld [vmem:[#allocation46_spill] sm:$0xff] }
  0xf6   : > { %3889 = vmatprep.mubr.msk.f32.mxu1 %vm357_vm2, %v4712_v28  ;;  %4115 = vmatprep.mubr.msk.f32.mxu0 %vm357_vm2, %v4767_v21  ;;  %v2701_v28 = vrot.slane %v5282_v38, 2  ;;  %v2704_v21 = vrot.slane %v5420_v36, 2 }
  0xf9   : > { %3890 = vmatmul.mubr.msk.f32.gmra.mrb[16].mxu1 %vm357_vm2, %v4715_v29  ;;  %4116 = vmatmul.mubr.msk.f32.vlgmr.msra.gmra.mrb[0].mxu0 %vm357_vm2, %v5816_v5  ;;  %v2702_v29 = vrot.slane %v5293_v62, 2 }
  0xfa   : > { %3892 = vmatprep.mubr.msk.f32.mxu1 %vm357_vm2, %v4740_v53  ;;  %4118 = vmatprep.mubr.msk.f32.mxu0 %vm357_vm2, %v5817_v11  ;;  %v5865_v53 = vld [vmem:[#allocation48_spill] sm:$0xff] }
  0xfd   : > { %3893 = vmatmul.mubr.msk.f32.gmra.mrb[18].mxu1 %vm357_vm2, %v4743_v55  ;;  %4119 = vmatmul.mubr.msk.f32.gmra.mrb[2].mxu0 %vm357_vm2, %v5818_v47  ;;  %v5866_v55 = vld [vmem:[#allocation49_spill] sm:$0xff] }
  0xfe   : > { %3895 = vmatprep.mubr.msk.f32.mxu1 %vm357_vm2, %v4772_v22  ;;  %4121 = vmatprep.mubr.msk.f32.mxu0 %vm357_vm2, %v5819_v63  ;;  %v5864_v22 = vld [vmem:[#allocation47_spill] sm:$0xff] }
 0x101   : > { %3896 = vmatmul.mubr.msk.f32.gmra.mrb[20].mxu1 %vm357_vm2, %v4775_v24  ;;  %4122 = vmatmul.mubr.msk.f32.gmra.mrb[4].mxu0 %vm357_vm2, %v5820_v23  ;;  %v2703_v24 = vsel %vm943_vm3, %v2701_v28, %v2702_v29 }
 0x102   : > { %3898 = vmatprep.mubr.msk.f32.mxu1 %vm357_vm2, %v4814_v8  ;;  %4124 = vmatprep.mubr.msk.f32.mxu0 %vm357_vm2, %v5821_v57  ;;  %v5863_v8 = vld [vmem:[#allocation37_spill] sm:$0xff] }
 0x105   : > { %3899 = vmatmul.mubr.msk.f32.gmra.mrb[22].mxu1 %vm357_vm2, %v4817_v10  ;;  %4125 = vmatmul.mubr.msk.f32.gmra.mrb[6].mxu0 %vm357_vm2, %v5822_v30  ;;  %v5867_v10 = vld [vmem:[#allocation50_spill] sm:$0xff] }
 0x106   : > { %3901 = vmatprep.mubr.msk.f32.mxu1 %vm357_vm2, %v4851_v46  ;;  %4127 = vmatprep.mubr.msk.f32.mxu0 %vm357_vm2, %v4916_v19  ;;  %v5856_v46 = vld [vmem:[#allocation34_spill] sm:$0xff] }
 0x109   : > { %3902 = vmatmul.mubr.msk.f32.gmra.mrb[24].mxu1 %vm357_vm2, %v4854_v12  ;;  %4128 = vmatmul.mubr.msk.f32.gmra.mrb[8].mxu0 %vm357_vm2, %v5823_v37  ;;  %v2705_v12 = vsel %vm943_vm3, %v2702_v29, %v2704_v21 }
 0x10a   : > { %3904 = vmatprep.mubr.msk.f32.mxu1 %vm357_vm2, %v4886_v20  ;;  %4130 = vmatprep.mubr.msk.f32.mxu0 %vm357_vm2, %v4951_v39 }
 0x10d   : > { %3905 = vmatmul.mubr.msk.f32.gmra.mrb[26].mxu1 %vm357_vm2, %v4889_v54  ;;  %4131 = vmatmul.mubr.msk.f32.gmra.mrb[10].mxu0 %vm357_vm2, %v4968_v41 }
 0x10e   : > { %3907 = vmatprep.mubr.msk.f32.mxu1 %vm357_vm2, %v4921_v40  ;;  %4133 = vmatprep.mubr.msk.f32.mxu0 %vm357_vm2, %v4975_v13 }
 0x111   : > { %3908 = vmatmul.mubr.msk.f32.gmra.mrb[28].mxu1 %vm357_vm2, %v5856_v46  ;;  %4134 = vmatmul.mubr.msk.f32.gmra.mrb[12].mxu0 %vm357_vm2, %v4991_v17 }
 0x112   : > { %3910 = vmatprep.mubr.msk.f32.mxu1 %vm357_vm2, %v5096_v9  ;;  %4136 = vmatprep.mubr.msk.f32.mxu0 %vm357_vm2, %v4995_v61  ;;  %v5857_v9 = vld [vmem:[#allocation41_spill] sm:$0xff] }
 0x115   : > { %3911 = vmatmul.mubr.msk.f32.gmra.mrb[30].mxu1 %vm357_vm2, %v5099_v6  ;;  %4137 = vmatmul.mubr.msk.f32.gmra.mrb[14].mxu0 %vm357_vm2, %v5008_v45  ;;  %v5858_v6 = vld [vmem:[#allocation44_spill] sm:$0xff] }
 0x116   : > { %3939 = vmatprep.mubr.msk.f32.mxu1 %vm357_vm2, %v5840_v35  ;;  %4139 = vmatprep.mubr.msk.f32.mxu0 %vm357_vm2, %v5012_v0 }
 0x119   : > { %3940 = vmatmul.mubr.msk.f32.vlgmr.msra.gmra.mrb[16].mxu1 %vm357_vm2, %v5841_v44  ;;  %4140 = vmatmul.mubr.msk.f32.gmra.mrb[16].mxu0 %vm357_vm2, %v5032_v16 }
 0x11a   : > { %3942 = vmatprep.mubr.msk.f32.mxu1 %vm357_vm2, %v5843_v27  ;;  %4142 = vmatprep.mubr.msk.f32.mxu0 %vm357_vm2, %v5857_v9 }
 0x11d   : > { %3943 = vmatmul.mubr.msk.f32.gmra.mrb[18].mxu1 %vm357_vm2, %v5845_v2  ;;  %4143 = vmatmul.mubr.msk.f32.gmra.mrb[18].mxu0 %vm357_vm2, %v5051_v56 }
 0x11e   : > { %3945 = vmatprep.mubr.msk.f32.mxu1 %vm357_vm2, %v5846_v48  ;;  %4145 = vmatprep.mubr.msk.f32.mxu0 %vm357_vm2, %v5055_v14  ;;  %v5583_v48 = vld [vmem:[%s5692_s2] ss:$0 sm:$0xff] }
 0x121   : > { %3946 = vmatmul.mubr.msk.f32.gmra.mrb[20].mxu1 %vm357_vm2, %v5847_v34  ;;  %4146 = vmatmul.mubr.msk.f32.gmra.mrb[20].mxu0 %vm357_vm2, %v5833_v4 }
 0x122   : > { %3948 = vmatprep.mubr.msk.f32.mxu1 %vm357_vm2, %v5848_v60  ;;  %4148 = vmatprep.mubr.msk.f32.mxu0 %vm357_vm2, %v5835_v49 }
 0x125   : > { %3949 = vmatmul.mubr.msk.f32.gmra.mrb[22].mxu1 %vm357_vm2, %v5849_v1  ;;  %4149 = vmatmul.mubr.msk.f32.gmra.mrb[22].mxu0 %vm357_vm2, %v5858_v6 }
 0x126   : > { %3951 = vmatprep.mubr.msk.f32.mxu1 %vm357_vm2, %v5859_v58  ;;  %4151 = vmatprep.mubr.msk.f32.mxu0 %vm357_vm2, %v5860_v59 }
 0x129   : > { %3952 = vmatmul.mubr.msk.f32.gmra.mrb[24].mxu1 %vm357_vm2, %v5861_v3  ;;  %4152 = vmatmul.mubr.msk.f32.gmra.mrb[24].mxu0 %vm357_vm2, %v5862_v7 }
 0x12a   : > { %3954 = vmatprep.mubr.msk.f32.mxu1 %vm357_vm2, %v5863_v8  ;;  %4154 = vmatprep.mubr.msk.f32.mxu0 %vm357_vm2, %v5864_v22 }
 0x12d   : > { %3955 = vmatmul.mubr.msk.f32.gmra.mrb[26].mxu1 %vm357_vm2, %v5853_v33  ;;  %4155 = vmatmul.mubr.msk.f32.gmra.mrb[26].mxu0 %vm357_vm2, %v5865_v53 }
 0x12e   : > { %3957 = vmatprep.mubr.msk.f32.mxu1 %vm357_vm2, %v5854_v32  ;;  %4157 = vmatprep.mubr.msk.f32.mxu0 %vm357_vm2, %v5866_v55 }
 0x131   : > { %3958 = vmatmul.mubr.msk.f32.gmra.mrb[28].mxu1 %vm357_vm2, %v5855_v43  ;;  %4158 = vmatmul.mubr.msk.f32.gmra.mrb[28].mxu0 %vm357_vm2, %v5867_v10 }
 0x132   : > { %3960 = vmatprep.mubr.msk.f32.mxu1 %vm357_vm2, %v5417_v15  ;;  %4160 = vmatprep.mubr.msk.f32.mxu0 %vm357_vm2, %v2703_v24 }
 0x135   : > { %3961 = vmatmul.mubr.msk.f32.gmra.mrb[30].mxu1 %vm357_vm2, %v5431_v50  ;;  %4161 = vmatmul.mubr.msk.f32.gmra.mrb[30].mxu0 %vm357_vm2, %v2705_v12 }
 0x1ac   : > { %v3867_v40 = vpop.f32.mrb[0].mxu1 }
 0x1ad   : > { %v1427_v20 = vpop.f32.mrb[1].mxu1 }
 0x1b0   : > { %v3870_v54 = vpop.f32.mrb[2].mxu1 }
 0x1b1   : > { %v1437_v19 = vpop.f32.mrb[3].mxu1 }
 0x1b4   : > { %v3873_v13 = vpop.f32.mrb[4].mxu1 }
 0x1b5   : > { %v1447_v39 = vpop.f32.mrb[5].mxu1 }
 0x1b8   : > { %v3876_v41 = vpop.f32.mrb[6].mxu1 }
 0x1b9   : > { %v1457_v17 = vpop.f32.mrb[7].mxu1 }
 0x1bc   : > { %v3879_v61 = vpop.f32.mrb[8].mxu1 }
 0x1bd   : > { %v1467_v45 = vpop.f32.mrb[9].mxu1 }
 0x1c0   : > { %v3882_v0 = vpop.f32.mrb[10].mxu1 }
 0x1c1   : > { %v1477_v16 = vpop.f32.mrb[11].mxu1 }
 0x1c4   : > { %v3885_v49 = vpop.f32.mrb[12].mxu1 }
 0x1c5   : > { %v1487_v56 = vpop.f32.mrb[13].mxu1 }
 0x1c8   : > { %v3888_v14 = vpop.f32.mrb[14].mxu1 }
 0x1c9   : > { %v5577_v36 = vpop.f32.mrb[15].mxu1 }
 0x1cc   : > { %v4117_v33 = vpop.f32.mrb[0].mxu0 }
 0x1cd   : > { %v4165_v5 = vadd.f32 %v4117_v33, %v3867_v40  ;;  %v2781_v11 = vpop.f32.mrb[1].mxu0 }
 0x1ce   : > { %v4166_v47 = vadd.f32 %v2781_v11, %v1427_v20 }
 0x1cf   : > { %v2980_v63 = vadd.f32 %v4165_v5, %v5583_v48 }
 0x1d0   : > { %v2979_v23 = vadd.f32 %v4166_v47, %v5583_v48  ;;  %v4120_v57 = vpop.f32.mrb[2].mxu0 }
 0x1d1   : > { %3013 = vst.msk [vmem:[%s5588_s16 + $0x8] sm:$0xff] %vm3011_vm4, %v2980_v63  ;;  %v4167_v30 = vadd.f32 %v4120_v57, %v3870_v54  ;;  %v2791_v38 = vpop.f32.mrb[3].mxu0 }
 0x1d2   : > { %3012 = vst.msk [vmem:[%s5588_s16] sm:$0xff] %vm3011_vm4, %v2979_v23  ;;  %v4168_v37 = vadd.f32 %v2791_v38, %v1437_v19 }
 0x1d3   : > { %v2982_v62 = vadd.f32 %v4167_v30, %v5583_v48 }
 0x1d4   : > { %v2981_v4 = vadd.f32 %v4168_v37, %v5583_v48  ;;  %v4123_v35 = vpop.f32.mrb[4].mxu0 }
 0x1d5   : > { %3015 = vst.msk [vmem:[%s5588_s16 + $0x18] sm:$0xff] %vm3011_vm4, %v2982_v62  ;;  %v4169_v44 = vadd.f32 %v4123_v35, %v3873_v13  ;;  %v2801_v27 = vpop.f32.mrb[5].mxu0 }
 0x1d6   : > { %3014 = vst.msk [vmem:[%s5588_s16 + $0x10] sm:$0xff] %vm3011_vm4, %v2981_v4  ;;  %v4170_v2 = vadd.f32 %v2801_v27, %v1447_v39 }
 0x1d7   : > { %v2984_v34 = vadd.f32 %v4169_v44, %v5583_v48 }
 0x1d8   : > { %v2983_v60 = vadd.f32 %v4170_v2, %v5583_v48  ;;  %v4126_v1 = vpop.f32.mrb[6].mxu0 }
 0x1d9   : > { %3017 = vst.msk [vmem:[%s5588_s16 + $0x28] sm:$0xff] %vm3011_vm4, %v2984_v34  ;;  %v4171_v15 = vadd.f32 %v4126_v1, %v3876_v41  ;;  %v2811_v18 = vpop.f32.mrb[7].mxu0 }
 0x1da   : > { %3016 = vst.msk [vmem:[%s5588_s16 + $0x20] sm:$0xff] %vm3011_vm4, %v2983_v60  ;;  %v4172_v25 = vadd.f32 %v2811_v18, %v1457_v17 }
 0x1db   : > { %v2986_v31 = vadd.f32 %v4171_v15, %v5583_v48 }
 0x1dc   : > { %v2985_v32 = vadd.f32 %v4172_v25, %v5583_v48  ;;  %v4129_v42 = vpop.f32.mrb[8].mxu0 }
 0x1dd   : > { %3019 = vst.msk [vmem:[%s5588_s16 + $0x38] sm:$0xff] %vm3011_vm4, %v2986_v31  ;;  %v4173_v43 = vadd.f32 %v4129_v42, %v3879_v61  ;;  %v2821_v50 = vpop.f32.mrb[9].mxu0 }
 0x1de   : > { %3018 = vst.msk [vmem:[%s5588_s16 + $0x30] sm:$0xff] %vm3011_vm4, %v2985_v32  ;;  %v4174_v52 = vadd.f32 %v2821_v50, %v1467_v45 }
 0x1df   : > { %v2988_v26 = vadd.f32 %v4173_v43, %v5583_v48 }
 0x1e0   : > { %v2987_v51 = vadd.f32 %v4174_v52, %v5583_v48  ;;  %v4132_v46 = vpop.f32.mrb[10].mxu0 }
 0x1e1   : > { %3021 = vst.msk [vmem:[%s5588_s16 + $0x48] sm:$0xff] %vm3011_vm4, %v2988_v26  ;;  %v4175_v9 = vadd.f32 %v4132_v46, %v3882_v0  ;;  %v2831_v6 = vpop.f32.mrb[11].mxu0 }
 0x1e2   : > { %3020 = vst.msk [vmem:[%s5588_s16 + $0x40] sm:$0xff] %vm3011_vm4, %v2987_v51  ;;  %v4176_v58 = vadd.f32 %v2831_v6, %v1477_v16 }
 0x1e3   : > { %v2990_v59 = vadd.f32 %v4175_v9, %v5583_v48 }
 0x1e4   : > { %v2989_v3 = vadd.f32 %v4176_v58, %v5583_v48  ;;  %v4135_v7 = vpop.f32.mrb[12].mxu0 }
 0x1e5   : > { %3023 = vst.msk [vmem:[%s5588_s16 + $0x58] sm:$0xff] %vm3011_vm4, %v2990_v59  ;;  %v4177_v8 = vadd.f32 %v4135_v7, %v3885_v49  ;;  %v2841_v22 = vpop.f32.mrb[13].mxu0 }
 0x1e6   : > { %3022 = vst.msk [vmem:[%s5588_s16 + $0x50] sm:$0xff] %vm3011_vm4, %v2989_v3  ;;  %v4178_v28 = vadd.f32 %v2841_v22, %v1487_v56 }
 0x1e7   : > { %v2992_v29 = vadd.f32 %v4177_v8, %v5583_v48 }
 0x1e8   : > { %v2991_v53 = vadd.f32 %v4178_v28, %v5583_v48  ;;  %v4138_v55 = vpop.f32.mrb[14].mxu0 }
 0x1e9   : > { %3025 = vst.msk [vmem:[%s5588_s16 + $0x68] sm:$0xff] %vm3011_vm4, %v2992_v29  ;;  %v4179_v21 = vadd.f32 %v4138_v55, %v3888_v14  ;;  %v2851_v24 = vpop.f32.mrb[15].mxu0 }
 0x1ea   : > { %3024 = vst.msk [vmem:[%s5588_s16 + $0x60] sm:$0xff] %vm3011_vm4, %v2991_v53  ;;  %v4180_v10 = vadd.f32 %v2851_v24, %v5577_v36 }
 0x1eb   : > { %v2994_v12 = vadd.f32 %v4179_v21, %v5583_v48 }
 0x1ec   : > { %v3941_v40 = vpop.f32.mrb[16].mxu1  ;;  %v2993_v20 = vadd.f32 %v4180_v10, %v5583_v48  ;;  %v4141_v54 = vpop.f32.mrb[16].mxu0 }
 0x1ed   : > { %v1779_v19 = vpop.f32.mrb[17].mxu1  ;;  %3027 = vst.msk [vmem:[%s5588_s16 + $0x78] sm:$0xff] %vm3011_vm4, %v2994_v12  ;;  %v4181_v13 = vadd.f32 %v4141_v54, %v3941_v40  ;;  %v2861_v39 = vpop.f32.mrb[17].mxu0 }
 0x1ee   : > { %3026 = vst.msk [vmem:[%s5588_s16 + $0x70] sm:$0xff] %vm3011_vm4, %v2993_v20  ;;  %v4182_v41 = vadd.f32 %v2861_v39, %v1779_v19 }
 0x1ef   : > { %v2996_v17 = vadd.f32 %v4181_v13, %v5583_v48 }
 0x1f0   : > { %v3944_v61 = vpop.f32.mrb[18].mxu1  ;;  %v2995_v45 = vadd.f32 %v4182_v41, %v5583_v48  ;;  %v4144_v0 = vpop.f32.mrb[18].mxu0 }
 0x1f1   : > { %v1789_v16 = vpop.f32.mrb[19].mxu1  ;;  %3029 = vst.msk [vmem:[%s5588_s16 + $0x88] sm:$0xff] %vm3011_vm4, %v2996_v17  ;;  %v4183_v49 = vadd.f32 %v4144_v0, %v3944_v61  ;;  %v2871_v56 = vpop.f32.mrb[19].mxu0 }
 0x1f2   : > { %3028 = vst.msk [vmem:[%s5588_s16 + $0x80] sm:$0xff] %vm3011_vm4, %v2995_v45  ;;  %v4184_v14 = vadd.f32 %v2871_v56, %v1789_v16 }
 0x1f3   : > { %v2998_v36 = vadd.f32 %v4183_v49, %v5583_v48 }
 0x1f4   : > { %v3947_v33 = vpop.f32.mrb[20].mxu1  ;;  %v2997_v5 = vadd.f32 %v4184_v14, %v5583_v48  ;;  %v4147_v11 = vpop.f32.mrb[20].mxu0 }
 0x1f5   : > { %v1799_v47 = vpop.f32.mrb[21].mxu1  ;;  %3031 = vst.msk [vmem:[%s5588_s16 + $0x98] sm:$0xff] %vm3011_vm4, %v2998_v36  ;;  %v4185_v63 = vadd.f32 %v4147_v11, %v3947_v33  ;;  %v2881_v23 = vpop.f32.mrb[21].mxu0 }
 0x1f6   : > { %3030 = vst.msk [vmem:[%s5588_s16 + $0x90] sm:$0xff] %vm3011_vm4, %v2997_v5  ;;  %v4186_v57 = vadd.f32 %v2881_v23, %v1799_v47 }
 0x1f7   : > { %v3000_v30 = vadd.f32 %v4185_v63, %v5583_v48 }
 0x1f8   : > { %v3950_v38 = vpop.f32.mrb[22].mxu1  ;;  %v2999_v37 = vadd.f32 %v4186_v57, %v5583_v48  ;;  %v4150_v62 = vpop.f32.mrb[22].mxu0 }
 0x1f9   : > { %v1809_v4 = vpop.f32.mrb[23].mxu1  ;;  %3033 = vst.msk [vmem:[%s5588_s16 + $0xa8] sm:$0xff] %vm3011_vm4, %v3000_v30  ;;  %v4187_v35 = vadd.f32 %v4150_v62, %v3950_v38  ;;  %v2891_v44 = vpop.f32.mrb[23].mxu0 }
 0x1fa   : > { %3032 = vst.msk [vmem:[%s5588_s16 + $0xa0] sm:$0xff] %vm3011_vm4, %v2999_v37  ;;  %v4188_v27 = vadd.f32 %v2891_v44, %v1809_v4 }
 0x1fb   : > { %v3002_v2 = vadd.f32 %v4187_v35, %v5583_v48 }
 0x1fc   : > { %v3953_v34 = vpop.f32.mrb[24].mxu1  ;;  %v3001_v60 = vadd.f32 %v4188_v27, %v5583_v48  ;;  %v4153_v1 = vpop.f32.mrb[24].mxu0 }
 0x1fd   : > { %v1819_v15 = vpop.f32.mrb[25].mxu1  ;;  %3035 = vst.msk [vmem:[%s5588_s16 + $0xb8] sm:$0xff] %vm3011_vm4, %v3002_v2  ;;  %v4189_v18 = vadd.f32 %v4153_v1, %v3953_v34  ;;  %v2901_v25 = vpop.f32.mrb[25].mxu0 }
 0x1fe   : > { %3034 = vst.msk [vmem:[%s5588_s16 + $0xb0] sm:$0xff] %vm3011_vm4, %v3001_v60  ;;  %v4190_v31 = vadd.f32 %v2901_v25, %v1819_v15 }
 0x1ff   : > { %v3004_v32 = vadd.f32 %v4189_v18, %v5583_v48 }
 0x200   : > { %v3956_v42 = vpop.f32.mrb[26].mxu1  ;;  %v3003_v43 = vadd.f32 %v4190_v31, %v5583_v48  ;;  %v4156_v50 = vpop.f32.mrb[26].mxu0 }
 0x201   : > { %v1829_v52 = vpop.f32.mrb[27].mxu1  ;;  %3037 = vst.msk [vmem:[%s5588_s16 + $0xc8] sm:$0xff] %vm3011_vm4, %v3004_v32  ;;  %v4191_v26 = vadd.f32 %v4156_v50, %v3956_v42  ;;  %v2911_v51 = vpop.f32.mrb[27].mxu0 }
 0x202   : > { %3036 = vst.msk [vmem:[%s5588_s16 + $0xc0] sm:$0xff] %vm3011_vm4, %v3003_v43  ;;  %v4192_v46 = vadd.f32 %v2911_v51, %v1829_v52 }
 0x203   : > { %v3006_v9 = vadd.f32 %v4191_v26, %v5583_v48 }
 0x204   : > { %v3959_v6 = vpop.f32.mrb[28].mxu1  ;;  %v3005_v58 = vadd.f32 %v4192_v46, %v5583_v48  ;;  %v4159_v59 = vpop.f32.mrb[28].mxu0 }
 0x205   : > { %v1839_v3 = vpop.f32.mrb[29].mxu1  ;;  %3039 = vst.msk [vmem:[%s5588_s16 + $0xd8] sm:$0xff] %vm3011_vm4, %v3006_v9  ;;  %v4193_v7 = vadd.f32 %v4159_v59, %v3959_v6  ;;  %v2921_v8 = vpop.f32.mrb[29].mxu0 }
 0x206   : > { %3038 = vst.msk [vmem:[%s5588_s16 + $0xd0] sm:$0xff] %vm3011_vm4, %v3005_v58  ;;  %v4194_v22 = vadd.f32 %v2921_v8, %v1839_v3 }
 0x207   : > { %v3008_v28 = vadd.f32 %v4193_v7, %v5583_v48 }
 0x208   : > { %v3962_v29 = vpop.f32.mrb[30].mxu1  ;;  %v3007_v53 = vadd.f32 %v4194_v22, %v5583_v48  ;;  %v4162_v55 = vpop.f32.mrb[30].mxu0 }
 0x209   : > { %v1849_v21 = vpop.f32.mrb[31].mxu1  ;;  %3041 = vst.msk [vmem:[%s5588_s16 + $0xe8] sm:$0xff] %vm3011_vm4, %v3008_v28  ;;  %v4195_v24 = vadd.f32 %v4162_v55, %v3962_v29  ;;  %v2931_v10 = vpop.f32.mrb[31].mxu0 }
 0x20a   : > { %3040 = vst.msk [vmem:[%s5588_s16 + $0xe0] sm:$0xff] %vm3011_vm4, %v3007_v53  ;;  %v4196_v12 = vadd.f32 %v2931_v10, %v1849_v21 }
 0x20b   : > { %v3010_v40 = vadd.f32 %v4195_v24, %v5583_v48 }
 0x20c   : > { %v3009_v20 = vadd.f32 %v4196_v12, %v5583_v48 }
 0x20d   : > { %3043 = vst.msk [vmem:[%s5588_s16 + $0xf8] sm:$0xff] %vm3011_vm4, %v3010_v40 }
 0x20e   : > { %3042 = vst.msk [vmem:[%s5588_s16 + $0xf0] sm:$0xff] %vm3011_vm4, %v3009_v20 }
 0x20f PF: > { %s13_s12 = sadd.s32 1, %s4436_s12  }
 0x210   : > { %p10_p4 = scmp.ge.s32.totalorder %s13_s12, 4  }
 0x212   :  { %12 = sbr.rel (!%p10_p4) target bundleno = 1 (0x1), region = 70 }

// kernel: vit_forward.11
= control target key start
LH: loop header
LB: loop body
LE: loop exit
PB: predicated region body
PF: predicated region fallthrough
CT: control target
= control target key end

     0   :  { %s870_s24 = smov 0   ;;  %s1008_s0 = inlined_call_operand.vmem [shape: f32[2,24,32], index: 0, kind: input, shape index: {}]   ;;  %s1009_s1 = inlined_call_operand.vmem [shape: f32[1,32], index: 1, kind: input, shape index: {}]   ;;  %s1010_s2 = inlined_call_operand.vmem [shape: f32[1,32], index: 2, kind: input, shape index: {}]   ;;  %s1011_s3 = inlined_call_operand.vmem [shape: f32[32,64], index: 3, kind: input, shape index: {}]   ;;  %s1012_s4 = inlined_call_operand.vmem [shape: f32[1,64], index: 4, kind: input, shape index: {}]   ;;  %s1013_s5 = inlined_call_operand.vmem [shape: f32[64,32], index: 5, kind: input, shape index: {}]   ;;  %s1014_s6 = inlined_call_operand.vmem [shape: f32[1,32], index: 6, kind: input, shape index: {}]   ;;  %s1015_s7 = inlined_call_operand.vmem [shape: f32[2,24,32], index: 7, kind: output, shape index: {}]  }
   0x1 LB: > { %s690_s25 = sadd.s32 4294967295, %s824_s24   ;;  %p694_p0 = scmp.ge.s32.totalorder %s824_s24, 1  ;;  %s824_s24 = sphi %s870_s24, %s17_s24  }
   0x2   : > { %p237_p1 = scmp.lt.s32.totalorder %s824_s24, 3 }
   0x4   : > { %p238_p2 = pnand %p694_p0, %p237_p1 }
   0x5   : > { %p269_p3 = scmp.lt.s32.totalorder (!%p238_p2), %s690_s25, 1  ;;  %vm284_vm0 = vcmask (!%p238_p2), 261120   ;;  %v343_v21 = vld [vmem:[%s1011_s3] sm:$0xff] (!%p238_p2)  ;;  %v344_v22 = vld [vmem:[%s1011_s3 + $0x8] sm:$0xff] (!%p238_p2)  ;;  %v345_v23 = vld [vmem:[%s1011_s3 + $0x10] sm:$0xff] (!%p238_p2)  ;;  %v826_v24 = vmov (!%p238_p2), 0.0|0.0  }
   0x6   : > { %241 = sbr.rel (%p238_p2) target bundleno = 818 (0x332), region = 48  ;;  %769 = vmatprep.subr.bf16.mxu0 (!%p238_p2), %v826_v24  ;;  %v770_v25 = vpack.c.bf16 (!%p238_p2), %v344_v22, %v343_v21  ;;  %v346_v26 = vld [vmem:[%s1011_s3 + $0x18] sm:$0xff] (!%p238_p2)  ;;  %vm827_vm1 = vmmov (!%p238_p2), 0   ;;  %v828_v27 = vmov (!%p238_p2), 0.0   ;;  %775 = vmatprep.subr.bf16.mxu1 (!%p238_p2), %v826_v24  ;;  %v697_v39 = vld [vmem:[%s1009_s1] ss:$0 sm:$0xff] (!%p238_p2) }
   0x7   : > { %735 = vmatprep.mubr.msk.f32.mxu0 (!%p238_p2), %vm827_vm1, %v828_v27  ;;  %760 = vmatprep.mubr.msk.f32.mxu1 (!%p238_p2), %vm827_vm1, %v828_v27  ;;  %v773_v28 = vpack.c.bf16 (!%p238_p2), %v346_v26, %v345_v23  ;;  %v698_v41 = vld [vmem:[%s1010_s2] ss:$0 sm:$0xff] (!%p238_p2)  ;;  %v525_v53 = vld [vmem:[%s1013_s5 + $0x8] sm:$0xff] (!%p238_p2)  ;;  %v526_v55 = vld [vmem:[%s1013_s5 + $0x10] sm:$0xff] (!%p238_p2)  ;;  %vm539_vm4 = vcmask (!%p238_p2), 523264  }
   0x8   : > { %771 = vmatpush3.bf16.msra.mxu0 (!%p238_p2), %v770_v25  ;;  %v524_v52 = vld [vmem:[%s1013_s5] sm:$0xff] (!%p238_p2)  ;;  %v527_v56 = vld [vmem:[%s1013_s5 + $0x18] sm:$0xff] (!%p238_p2)  ;;  %v529_v59 = vld [vmem:[%s1013_s5 + $0x28] sm:$0xff] (!%p238_p2) }
   0x9   : > { %772 = vmatprep.subr.bf16.mxu0 (!%p238_p2), %v826_v24  ;;  %v776_v54 = vpack.c.bf16 (!%p238_p2), %v525_v53, %v524_v52  ;;  %v779_v57 = vpack.c.bf16 (!%p238_p2), %v527_v56, %v526_v55  ;;  %v528_v58 = vld [vmem:[%s1013_s5 + $0x20] sm:$0xff] (!%p238_p2)  ;;  %v530_v61 = vld [vmem:[%s1013_s5 + $0x30] sm:$0xff] (!%p238_p2)  ;;  %v531_v62 = vld [vmem:[%s1013_s5 + $0x38] sm:$0xff] (!%p238_p2) }
   0xa   : > { %v782_v60 = vpack.c.bf16 (!%p238_p2), %v529_v59, %v528_v58  ;;  %v785_v63 = vpack.c.bf16 (!%p238_p2), %v531_v62, %v530_v61 }
   0xb   : > { %777 = vmatpush3.bf16.msra.mxu1 (!%p238_p2), %v776_v54 }
   0xc   : > { %774 = vmatpush3.bf16.msra.mxu0 (!%p238_p2), %v773_v28  ;;  %778 = vmatprep.subr.bf16.mxu1 (!%p238_p2), %v826_v24 }
   0xd   : > { %s1017_s25 = smov (!%p269_p3, %s690_s25), 1 }
   0xe   : > { %s787_s26 = smul.u32 24, %s1017_s25 }
   0xf   : > { %780 = vmatpush3.bf16.msra.mxu1 %v779_v57 }
  0x10   : > { %s273_s29 = scalar_lea.vmem %s1008_s0, %s787_s26  ;;  %781 = vmatprep.subr.bf16.mxu1 %v826_v24  ;;  %s278_s21 = scalar_lea.vmem %s1015_s7, %s787_s26 }
  0x11   : > { %v886_v0 = vld [vmem:[%s273_s29] sm:$0xff]  ;;  %v888_v1 = vld [vmem:[%s273_s29 + $0x10] sm:$0xff]  ;;  %v890_v2 = vld [vmem:[%s273_s29 + $0x8] sm:$0xff] }
  0x12   : > { %v285_v3 = vsel %vm284_vm0, %v886_v0, 0.0  ;;  %v291_v4 = vsel %vm284_vm0, %v888_v1, 0.0  ;;  %v288_v5 = vsel %vm284_vm0, %v890_v2, 0.0 }
  0x13   : > { %286 = vadd.xlane.f32.xlu0 %v285_v3  ;;  %292 = vadd.xlane.f32.xlu1 %v291_v4  ;;  %v699_v3 = vld [vmem:[%s1012_s4] ss:$0 sm:$0xff] }
  0x14   : > { %783 = vmatpush3.bf16.msra.mxu1 %v782_v60 }
  0x15   : > { %784 = vmatprep.subr.bf16.mxu1 %v826_v24 }
  0x17   : > { %289 = vadd.xlane.f32.xlu0 %v288_v5 }
  0x18   : > { %786 = vmatpush3.bf16.msra.mxu1 %v785_v63 }
  0xa0   : > { %v287_v6 = vpop.xlane.xlu0 %286  ;;  %v293_v7 = vpop.xlane.xlu1 %292 }
  0xa1   : > { %v295_v8 = vmul.f32 0.03125, %v287_v6  ;;  %v297_v9 = vmul.f32 0.03125, %v293_v7 }
  0xa3   : > { %v298_v10 = vsub.f32 %v886_v0, %v295_v8  ;;  %v300_v11 = vsub.f32 %v888_v1, %v297_v9 }
  0xa4   : > { %v290_v12 = vpop.xlane.xlu0 %289 }
  0xa5   : > { %v296_v13 = vmul.f32 0.03125, %v290_v12  ;;  %v301_v14 = vmul.f32 %v298_v10, %v298_v10  ;;  %v303_v15 = vmul.f32 %v300_v11, %v300_v11 }
  0xa7   : > { %v299_v16 = vsub.f32 %v890_v2, %v296_v13  ;;  %v304_v17 = vsel %vm284_vm0, %v301_v14, 0.0  ;;  %v310_v18 = vsel %vm284_vm0, %v303_v15, 0.0 }
  0xa8   : > { %305 = vadd.xlane.f32.xlu1 %v304_v17 }
  0xa9   : > { %v302_v19 = vmul.f32 %v299_v16, %v299_v16 }
  0xab   : > { %v307_v20 = vsel %vm284_vm0, %v302_v19, 0.0 }
  0xac   : > { %311 = vadd.xlane.f32.xlu1 %v310_v18  ;;  %308 = vadd.xlane.f32.xlu0 %v307_v20 }
 0x135   : > { %v306_v29 = vpop.xlane.xlu1 %305 }
 0x136   : > { %v313_v30 = vmul.f32 0.03125, %v306_v29 }
 0x138   : > { %v316_v31 = vadd.f32 1e-05, %v313_v30 }
 0x139   : > { %v312_v32 = vpop.xlane.xlu1 %311  ;;  %v309_v33 = vpop.xlane.xlu0 %308 }
 0x13a   : > { %800 = vrsqrt.f32 %v316_v31  ;;  %v315_v34 = vmul.f32 0.03125, %v312_v32  ;;  %v314_v35 = vmul.f32 0.03125, %v309_v33 }
 0x13c   : > { %v318_v36 = vadd.f32 1e-05, %v315_v34  ;;  %v317_v37 = vadd.f32 1e-05, %v314_v35 }
 0x13e   : > { %802 = vrsqrt.f32 %v318_v36 }
 0x13f   : > { %804 = vrsqrt.f32 %v317_v37 }
 0x144   : > { %v801_v38 = vpop.eup %800 }
 0x145   : > { %v322_v40 = vmul.f32 %v801_v38, %v298_v10 }
 0x147   : > { %v331_v42 = vmul.f32 %v697_v39, %v322_v40 }
 0x148   : > { %v803_v43 = vpop.eup %802 }
 0x149   : > { %v805_v44 = vpop.eup %804  ;;  %v340_v45 = vadd.f32 %v698_v41, %v331_v42  ;;  %v324_v47 = vmul.f32 %v803_v43, %v300_v11 }
 0x14a   : > { %v323_v46 = vmul.f32 %v805_v44, %v299_v16 }
 0x14b   : > { %736 = vmatmul.mubr.msk.f32.vlgmr.msra.gmra.mrb[0].mxu0 %vm284_vm0, %v340_v45  ;;  %v333_v50 = vmul.f32 %v697_v39, %v324_v47 }
 0x14c   : > { %738 = vmatprep.mubr.msk.f32.mxu0 %vm827_vm1, %v828_v27  ;;  %v332_v48 = vmul.f32 %v697_v39, %v323_v46 }
 0x14d   : > { %v342_v51 = vadd.f32 %v698_v41, %v333_v50 }
 0x14e   : > { %v341_v49 = vadd.f32 %v698_v41, %v332_v48 }
 0x150   : > { %739 = vmatmul.mubr.msk.f32.gmra.mrb[2].mxu0 %vm284_vm0, %v341_v49 }
 0x151   : > { %741 = vmatprep.mubr.msk.f32.mxu0 %vm827_vm1, %v828_v27 }
 0x154   : > { %742 = vmatmul.mubr.msk.f32.gmra.mrb[4].mxu0 %vm284_vm0, %v342_v51 }
 0x21e   : > { %v429_v4 = vpop.f32.mrb[0].mxu0 }
 0x21f   : > { %v960_v5 = vadd.f32 %v699_v3, %v429_v4  ;;  %v737_v6 = vpop.f32.mrb[1].mxu0 }
 0x221   : > { %v963_v7 = vmul.f32 0.70710677, %v960_v5 }
 0x223   : > { %v455_v8 = vand.u32 2147483647, %v963_v7  ;;  %v434_v9 = vpop.f32.mrb[2].mxu0  ;;  %vm449_vm2 = vcmp.ge.f32.partialorder %v963_v7, 0.0 }
 0x224   : > { %v966_v10 = vadd.f32 %v699_v3, %v434_v9  ;;  %v740_v11 = vpop.f32.mrb[3].mxu0 }
 0x225   : > { %v458_v12 = vmul.f32 0.3275911, %v455_v8  ;;  %v497_v24 = vsub.f32 0.0, %v455_v8 }
 0x226   : > { %v969_v13 = vmul.f32 0.70710677, %v966_v10 }
 0x227   : > { %v461_v14 = vadd.f32 1.0, %v458_v12  ;;  %v439_v15 = vpop.f32.mrb[4].mxu0  ;;  %v500_v28 = vmul.f32 %v497_v24, %v455_v8 }
 0x228   : > { %v456_v16 = vand.u32 2147483647, %v969_v13  ;;  %v972_v17 = vadd.f32 %v699_v3, %v439_v15  ;;  %v743_v18 = vpop.f32.mrb[5].mxu0  ;;  %v829_v3 = vmov -1.0   ;;  %vm450_vm3 = vcmp.ge.f32.partialorder %v969_v13, 0.0 }
 0x229   : > { %806 = vrcp.f32 %v461_v14  ;;  %v503_v32 = vmul.f32 1.442695, %v500_v28  ;;  %v452_v4 = vsel %vm449_vm2, 1.0, %v829_v3  ;;  %v443_v15 = vmul.f32 0.5, %v960_v5 }
 0x22a   : > { %v459_v19 = vmul.f32 0.3275911, %v456_v16  ;;  %v975_v20 = vmul.f32 0.70710677, %v972_v17  ;;  %v498_v30 = vsub.f32 0.0, %v456_v16 }
 0x22c   : > { %v462_v21 = vadd.f32 1.0, %v459_v19  ;;  %v457_v22 = vand.u32 2147483647, %v975_v20  ;;  %v501_v35 = vmul.f32 %v498_v30, %v456_v16  ;;  %vm451_vm5 = vcmp.ge.f32.partialorder %v975_v20, 0.0 }
 0x22d   : > { %v454_v5 = vsel %vm451_vm5, 1.0, %v829_v3  ;;  %v445_v30 = vmul.f32 0.5, %v972_v17 }
 0x22e   : > { %808 = vrcp.f32 %v462_v21  ;;  %v460_v23 = vmul.f32 0.3275911, %v457_v22  ;;  %v499_v36 = vsub.f32 0.0, %v457_v22  ;;  %v505_v42 = vmul.f32 1.442695, %v501_v35 }
 0x230   : > { %v463_v25 = vadd.f32 1.0, %v460_v23  ;;  %v502_v43 = vmul.f32 %v499_v36, %v457_v22  ;;  %v453_v22 = vsel %vm450_vm3, 1.0, %v829_v3 }
 0x232   : > { %810 = vrcp.f32 %v463_v25  ;;  %v507_v50 = vmul.f32 1.442695, %v502_v43  ;;  %v444_v25 = vmul.f32 0.5, %v966_v10  ;;  %v703_v10 = vld [vmem:[%s1014_s6] ss:$0 sm:$0xff] }
 0x233   : > { %v807_v26 = vpop.eup %806  ;;  %812 = vpow2.f32 %v503_v32 }
 0x234   : > { %v470_v29 = vmul.f32 1.0614054, %v807_v26  ;;  %814 = vpow2.f32 %v505_v42 }
 0x235   : > { %816 = vpow2.f32 %v507_v50 }
 0x236   : > { %v473_v31 = vadd.f32 -1.4531521, %v470_v29 }
 0x238   : > { %v809_v33 = vpop.eup %808  ;;  %v476_v34 = vmul.f32 %v807_v26, %v473_v31 }
 0x239   : > { %v471_v37 = vmul.f32 1.0614054, %v809_v33 }
 0x23a   : > { %v479_v38 = vadd.f32 1.4214138, %v476_v34 }
 0x23b   : > { %v474_v39 = vadd.f32 -1.4531521, %v471_v37 }
 0x23c   : > { %v811_v40 = vpop.eup %810  ;;  %v482_v41 = vmul.f32 %v807_v26, %v479_v38 }
 0x23d   : > { %v477_v44 = vmul.f32 %v809_v33, %v474_v39  ;;  %v472_v45 = vmul.f32 1.0614054, %v811_v40  ;;  %v813_v57 = vpop.eup %812 }
 0x23e   : > { %v485_v46 = vadd.f32 -0.28449672, %v482_v41  ;;  %v815_v9 = vpop.eup %814 }
 0x23f   : > { %v480_v47 = vadd.f32 1.4214138, %v477_v44  ;;  %v475_v48 = vadd.f32 -1.4531521, %v472_v45  ;;  %v817_v7 = vpop.eup %816 }
 0x240   : > { %v488_v49 = vmul.f32 %v807_v26, %v485_v46 }
 0x241   : > { %v483_v51 = vmul.f32 %v809_v33, %v480_v47  ;;  %v478_v52 = vmul.f32 %v811_v40, %v475_v48 }
 0x242   : > { %v491_v53 = vadd.f32 0.2548296, %v488_v49 }
 0x243   : > { %v486_v54 = vadd.f32 -0.28449672, %v483_v51  ;;  %v481_v55 = vadd.f32 1.4214138, %v478_v52 }
 0x244   : > { %v494_v56 = vmul.f32 %v807_v26, %v491_v53 }
 0x245   : > { %v489_v58 = vmul.f32 %v809_v33, %v486_v54  ;;  %v484_v59 = vmul.f32 %v811_v40, %v481_v55 }
 0x246   : > { %v509_v60 = vmul.f32 %v813_v57, %v494_v56 }
 0x247   : > { %v492_v61 = vadd.f32 0.2548296, %v489_v58  ;;  %v487_v62 = vadd.f32 -0.28449672, %v484_v59 }
 0x248   : > { %v512_v63 = vsub.f32 1.0, %v509_v60 }
 0x249   : > { %v495_v6 = vmul.f32 %v809_v33, %v492_v61  ;;  %v490_v8 = vmul.f32 %v811_v40, %v487_v62 }
 0x24a   : > { %v515_v11 = vmul.f32 %v512_v63, %v452_v4 }
 0x24b   : > { %v510_v12 = vmul.f32 %v815_v9, %v495_v6  ;;  %v493_v14 = vadd.f32 0.2548296, %v490_v8 }
 0x24c   : > { %v518_v16 = vadd.f32 1.0, %v515_v11 }
 0x24d   : > { %v513_v18 = vsub.f32 1.0, %v510_v12  ;;  %v496_v19 = vmul.f32 %v811_v40, %v493_v14 }
 0x24e   : > { %v521_v21 = vmul.f32 %v518_v16, %v443_v15 }
 0x24f   : > { %v516_v23 = vmul.f32 %v513_v18, %v453_v22  ;;  %v511_v24 = vmul.f32 %v817_v7, %v496_v19 }
 0x250   : > { %761 = vmatmul.mubr.msk.f32.vlgmr.msra.gmra.mrb[0].mxu1 %vm539_vm4, %v521_v21 }
 0x251   : > { %v519_v13 = vadd.f32 1.0, %v516_v23  ;;  %v514_v26 = vsub.f32 1.0, %v511_v24  ;;  %763 = vmatprep.mubr.msk.f32.mxu1 %vm827_vm1, %v828_v27 }
 0x253   : > { %v522_v28 = vmul.f32 %v519_v13, %v444_v25  ;;  %v517_v29 = vmul.f32 %v514_v26, %v454_v5 }
 0x255   : > { %v520_v31 = vadd.f32 1.0, %v517_v29  ;;  %764 = vmatmul.mubr.msk.f32.gmra.mrb[2].mxu1 %vm539_vm4, %v522_v28 }
 0x256   : > { %766 = vmatprep.mubr.msk.f32.mxu1 %vm827_vm1, %v828_v27 }
 0x257   : > { %v523_v20 = vmul.f32 %v520_v31, %v445_v30 }
 0x259   : > { %767 = vmatmul.mubr.msk.f32.gmra.mrb[4].mxu1 %vm539_vm4, %v523_v20 }
 0x323   : > { %v615_v32 = vpop.f32.mrb[0].mxu1 }
 0x324   : > { %v616_v33 = vadd.f32 %v703_v10, %v615_v32  ;;  %v762_v34 = vpop.f32.mrb[1].mxu1 }
 0x326   : > { %v629_v17 = vadd.f32 %v616_v33, %v886_v0 }
 0x328   : > { %632 = vst.msk [vmem:[%s278_s21] sm:$0xff] %vm284_vm0, %v629_v17  ;;  %v620_v27 = vpop.f32.mrb[2].mxu1 }
 0x329   : > { %v621_v35 = vadd.f32 %v703_v10, %v620_v27  ;;  %v765_v36 = vpop.f32.mrb[3].mxu1 }
 0x32b   : > { %v630_v37 = vadd.f32 %v621_v35, %v890_v2 }
 0x32c   : > { %v625_v38 = vpop.f32.mrb[4].mxu1 }
 0x32d   : > { %633 = vst.msk [vmem:[%s278_s21 + $0x8] sm:$0xff] %vm284_vm0, %v630_v37  ;;  %v626_v39 = vadd.f32 %v703_v10, %v625_v38  ;;  %v768_v40 = vpop.f32.mrb[5].mxu1 }
 0x32f   : > { %v631_v41 = vadd.f32 %v626_v39, %v888_v1 }
 0x331   : > { %634 = vst.msk [vmem:[%s278_s21 + $0x10] sm:$0xff] %vm284_vm0, %v631_v41 }
 0x332 PF: > { %s17_s24 = sadd.s32 1, %s824_s24  }
 0x333   : > { %p14_p4 = scmp.ge.s32.totalorder %s17_s24, 4  }
 0x335   :  { %16 = sbr.rel (!%p14_p4) target bundleno = 1 (0x1), region = 78 }

// kernel: vit_forward.10
= control target key start
LH: loop header
LB: loop body
LE: loop exit
PB: predicated region body
PF: predicated region fallthrough
CT: control target
= control target key end

     0   :  { %s3624_s27 = smov 0   ;;  %s4229_s0 = inlined_call_operand.vmem [shape: f32[2,24,32], index: 0, kind: input, shape index: {}]   ;;  %s4230_s1 = inlined_call_operand.vmem [shape: f32[1,32], index: 1, kind: input, shape index: {}]   ;;  %s4231_s2 = inlined_call_operand.vmem [shape: f32[1,32], index: 2, kind: input, shape index: {}]   ;;  %s4232_s3 = inlined_call_operand.vmem [shape: f32[4,32,8], index: 3, kind: input, shape index: {}]   ;;  %s4233_s4 = inlined_call_operand.vmem [shape: f32[4,32,8], index: 4, kind: input, shape index: {}]   ;;  %s4234_s5 = inlined_call_operand.vmem [shape: f32[4,32,8], index: 5, kind: input, shape index: {}]   ;;  %s4235_s6 = inlined_call_operand.vmem [shape: f32[4,8,32], index: 6, kind: input, shape index: {}]   ;;  %s4236_s7 = inlined_call_operand.vmem [shape: f32[1,32], index: 7, kind: input, shape index: {}]   ;;  %s4237_s8 = inlined_call_operand.vmem [shape: f32[2,24,32], index: 8, kind: output, shape index: {}]  }
   0x1 LB: > { %s2746_s28 = sadd.s32 4294967295, %s3573_s27   ;;  %p2750_p0 = scmp.ge.s32.totalorder %s3573_s27, 1  ;;  %s3573_s27 = sphi %s3624_s27, %s18_s27  }
   0x2   : > { %p262_p1 = scmp.lt.s32.totalorder %s3573_s27, 3 }
   0x4   : > { %p263_p2 = pnand %p2750_p0, %p262_p1 }
   0x5   : > { %p296_p3 = scmp.lt.s32.totalorder (!%p263_p2), %s2746_s28, 1  ;;  %vm311_vm0 = vcmask (!%p263_p2), 261120   ;;  %v374_v21 = vld [vmem:[%s4232_s3] sm:$0xff] (!%p263_p2)  ;;  %v375_v22 = vld [vmem:[%s4232_s3 + $0x8] sm:$0xff] (!%p263_p2)  ;;  %v3575_v26 = vmov (!%p263_p2), 0.0|0.0   ;;  %v376_v28 = vld [vmem:[%s4232_s3 + $0x10] sm:$0xff] (!%p263_p2) }
   0x6   : > { %266 = sbr.rel (%p263_p2) target bundleno = 4250 (0x109a), region = 52  ;;  %v467_v23 = vld [vmem:[%s4233_s4] sm:$0xff] (!%p263_p2)  ;;  %v3398_v24 = vpack.c.bf16 (!%p263_p2), %v375_v22, %v374_v21  ;;  %v468_v25 = vld [vmem:[%s4233_s4 + $0x8] sm:$0xff] (!%p263_p2)  ;;  %3397 = vmatprep.subr.bf16.mxu0 (!%p263_p2), %v3575_v26  ;;  %3403 = vmatprep.subr.bf16.mxu1 (!%p263_p2), %v3575_v26  ;;  %v377_v29 = vld [vmem:[%s4232_s3 + $0x18] sm:$0xff] (!%p263_p2)  ;;  %vm3576_vm1 = vmmov (!%p263_p2), 0   ;;  %v3577_v34 = vmov (!%p263_p2), 0.0  }
   0x7   : > { %v3404_v27 = vpack.c.bf16 (!%p263_p2), %v468_v25, %v467_v23  ;;  %v469_v30 = vld [vmem:[%s4233_s4 + $0x10] sm:$0xff] (!%p263_p2)  ;;  %v3401_v31 = vpack.c.bf16 (!%p263_p2), %v377_v29, %v376_v28  ;;  %v470_v32 = vld [vmem:[%s4233_s4 + $0x18] sm:$0xff] (!%p263_p2)  ;;  %3037 = vmatprep.mubr.msk.f32.mxu0 (!%p263_p2), %vm3576_vm1, %v3577_v34  ;;  %3054 = vmatprep.mubr.msk.f32.mxu1 (!%p263_p2), %vm3576_vm1, %v3577_v34  ;;  %v2753_v45 = vld [vmem:[%s4230_s1] ss:$0 sm:$0xff] (!%p263_p2)  ;;  %vm635_vm2 = vcmask (!%p263_p2), 64512   ;;  %vm740_vm5 = vcmask (!%p263_p2), 195584  }
   0x8   : > { %3399 = vmatpush3.bf16.msra.mxu0 (!%p263_p2), %v3398_v24  ;;  %v3407_v33 = vpack.c.bf16 (!%p263_p2), %v470_v32, %v469_v30  ;;  %v2754_v47 = vld [vmem:[%s4231_s2] ss:$0 sm:$0xff] (!%p263_p2)  ;;  %v552_v49 = vld [vmem:[%s4234_s5 + $0x8] sm:$0xff] (!%p263_p2)  ;;  %v553_v57 = vld [vmem:[%s4234_s5 + $0x10] sm:$0xff] (!%p263_p2) }
   0x9   : > { %3405 = vmatpush3.bf16.msra.mxu1 (!%p263_p2), %v3404_v27  ;;  %3400 = vmatprep.subr.bf16.mxu0 (!%p263_p2), %v3575_v26  ;;  %v551_v48 = vld [vmem:[%s4234_s5] sm:$0xff] (!%p263_p2)  ;;  %v554_v58 = vld [vmem:[%s4234_s5 + $0x18] sm:$0xff] (!%p263_p2)  ;;  %vm3754_vm3 = vmpackc.low (!%p263_p2), %vm635_vm2, %vm635_vm2 }
   0xa   : > { %3406 = vmatprep.subr.bf16.mxu1 (!%p263_p2), %v3575_v26  ;;  %v3410_v54 = vpack.c.bf16 (!%p263_p2), %v552_v49, %v551_v48  ;;  %v3413_v62 = vpack.c.bf16 (!%p263_p2), %v554_v58, %v553_v57  ;;  %v2775_v22 = vld [vmem:[%s4232_s3 + $0x30] sm:$0xff] (!%p263_p2)  ;;  %v2776_v23 = vld [vmem:[%s4232_s3 + $0x38] sm:$0xff] (!%p263_p2)  ;;  %v2787_v28 = vld [vmem:[%s4234_s5 + $0x20] sm:$0xff] (!%p263_p2) }
   0xb   : > { %v3426_v25 = vpack.c.bf16 (!%p263_p2), %v2776_v23, %v2775_v22  ;;  %v2788_v29 = vld [vmem:[%s4234_s5 + $0x28] sm:$0xff] (!%p263_p2)  ;;  %v2790_v32 = vld [vmem:[%s4234_s5 + $0x38] sm:$0xff] (!%p263_p2) }
   0xc   : > { %3402 = vmatpush3.bf16.msra.mxu0 (!%p263_p2), %v3401_v31  ;;  %v3435_v30 = vpack.c.bf16 (!%p263_p2), %v2788_v29, %v2787_v28  ;;  %v2789_v31 = vld [vmem:[%s4234_s5 + $0x30] sm:$0xff] (!%p263_p2) }
   0xd   : > { %s4241_s28 = smov (!%p296_p3, %s2746_s28), 1  ;;  %3408 = vmatpush3.bf16.msra.mxu1 %v3407_v33  ;;  %3409 = vmatprep.subr.bf16.mxu0 %v3575_v26  ;;  %v3438_v33 = vpack.c.bf16 %v2790_v32, %v2789_v31  ;;  %v2782_v31 = vld [vmem:[%s4233_s4 + $0x30] sm:$0xff]  ;;  %v2783_v32 = vld [vmem:[%s4233_s4 + $0x38] sm:$0xff] }
   0xe   : > { %s3497_s29 = smul.u32 24, %s4241_s28  ;;  %3415 = vmatprep.subr.bf16.mxu1 %v3575_v26 }
  0x10   : > { %s3640_s10 = scalar_lea.vmem %s4229_s0, %s3497_s29  ;;  %s305_s15 = scalar_lea.vmem %s4237_s8, %s3497_s29 }
  0x11   : > { %v306_v0 = vld [vmem:[%s3640_s10] sm:$0xff]  ;;  %v308_v1 = vld [vmem:[%s3640_s10 + $0x10] sm:$0xff]  ;;  %v307_v2 = vld [vmem:[%s3640_s10 + $0x8] sm:$0xff] }
  0x12   : > { %v312_v3 = vsel %vm311_vm0, %v306_v0, 0.0  ;;  %v318_v4 = vsel %vm311_vm0, %v308_v1, 0.0  ;;  %v315_v5 = vsel %vm311_vm0, %v307_v2, 0.0 }
  0x13   : > { %313 = vadd.xlane.f32.xlu0 %v312_v3  ;;  %319 = vadd.xlane.f32.xlu1 %v318_v4 }
  0x17   : > { %316 = vadd.xlane.f32.xlu0 %v315_v5 }
  0xa0   : > { %v314_v6 = vpop.xlane.xlu0 %313  ;;  %v320_v7 = vpop.xlane.xlu1 %319 }
  0xa1   : > { %v322_v8 = vmul.f32 0.03125, %v314_v6  ;;  %v324_v9 = vmul.f32 0.03125, %v320_v7 }
  0xa3   : > { %v325_v10 = vsub.f32 %v306_v0, %v322_v8  ;;  %v3648_v11 = vsub.f32 %v308_v1, %v324_v9 }
  0xa4   : > { %v317_v12 = vpop.xlane.xlu0 %316 }
  0xa5   : > { %v323_v13 = vmul.f32 0.03125, %v317_v12  ;;  %v328_v14 = vmul.f32 %v325_v10, %v325_v10  ;;  %v330_v15 = vmul.f32 %v3648_v11, %v3648_v11 }
  0xa7   : > { %v326_v16 = vsub.f32 %v307_v2, %v323_v13  ;;  %v331_v17 = vsel %vm311_vm0, %v328_v14, 0.0  ;;  %v337_v18 = vsel %vm311_vm0, %v330_v15, 0.0 }
  0xa8   : > { %332 = vadd.xlane.f32.xlu1 %v331_v17  ;;  %v2774_v17 = vld [vmem:[%s4232_s3 + $0x28] sm:$0xff] }
  0xa9   : > { %v329_v19 = vmul.f32 %v326_v16, %v326_v16 }
  0xab   : > { %v334_v20 = vsel %vm311_vm0, %v329_v19, 0.0 }
  0xac   : > { %338 = vadd.xlane.f32.xlu1 %v337_v18  ;;  %335 = vadd.xlane.f32.xlu0 %v334_v20 }
 0x135   : > { %v333_v35 = vpop.xlane.xlu1 %332 }
 0x136   : > { %v340_v36 = vmul.f32 0.03125, %v333_v35  ;;  %v370_v35 = vlaneseq }
 0x138   : > { %v343_v37 = vadd.f32 1e-05, %v340_v36  ;;  %v371_v36 = vand.u32 127, %v370_v35  ;;  %v3432_v35 = vpack.c.bf16 %v2783_v32, %v2782_v31 }
 0x139   : > { %v339_v38 = vpop.xlane.xlu1 %338  ;;  %v336_v39 = vpop.xlane.xlu0 %335 }
 0x13a   : > { %3510 = vrsqrt.f32 %v343_v37  ;;  %v342_v40 = vmul.f32 0.03125, %v339_v38  ;;  %v341_v41 = vmul.f32 0.03125, %v336_v39  ;;  %vm372_vm4 = vcmp.lt.s32.totalorder %v371_v36, 17 }
 0x13b   : > { %v3578_v38 = vmov -1e+30  }
 0x13c   : > { %v345_v42 = vadd.f32 1e-05, %v342_v40  ;;  %v344_v43 = vadd.f32 1e-05, %v341_v41  ;;  %v3826_v39 = vsel %vm372_vm4, 0.0, %v3578_v38 }
 0x13e   : > { %3512 = vrsqrt.f32 %v345_v42 }
 0x13f   : > { %3514 = vrsqrt.f32 %v344_v43 }
 0x144   : > { %v3511_v44 = vpop.eup %3510 }
 0x145   : > { %v349_v46 = vmul.f32 %v3511_v44, %v325_v10 }
 0x147   : > { %v358_v50 = vmul.f32 %v2753_v45, %v349_v46 }
 0x148   : > { %v3513_v51 = vpop.eup %3512 }
 0x149   : > { %v3515_v52 = vpop.eup %3514  ;;  %v3701_v53 = vadd.f32 %v2754_v47, %v358_v50  ;;  %v351_v55 = vmul.f32 %v3513_v51, %v3648_v11 }
 0x14a   : > { %v350_v56 = vmul.f32 %v3515_v52, %v326_v16  ;;  %v2773_v16 = vld [vmem:[%s4232_s3 + $0x20] sm:$0xff] }
 0x14b   : > { %3038 = vmatmul.mubr.msk.f32.vlgmr.msra.gmra.mrb[0].mxu0 %vm311_vm0, %v3701_v53  ;;  %3055 = vmatmul.mubr.msk.f32.vlgmr.msra.gmra.mrb[0].mxu1 %vm311_vm0, %v3701_v53  ;;  %v360_v60 = vmul.f32 %v2753_v45, %v351_v55  ;;  %v3423_v19 = vpack.c.bf16 %v2774_v17, %v2773_v16 }
 0x14c   : > { %v359_v59 = vmul.f32 %v2753_v45, %v350_v56  ;;  %3040 = vmatprep.mubr.msk.f32.mxu0 %vm3576_vm1, %v3577_v34  ;;  %3057 = vmatprep.mubr.msk.f32.mxu1 %vm3576_vm1, %v3577_v34 }
 0x14d   : > { %3411 = vmatpush3.bf16.msra.mxu0 %v3410_v54  ;;  %v3729_v63 = vadd.f32 %v2754_v47, %v360_v60 }
 0x14e   : > { %v3718_v61 = vadd.f32 %v2754_v47, %v359_v59  ;;  %3412 = vmatprep.subr.bf16.mxu0 %v3575_v26 }
 0x150   : > { %3041 = vmatmul.mubr.msk.f32.gmra.mrb[2].mxu0 %vm311_vm0, %v3718_v61  ;;  %3058 = vmatmul.mubr.msk.f32.gmra.mrb[2].mxu1 %vm311_vm0, %v3718_v61 }
 0x151   : > { %3043 = vmatprep.mubr.msk.f32.mxu0 %vm3576_vm1, %v3577_v34  ;;  %3060 = vmatprep.mubr.msk.f32.mxu1 %vm3576_vm1, %v3577_v34 }
 0x152   : > { %3414 = vmatpush3.bf16.msra.mxu0 %v3413_v62 }
 0x153   : > { %3419 = vmatprep.subr.bf16.mxu0 %v3575_v26 }
 0x154   : > { %3044 = vmatmul.mubr.msk.f32.gmra.mrb[4].mxu0 %vm311_vm0, %v3729_v63  ;;  %3061 = vmatmul.mubr.msk.f32.gmra.mrb[4].mxu1 %vm311_vm0, %v3729_v63 }
 0x155   : > { %3071 = vmatprep.mubr.msk.f32.mxu0 %vm3576_vm1, %v3577_v34  ;;  %3086 = vmatprep.mubr.msk.f32.mxu1 %vm3576_vm1, %v3577_v34 }
 0x158   : > { %3072 = vmatmul.mubr.msk.f32.vlgmr.msra.gmra.mrb[6].mxu0 %vm311_vm0, %v3701_v53 }
 0x159   : > { %3074 = vmatprep.mubr.msk.f32.mxu0 %vm3576_vm1, %v3577_v34 }
 0x15c   : > { %3075 = vmatmul.mubr.msk.f32.gmra.mrb[8].mxu0 %vm311_vm0, %v3718_v61 }
 0x15d   : > { %3077 = vmatprep.mubr.msk.f32.mxu0 %vm3576_vm1, %v3577_v34 }
 0x160   : > { %3078 = vmatmul.mubr.msk.f32.gmra.mrb[10].mxu0 %vm311_vm0, %v3729_v63 }
 0x161   : > { %3101 = vmatprep.mubr.msk.f32.mxu0 %vm3576_vm1, %v3577_v34 }
 0x21e   : > { %v453_v0 = vpop.f32.mrb[0].mxu0  ;;  %v537_v1 = vpop.f32.mrb[0].mxu1 }
 0x21f   : > { %v3039_v2 = vpop.f32.mrb[1].mxu0  ;;  %v3056_v3 = vpop.f32.mrb[1].mxu1 }
 0x223   : > { %v458_v4 = vpop.f32.mrb[2].mxu0  ;;  %v542_v5 = vpop.f32.mrb[2].mxu1 }
 0x224   : > { %v3416_v7 = vpack.c.bf16 %v542_v5, %v537_v1  ;;  %v3042_v8 = vpop.f32.mrb[3].mxu0  ;;  %v3059_v9 = vpop.f32.mrb[3].mxu1 }
 0x226   : > { %3418 = vmatpush3.bf16.xpose.msk.msra.mxu1 %vm3754_vm3, %v3416_v7 }
 0x227   : > { %v463_v10 = vpop.f32.mrb[4].mxu0  ;;  %v547_v11 = vpop.f32.mrb[4].mxu1  ;;  %3084 = vmatprep.subr.mxu1 %v3577_v34 }
 0x228   : > { %v3045_v12 = vpop.f32.mrb[5].mxu0  ;;  %v3062_v13 = vpop.f32.mrb[5].mxu1 }
 0x22b   : > { %v621_v14 = vpop.f32.mrb[6].mxu0 }
 0x22c   : > { %v3073_v15 = vpop.f32.mrb[7].mxu0 }
 0x22e   : > { %3085 = vmatpush3.xpose.msk.msra.mxu1 %vm635_vm2, %v547_v11 }
 0x22f   : > { %v626_v18 = vpop.f32.mrb[8].mxu0  ;;  %3422 = vmatprep.subr.bf16.mxu1 %v3575_v26 }
 0x230   : > { %v3420_v20 = vpack.c.bf16 %v626_v18, %v621_v14  ;;  %v3076_v21 = vpop.f32.mrb[9].mxu0 }
 0x231   : > { %3087 = vmatmul.mubr.msk.f32.vlgmr.msra.gmra.mrb[6].mxu1 %vm635_vm2, %v453_v0 }
 0x232   : > { %3421 = vmatpush3.bf16.msra.mxu0 %v3420_v20  ;;  %3089 = vmatprep.mubr.msk.f32.mxu1 %vm3576_vm1, %v3577_v34 }
 0x233   : > { %v631_v24 = vpop.f32.mrb[10].mxu0  ;;  %3099 = vmatprep.subr.mxu0 %v3577_v34  ;;  %3424 = vmatpush3.bf16.msra.mxu1 %v3423_v19 }
 0x234   : > { %v3079_v27 = vpop.f32.mrb[11].mxu0  ;;  %3425 = vmatprep.subr.bf16.mxu1 %v3575_v26 }
 0x235   : > { %3090 = vmatmul.mubr.msk.f32.gmra.mrb[8].mxu1 %vm635_vm2, %v458_v4  ;;  %v2781_v27 = vld [vmem:[%s4233_s4 + $0x28] sm:$0xff] }
 0x236   : > { %3100 = vmatpush3.msra.mxu0 %v631_v24  ;;  %3092 = vmatprep.mubr.msk.f32.mxu1 %vm3576_vm1, %v3577_v34 }
 0x237   : > { %3427 = vmatpush3.bf16.msra.mxu1 %v3426_v25  ;;  %3428 = vmatprep.subr.bf16.mxu0 %v3575_v26  ;;  %v2780_v25 = vld [vmem:[%s4233_s4 + $0x20] sm:$0xff] }
 0x238   : > { %3434 = vmatprep.subr.bf16.mxu1 %v3575_v26  ;;  %v3429_v29 = vpack.c.bf16 %v2781_v27, %v2780_v25 }
 0x239   : > { %3093 = vmatmul.mubr.msk.f32.gmra.mrb[10].mxu1 %vm635_vm2, %v463_v10 }
 0x23a   : > { %3118 = vmatprep.mubr.msk.f32.mxu1 %vm3576_vm1, %v3577_v34 }
 0x23d   : > { %3119 = vmatmul.mubr.msk.f32.vlgmr.msra.gmra.mrb[12].mxu1 %vm311_vm0, %v3701_v53 }
 0x23e   : > { %3121 = vmatprep.mubr.msk.f32.mxu1 %vm3576_vm1, %v3577_v34  ;;  %3436 = vmatpush3.bf16.msra.mxu1 %v3435_v30 }
 0x23f   : > { %3437 = vmatprep.subr.bf16.mxu1 %v3575_v26 }
 0x241   : > { %3122 = vmatmul.mubr.msk.f32.gmra.mrb[14].mxu1 %vm311_vm0, %v3718_v61 }
 0x242   : > { %3124 = vmatprep.mubr.msk.f32.mxu1 %vm3576_vm1, %v3577_v34  ;;  %3439 = vmatpush3.bf16.msra.mxu1 %v3438_v33 }
 0x243   : > { %3444 = vmatprep.subr.bf16.mxu1 %v3575_v26 }
 0x245   : > { %3125 = vmatmul.mubr.msk.f32.gmra.mrb[16].mxu1 %vm311_vm0, %v3729_v63 }
 0x246   : > { %3152 = vmatprep.mubr.msk.f32.mxu1 %vm3576_vm1, %v3577_v34 }
 0x249   : > { %3153 = vmatmul.mubr.msk.f32.vlgmr.msra.gmra.mrb[18].mxu1 %vm311_vm0, %v3701_v53 }
 0x24a   : > { %3155 = vmatprep.mubr.msk.f32.mxu1 %vm3576_vm1, %v3577_v34 }
 0x24d   : > { %3156 = vmatmul.mubr.msk.f32.gmra.mrb[20].mxu1 %vm311_vm0, %v3718_v61 }
 0x24e   : > { %3158 = vmatprep.mubr.msk.f32.mxu1 %vm3576_vm1, %v3577_v34 }
 0x251   : > { %3159 = vmatmul.mubr.msk.f32.gmra.mrb[22].mxu1 %vm311_vm0, %v3729_v63 }
 0x252   : > { %3182 = vmatprep.mubr.msk.f32.mxu1 %vm3576_vm1, %v3577_v34 }
 0x304   : > { %v720_v37 = vpop.f32.mrb[6].mxu1 }
 0x305   : > { %v734_v40 = vmul.f32 0.35355338, %v720_v37  ;;  %v3088_v41 = vpop.f32.mrb[7].mxu1 }
 0x307   : > { %v737_v42 = vadd.f32 %v734_v40, %v3826_v39 }
 0x308   : > { %v725_v43 = vpop.f32.mrb[8].mxu1 }
 0x309   : > { %v735_v44 = vmul.f32 0.35355338, %v725_v43  ;;  %v3091_v45 = vpop.f32.mrb[9].mxu1  ;;  %v741_v46 = vsel %vm740_vm5, %v737_v42, -inf }
 0x30a   : > { %742 = vmax.xlane.f32.xlu0 %v741_v46 }
 0x30b   : > { %v738_v47 = vadd.f32 %v735_v44, %v3826_v39 }
 0x30c   : > { %v730_v48 = vpop.f32.mrb[10].mxu1 }
 0x30d   : > { %v736_v49 = vmul.f32 0.35355338, %v730_v48  ;;  %v3094_v50 = vpop.f32.mrb[11].mxu1  ;;  %v744_v51 = vsel %vm740_vm5, %v738_v47, -inf }
 0x30e   : > { %745 = vmax.xlane.f32.xlu1 %v744_v51 }
 0x30f   : > { %v739_v52 = vadd.f32 %v736_v49, %v3826_v39 }
 0x310   : > { %v3833_v54 = vpop.f32.mrb[12].mxu1 }
 0x311   : > { %v3120_v55 = vpop.f32.mrb[13].mxu1  ;;  %v747_v56 = vsel %vm740_vm5, %v739_v52, -inf }
 0x312   : > { %748 = vmax.xlane.f32.xlu0 %v747_v56 }
 0x314   : > { %v3836_v57 = vpop.f32.mrb[14].mxu1 }
 0x315   : > { %v3123_v58 = vpop.f32.mrb[15].mxu1 }
 0x318   : > { %v3838_v59 = vpop.f32.mrb[16].mxu1 }
 0x319   : > { %v3126_v60 = vpop.f32.mrb[17].mxu1 }
 0x31c   : > { %v1105_v62 = vpop.f32.mrb[18].mxu1 }
 0x31d   : > { %v3154_v0 = vpop.f32.mrb[19].mxu1 }
 0x320   : > { %v1110_v1 = vpop.f32.mrb[20].mxu1 }
 0x321   : > { %v3445_v2 = vpack.c.bf16 %v1110_v1, %v1105_v62  ;;  %v3157_v3 = vpop.f32.mrb[21].mxu1 }
 0x323   : > { %3446 = vmatpush3.bf16.msra.mxu1 %v3445_v2 }
 0x324   : > { %v1115_v4 = vpop.f32.mrb[22].mxu1  ;;  %3180 = vmatprep.subr.mxu1 %v3577_v34 }
 0x325   : > { %v3160_v5 = vpop.f32.mrb[23].mxu1 }
 0x327   : > { %3181 = vmatpush3.msra.mxu1 %v1115_v4 }
 0x328   : > { %3202 = vmatprep.subr.mxu1 %v3577_v34 }
 0x397   : > { %v743_v7 = vpop.xlane.xlu0 %742 }
 0x398   : > { %v750_v8 = vsub.f32 %v737_v42, %v743_v7 }
 0x39a   : > { %v753_v9 = vmul.f32 1.442695, %v750_v8 }
 0x39b   : > { %v746_v10 = vpop.xlane.xlu1 %745 }
 0x39c   : > { %3516 = vpow2.f32 %v753_v9  ;;  %v751_v11 = vsub.f32 %v738_v47, %v746_v10 }
 0x39e   : > { %v755_v12 = vmul.f32 1.442695, %v751_v11 }
 0x39f   : > { %v749_v13 = vpop.xlane.xlu0 %748 }
 0x3a0   : > { %3518 = vpow2.f32 %v755_v12  ;;  %v752_v14 = vsub.f32 %v739_v52, %v749_v13 }
 0x3a2   : > { %v757_v15 = vmul.f32 1.442695, %v752_v14 }
 0x3a4   : > { %3520 = vpow2.f32 %v757_v15 }
 0x3a6   : > { %v3517_v16 = vpop.eup %3516 }
 0x3a7   : > { %v759_v17 = vsel %vm740_vm5, %v3517_v16, 0.0 }
 0x3a8   : > { %760 = vadd.xlane.f32.xlu1 %v759_v17 }
 0x3aa   : > { %v3519_v18 = vpop.eup %3518 }
 0x3ab   : > { %v762_v19 = vsel %vm740_vm5, %v3519_v18, 0.0 }
 0x3ac   : > { %763 = vadd.xlane.f32.xlu0 %v762_v19 }
 0x3ae   : > { %v3521_v20 = vpop.eup %3520 }
 0x3af   : > { %v765_v21 = vsel %vm740_vm5, %v3521_v20, 0.0 }
 0x3b0   : > { %766 = vadd.xlane.f32.xlu1 %v765_v21 }
 0x435   : > { %v761_v22 = vpop.xlane.xlu1 %760 }
 0x436   : > { %3522 = vrcp.f32 %v761_v22 }
 0x439   : > { %v764_v23 = vpop.xlane.xlu0 %763 }
 0x43a   : > { %3524 = vrcp.f32 %v764_v23  ;;  %v2803_v23 = vld [vmem:[%s4235_s6 + $0x8] sm:$0xff] }
 0x43d   : > { %v767_v24 = vpop.xlane.xlu1 %766 }
 0x43e   : > { %3526 = vrcp.f32 %v767_v24 }
 0x440   : > { %v3523_v28 = vpop.eup %3522 }
 0x441   : > { %v771_v30 = vmul.f32 %v3523_v28, %v3517_v16 }
 0x443   : > { %3102 = vmatmul.mubr.msk.f32.vlgmr.msra.gmra.mrb[12].mxu0 %vm740_vm5, %v771_v30  ;;  %v863_v30 = vld [vmem:[%s4235_s6] sm:$0xff] }
 0x444   : > { %v3525_v33 = vpop.eup %3524  ;;  %3104 = vmatprep.mubr.msk.f32.mxu0 %vm3576_vm1, %v3577_v34  ;;  %3430 = vmatpush3.bf16.msra.mxu0 %v3429_v29 }
 0x445   : > { %v772_v36 = vmul.f32 %v3525_v33, %v3519_v18  ;;  %3431 = vmatprep.subr.bf16.mxu0 %v3575_v26 }
 0x447   : > { %3105 = vmatmul.mubr.msk.f32.gmra.mrb[14].mxu0 %vm740_vm5, %v772_v36  ;;  %v2817_v36 = vld [vmem:[%s4233_s4 + $0x40] sm:$0xff] }
 0x448   : > { %v3527_v37 = vpop.eup %3526  ;;  %3107 = vmatprep.mubr.msk.f32.mxu0 %vm3576_vm1, %v3577_v34  ;;  %3433 = vmatpush3.bf16.msra.mxu0 %v3432_v35 }
 0x449   : > { %v773_v38 = vmul.f32 %v3527_v37, %v3521_v20  ;;  %3440 = vmatprep.subr.bf16.mxu0 %v3575_v26  ;;  %v2818_v37 = vld [vmem:[%s4233_s4 + $0x48] sm:$0xff] }
 0x44b   : > { %3108 = vmatmul.mubr.msk.f32.gmra.mrb[16].mxu0 %vm740_vm5, %v773_v38  ;;  %v3454_v38 = vpack.c.bf16 %v2818_v37, %v2817_v36 }
 0x44c   : > { %3135 = vmatprep.mubr.msk.f32.mxu0 %vm3576_vm1, %v3577_v34 }
 0x44f   : > { %3136 = vmatmul.mubr.msk.f32.vlgmr.msra.gmra.mrb[18].mxu0 %vm311_vm0, %v3701_v53 }
 0x450   : > { %3138 = vmatprep.mubr.msk.f32.mxu0 %vm3576_vm1, %v3577_v34 }
 0x453   : > { %3139 = vmatmul.mubr.msk.f32.gmra.mrb[20].mxu0 %vm311_vm0, %v3718_v61 }
 0x454   : > { %3141 = vmatprep.mubr.msk.f32.mxu0 %vm3576_vm1, %v3577_v34 }
 0x457   : > { %3142 = vmatmul.mubr.msk.f32.gmra.mrb[22].mxu0 %vm311_vm0, %v3729_v63 }
 0x458   : > { %3167 = vmatprep.mubr.msk.f32.mxu0 %vm3576_vm1, %v3577_v34 }
 0x516   : > { %v3880_v40 = vpop.f32.mrb[12].mxu0 }
 0x517   : > { %v3103_v41 = vpop.f32.mrb[13].mxu0 }
 0x518   : > { %v2819_v41 = vld [vmem:[%s4233_s4 + $0x50] sm:$0xff] }
 0x51a   : > { %v3882_v42 = vpop.f32.mrb[14].mxu0 }
 0x51b   : > { %v3106_v43 = vpop.f32.mrb[15].mxu0 }
 0x51c   : > { %v2820_v43 = vld [vmem:[%s4233_s4 + $0x58] sm:$0xff] }
 0x51e   : > { %v3884_v44 = vpop.f32.mrb[16].mxu0 }
 0x51f   : > { %v3109_v45 = vpop.f32.mrb[17].mxu0 }
 0x520   : > { %v3457_v45 = vpack.c.bf16 %v2820_v43, %v2819_v41 }
 0x522   : > { %v1020_v46 = vpop.f32.mrb[18].mxu0 }
 0x523   : > { %v3137_v47 = vpop.f32.mrb[19].mxu0 }
 0x524   : > { %v2813_v47 = vld [vmem:[%s4232_s3 + $0x58] sm:$0xff] }
 0x526   : > { %v1025_v48 = vpop.f32.mrb[20].mxu0 }
 0x527   : > { %v3441_v49 = vpack.c.bf16 %v1025_v48, %v1020_v46  ;;  %v3140_v50 = vpop.f32.mrb[21].mxu0  ;;  %v2812_v46 = vld [vmem:[%s4232_s3 + $0x50] sm:$0xff] }
 0x528   : > { %v3451_v50 = vpack.c.bf16 %v2813_v47, %v2812_v46 }
 0x529   : > { %3443 = vmatpush3.bf16.xpose.msk.msra.mxu0 %vm3754_vm3, %v3441_v49 }
 0x52a   : > { %v1030_v51 = vpop.f32.mrb[22].mxu0  ;;  %3165 = vmatprep.subr.mxu0 %v3577_v34 }
 0x52b   : > { %v3143_v52 = vpop.f32.mrb[23].mxu0 }
 0x531   : > { %3166 = vmatpush3.xpose.msk.msra.mxu0 %vm635_vm2, %v1030_v51 }
 0x532   : > { %3191 = vmatprep.subr.mxu0 %v3577_v34 }
 0x534   : > { %3168 = vmatmul.mubr.msk.f32.vlgmr.msra.gmra.mrb[24].mxu0 %vm635_vm2, %v3833_v54 }
 0x535   : > { %3170 = vmatprep.mubr.msk.f32.mxu0 %vm3576_vm1, %v3577_v34  ;;  %3192 = vmatpush3.msra.mxu0 %v2803_v23 }
 0x536   : > { %3447 = vmatprep.subr.bf16.mxu0 %v3575_v26 }
 0x538   : > { %3171 = vmatmul.mubr.msk.f32.gmra.mrb[26].mxu0 %vm635_vm2, %v3836_v57 }
 0x539   : > { %3173 = vmatprep.mubr.msk.f32.mxu0 %vm3576_vm1, %v3577_v34 }
 0x53c   : > { %3174 = vmatmul.mubr.msk.f32.gmra.mrb[28].mxu0 %vm635_vm2, %v3838_v59 }
 0x53d   : > { %3193 = vmatprep.mubr.msk.f32.mxu0 %vm3576_vm1, %v3577_v34 }
 0x607   : > { %v1203_v55 = vpop.f32.mrb[24].mxu0 }
 0x608   : > { %v1217_v56 = vmul.f32 0.35355338, %v1203_v55  ;;  %v3169_v58 = vpop.f32.mrb[25].mxu0  ;;  %v2824_v55 = vld [vmem:[%s4234_s5 + $0x40] sm:$0xff] }
 0x60a   : > { %v1220_v54 = vadd.f32 %v1217_v56, %v3826_v39  ;;  %v2825_v56 = vld [vmem:[%s4234_s5 + $0x48] sm:$0xff] }
 0x60b   : > { %v1208_v60 = vpop.f32.mrb[26].mxu0 }
 0x60c   : > { %v1218_v62 = vmul.f32 0.35355338, %v1208_v60  ;;  %v3172_v0 = vpop.f32.mrb[27].mxu0  ;;  %v1223_v1 = vsel %vm740_vm5, %v1220_v54, -inf  ;;  %v3460_v60 = vpack.c.bf16 %v2825_v56, %v2824_v55 }
 0x60d   : > { %1224 = vmax.xlane.f32.xlu0 %v1223_v1  ;;  %v2827_v0 = vld [vmem:[%s4234_s5 + $0x58] sm:$0xff] }
 0x60e   : > { %v1221_v57 = vadd.f32 %v1218_v62, %v3826_v39  ;;  %v2826_v62 = vld [vmem:[%s4234_s5 + $0x50] sm:$0xff] }
 0x60f   : > { %v1213_v2 = vpop.f32.mrb[28].mxu0 }
 0x610   : > { %v1219_v3 = vmul.f32 0.35355338, %v1213_v2  ;;  %v3175_v4 = vpop.f32.mrb[29].mxu0  ;;  %v1226_v59 = vsel %vm740_vm5, %v1221_v57, -inf  ;;  %v3463_v2 = vpack.c.bf16 %v2827_v0, %v2826_v62 }
 0x611   : > { %1227 = vmax.xlane.f32.xlu1 %v1226_v59 }
 0x612   : > { %v1222_v5 = vadd.f32 %v1219_v3, %v3826_v39 }
 0x614   : > { %v1229_v7 = vsel %vm740_vm5, %v1222_v5, -inf }
 0x615   : > { %1230 = vmax.xlane.f32.xlu0 %v1229_v7 }
 0x69a   : > { %v1225_v8 = vpop.xlane.xlu0 %1224 }
 0x69b   : > { %v1232_v9 = vsub.f32 %v1220_v54, %v1225_v8 }
 0x69d   : > { %v1235_v10 = vmul.f32 1.442695, %v1232_v9 }
 0x69e   : > { %v1228_v11 = vpop.xlane.xlu1 %1227 }
 0x69f   : > { %3528 = vpow2.f32 %v1235_v10  ;;  %v1233_v12 = vsub.f32 %v1221_v57, %v1228_v11 }
 0x6a1   : > { %v1237_v13 = vmul.f32 1.442695, %v1233_v12 }
 0x6a2   : > { %v1231_v14 = vpop.xlane.xlu0 %1230 }
 0x6a3   : > { %3530 = vpow2.f32 %v1237_v13  ;;  %v1234_v15 = vsub.f32 %v1222_v5, %v1231_v14 }
 0x6a5   : > { %v1239_v16 = vmul.f32 1.442695, %v1234_v15 }
 0x6a7   : > { %3532 = vpow2.f32 %v1239_v16 }
 0x6a9   : > { %v3529_v17 = vpop.eup %3528 }
 0x6aa   : > { %v1241_v18 = vsel %vm740_vm5, %v3529_v17, 0.0 }
 0x6ab   : > { %1242 = vadd.xlane.f32.xlu1 %v1241_v18 }
 0x6ad   : > { %v3531_v19 = vpop.eup %3530 }
 0x6ae   : > { %v1244_v20 = vsel %vm740_vm5, %v3531_v19, 0.0 }
 0x6af   : > { %1245 = vadd.xlane.f32.xlu0 %v1244_v20 }
 0x6b1   : > { %v3533_v21 = vpop.eup %3532 }
 0x6b2   : > { %v1247_v22 = vsel %vm740_vm5, %v3533_v21, 0.0 }
 0x6b3   : > { %1248 = vadd.xlane.f32.xlu1 %v1247_v22 }
 0x738   : > { %v1243_v24 = vpop.xlane.xlu1 %1242 }
 0x739   : > { %3534 = vrcp.f32 %v1243_v24 }
 0x73c   : > { %v1246_v25 = vpop.xlane.xlu0 %1245 }
 0x73d   : > { %3536 = vrcp.f32 %v1246_v25 }
 0x740   : > { %v1249_v27 = vpop.xlane.xlu1 %1248 }
 0x741   : > { %3538 = vrcp.f32 %v1249_v27 }
 0x743   : > { %v3535_v28 = vpop.eup %3534 }
 0x744   : > { %v1253_v29 = vmul.f32 %v3535_v28, %v3529_v17 }
 0x746   : > { %3183 = vmatmul.mubr.msk.f32.vlgmr.msra.gmra.mrb[24].mxu1 %vm740_vm5, %v1253_v29 }
 0x747   : > { %v3537_v31 = vpop.eup %3536  ;;  %3185 = vmatprep.mubr.msk.f32.mxu1 %vm3576_vm1, %v3577_v34  ;;  %3203 = vmatpush3.msra.mxu1 %v863_v30 }
 0x748   : > { %v1254_v32 = vmul.f32 %v3537_v31, %v3531_v19  ;;  %3453 = vmatprep.subr.bf16.mxu1 %v3575_v26 }
 0x74a   : > { %3186 = vmatmul.mubr.msk.f32.gmra.mrb[26].mxu1 %vm740_vm5, %v1254_v32 }
 0x74b   : > { %v3539_v33 = vpop.eup %3538  ;;  %3188 = vmatprep.mubr.msk.f32.mxu1 %vm3576_vm1, %v3577_v34 }
 0x74c   : > { %v1255_v35 = vmul.f32 %v3539_v33, %v3533_v21 }
 0x74e   : > { %3189 = vmatmul.mubr.msk.f32.gmra.mrb[28].mxu1 %vm740_vm5, %v1255_v35 }
 0x74f   : > { %3204 = vmatprep.mubr.msk.f32.mxu1 %vm3576_vm1, %v3577_v34 }
 0x752   : > { %3205 = vmatmul.mubr.msk.f32.vlgmr.msra.gmra.mrb[30].mxu1 %vm635_vm2, %v3880_v40  ;;  %v2810_v40 = vld [vmem:[%s4232_s3 + $0x40] sm:$0xff] }
 0x753   : > { %3207 = vmatprep.mubr.msk.f32.mxu1 %vm3576_vm1, %v3577_v34  ;;  %3455 = vmatpush3.bf16.msra.mxu1 %v3454_v38 }
 0x754   : > { %3456 = vmatprep.subr.bf16.mxu1 %v3575_v26 }
 0x756   : > { %3208 = vmatmul.mubr.msk.f32.gmra.mrb[32].mxu1 %vm635_vm2, %v3882_v42  ;;  %v2811_v42 = vld [vmem:[%s4232_s3 + $0x48] sm:$0xff] }
 0x757   : > { %3210 = vmatprep.mubr.msk.f32.mxu1 %vm3576_vm1, %v3577_v34  ;;  %3458 = vmatpush3.bf16.msra.mxu1 %v3457_v45 }
 0x758   : > { %3465 = vmatprep.subr.bf16.mxu1 %v3575_v26 }
 0x75a   : > { %3211 = vmatmul.mubr.msk.f32.gmra.mrb[34].mxu1 %vm635_vm2, %v3884_v44  ;;  %v3448_v44 = vpack.c.bf16 %v2811_v42, %v2810_v40 }
 0x75b   : > { %3238 = vmatprep.mubr.msk.f32.mxu1 %vm3576_vm1, %v3577_v34 }
 0x75e   : > { %3239 = vmatmul.mubr.msk.f32.vlgmr.msra.gmra.mrb[36].mxu1 %vm311_vm0, %v3701_v53 }
 0x75f   : > { %3241 = vmatprep.mubr.msk.f32.mxu1 %vm3576_vm1, %v3577_v34 }
 0x762   : > { %3242 = vmatmul.mubr.msk.f32.gmra.mrb[38].mxu1 %vm311_vm0, %v3718_v61 }
 0x763   : > { %3244 = vmatprep.mubr.msk.f32.mxu1 %vm3576_vm1, %v3577_v34 }
 0x766   : > { %3245 = vmatmul.mubr.msk.f32.gmra.mrb[40].mxu1 %vm311_vm0, %v3729_v63 }
 0x767   : > { %3270 = vmatprep.mubr.msk.f32.mxu1 %vm3576_vm1, %v3577_v34 }
 0x819   : > { %v1331_v48 = vpop.f32.mrb[24].mxu1 }
 0x81a   : > { %v3184_v49 = vpop.f32.mrb[25].mxu1  ;;  %3194 = vmatmul.mubr.msk.f32.vlgmr.msra.gmra.mrb[30].mxu0 %vm635_vm2, %v1331_v48 }
 0x81b   : > { %3196 = vmatprep.mubr.msk.f32.mxu0 %vm3576_vm1, %v3577_v34  ;;  %3449 = vmatpush3.bf16.msra.mxu0 %v3448_v44 }
 0x81c   : > { %3450 = vmatprep.subr.bf16.mxu0 %v3575_v26 }
 0x81d   : > { %v1336_v51 = vpop.f32.mrb[26].mxu1 }
 0x81e   : > { %v3187_v52 = vpop.f32.mrb[27].mxu1  ;;  %3197 = vmatmul.mubr.msk.f32.gmra.mrb[32].mxu0 %vm635_vm2, %v1336_v51 }
 0x81f   : > { %3199 = vmatprep.mubr.msk.f32.mxu0 %vm3576_vm1, %v3577_v34  ;;  %3452 = vmatpush3.bf16.msra.mxu0 %v3451_v50 }
 0x820   : > { %3459 = vmatprep.subr.bf16.mxu0 %v3575_v26 }
 0x821   : > { %v1341_v58 = vpop.f32.mrb[28].mxu1 }
 0x822   : > { %v3190_v54 = vpop.f32.mrb[29].mxu1  ;;  %3200 = vmatmul.mubr.msk.f32.gmra.mrb[34].mxu0 %vm635_vm2, %v1341_v58 }
 0x823   : > { %3221 = vmatprep.mubr.msk.f32.mxu0 %vm3576_vm1, %v3577_v34 }
 0x825   : > { %v1511_v1 = vpop.f32.mrb[30].mxu1 }
 0x826   : > { %v3206_v57 = vpop.f32.mrb[31].mxu1  ;;  %3222 = vmatmul.mubr.msk.f32.vlgmr.msra.gmra.mrb[36].mxu0 %vm311_vm0, %v3701_v53 }
 0x827   : > { %3224 = vmatprep.mubr.msk.f32.mxu0 %vm3576_vm1, %v3577_v34  ;;  %3461 = vmatpush3.bf16.msra.mxu0 %v3460_v60 }
 0x828   : > { %3462 = vmatprep.subr.bf16.mxu0 %v3575_v26 }
 0x829   : > { %v1516_v3 = vpop.f32.mrb[32].mxu1 }
 0x82a   : > { %v3209_v4 = vpop.f32.mrb[33].mxu1  ;;  %3225 = vmatmul.mubr.msk.f32.gmra.mrb[38].mxu0 %vm311_vm0, %v3718_v61 }
 0x82b   : > { %3227 = vmatprep.mubr.msk.f32.mxu0 %vm3576_vm1, %v3577_v34  ;;  %3464 = vmatpush3.bf16.msra.mxu0 %v3463_v2 }
 0x82c   : > { %3469 = vmatprep.subr.bf16.mxu0 %v3575_v26 }
 0x82d   : > { %v1521_v59 = vpop.f32.mrb[34].mxu1 }
 0x82e   : > { %v3212_v5 = vpop.f32.mrb[35].mxu1  ;;  %3228 = vmatmul.mubr.msk.f32.gmra.mrb[40].mxu0 %vm311_vm0, %v3729_v63 }
 0x82f   : > { %3255 = vmatprep.mubr.msk.f32.mxu0 %vm3576_vm1, %v3577_v34 }
 0x831   : > { %v1681_v7 = vpop.f32.mrb[36].mxu1 }
 0x832   : > { %v3240_v8 = vpop.f32.mrb[37].mxu1  ;;  %3256 = vmatmul.mubr.msk.f32.vlgmr.msra.gmra.mrb[42].mxu0 %vm311_vm0, %v3701_v53 }
 0x833   : > { %3258 = vmatprep.mubr.msk.f32.mxu0 %vm3576_vm1, %v3577_v34 }
 0x835   : > { %v1686_v9 = vpop.f32.mrb[38].mxu1 }
 0x836   : > { %v3466_v10 = vpack.c.bf16 %v1686_v9, %v1681_v7  ;;  %v3243_v11 = vpop.f32.mrb[39].mxu1  ;;  %3259 = vmatmul.mubr.msk.f32.gmra.mrb[44].mxu0 %vm311_vm0, %v3718_v61  ;;  %v2840_v9 = vld [vmem:[%s4235_s6 + $0x10] sm:$0xff] }
 0x837   : > { %3261 = vmatprep.mubr.msk.f32.mxu0 %vm3576_vm1, %v3577_v34 }
 0x838   : > { %3468 = vmatpush3.bf16.xpose.msk.msra.mxu1 %vm3754_vm3, %v3466_v10 }
 0x839   : > { %v1691_v12 = vpop.f32.mrb[40].mxu1  ;;  %3268 = vmatprep.subr.mxu1 %v3577_v34 }
 0x83a   : > { %v3246_v13 = vpop.f32.mrb[41].mxu1  ;;  %3262 = vmatmul.mubr.msk.f32.gmra.mrb[46].mxu0 %vm311_vm0, %v3729_v63 }
 0x83b   : > { %3285 = vmatprep.mubr.msk.f32.mxu0 %vm3576_vm1, %v3577_v34  ;;  %v2844_v13 = vld [vmem:[%s4232_s3 + $0x60] sm:$0xff] }
 0x840   : > { %3269 = vmatpush3.xpose.msk.msra.mxu1 %vm635_vm2, %v1691_v12 }
 0x841   : > { %3294 = vmatprep.subr.mxu1 %v3577_v34 }
 0x8ed   : > { %v1422_v14 = vpop.f32.mrb[30].mxu0 }
 0x8ee   : > { %v4033_v15 = vadd.f32 %v1511_v1, %v1422_v14  ;;  %v3195_v16 = vpop.f32.mrb[31].mxu0  ;;  %v2845_v14 = vld [vmem:[%s4232_s3 + $0x68] sm:$0xff] }
 0x8f1   : > { %v1427_v17 = vpop.f32.mrb[32].mxu0 }
 0x8f2   : > { %v4035_v18 = vadd.f32 %v1516_v3, %v1427_v17  ;;  %v3198_v19 = vpop.f32.mrb[33].mxu0  ;;  %v3473_v17 = vpack.c.bf16 %v2845_v14, %v2844_v13 }
 0x8f5   : > { %v1432_v20 = vpop.f32.mrb[34].mxu0 }
 0x8f6   : > { %v4037_v21 = vadd.f32 %v1521_v59, %v1432_v20  ;;  %v3201_v22 = vpop.f32.mrb[35].mxu0  ;;  %v2846_v20 = vld [vmem:[%s4232_s3 + $0x70] sm:$0xff] }
 0x8f7   : > { %v2847_v22 = vld [vmem:[%s4232_s3 + $0x78] sm:$0xff] }
 0x8f9   : > { %v1596_v23 = vpop.f32.mrb[36].mxu0 }
 0x8fa   : > { %v3223_v24 = vpop.f32.mrb[37].mxu0  ;;  %3271 = vmatmul.mubr.msk.f32.vlgmr.msra.gmra.mrb[42].mxu1 %vm635_vm2, %v1596_v23 }
 0x8fb   : > { %3273 = vmatprep.mubr.msk.f32.mxu1 %vm3576_vm1, %v3577_v34  ;;  %3295 = vmatpush3.msra.mxu1 %v2840_v9  ;;  %v3476_v24 = vpack.c.bf16 %v2847_v22, %v2846_v20 }
 0x8fc   : > { %3478 = vmatprep.subr.bf16.mxu1 %v3575_v26 }
 0x8fd   : > { %v1601_v25 = vpop.f32.mrb[38].mxu0 }
 0x8fe   : > { %v3226_v27 = vpop.f32.mrb[39].mxu0  ;;  %3274 = vmatmul.mubr.msk.f32.gmra.mrb[44].mxu1 %vm635_vm2, %v1601_v25 }
 0x8ff   : > { %3276 = vmatprep.mubr.msk.f32.mxu1 %vm3576_vm1, %v3577_v34 }
 0x901   : > { %v1606_v28 = vpop.f32.mrb[40].mxu0 }
 0x902   : > { %v3229_v29 = vpop.f32.mrb[41].mxu0  ;;  %3277 = vmatmul.mubr.msk.f32.gmra.mrb[46].mxu1 %vm635_vm2, %v1606_v28 }
 0x903   : > { %3296 = vmatprep.mubr.msk.f32.mxu1 %vm3576_vm1, %v3577_v34  ;;  %v2858_v29 = vld [vmem:[%s4234_s5 + $0x60] sm:$0xff] }
 0x905   : > { %v1766_v30 = vpop.f32.mrb[42].mxu0 }
 0x906   : > { %v3257_v31 = vpop.f32.mrb[43].mxu0 }
 0x909   : > { %v1771_v32 = vpop.f32.mrb[44].mxu0 }
 0x90a   : > { %v3470_v33 = vpack.c.bf16 %v1771_v32, %v1766_v30  ;;  %v3260_v35 = vpop.f32.mrb[45].mxu0  ;;  %v2859_v30 = vld [vmem:[%s4234_s5 + $0x68] sm:$0xff]  ;;  %v2860_v32 = vld [vmem:[%s4234_s5 + $0x70] sm:$0xff] }
 0x90b   : > { %v3485_v31 = vpack.c.bf16 %v2859_v30, %v2858_v29 }
 0x90c   : > { %3471 = vmatpush3.bf16.msra.mxu0 %v3470_v33  ;;  %v2861_v33 = vld [vmem:[%s4234_s5 + $0x78] sm:$0xff] }
 0x90d   : > { %v1776_v36 = vpop.f32.mrb[46].mxu0  ;;  %3283 = vmatprep.subr.mxu0 %v3577_v34  ;;  %v3488_v35 = vpack.c.bf16 %v2861_v33, %v2860_v32 }
 0x90e   : > { %v3263_v37 = vpop.f32.mrb[47].mxu0 }
 0x90f   : > { %v2852_v37 = vld [vmem:[%s4233_s4 + $0x68] sm:$0xff] }
 0x910   : > { %3284 = vmatpush3.msra.mxu0 %v1776_v36  ;;  %v2851_v36 = vld [vmem:[%s4233_s4 + $0x60] sm:$0xff] }
 0x911   : > { %3472 = vmatprep.subr.bf16.mxu0 %v3575_v26 }
 0x9cd   : > { %v1864_v38 = vpop.f32.mrb[42].mxu1 }
 0x9ce   : > { %v1878_v41 = vmul.f32 0.35355338, %v1864_v38  ;;  %v3272_v43 = vpop.f32.mrb[43].mxu1  ;;  %v3479_v38 = vpack.c.bf16 %v2852_v37, %v2851_v36 }
 0x9cf   : > { %v2854_v43 = vld [vmem:[%s4233_s4 + $0x78] sm:$0xff] }
 0x9d0   : > { %v1881_v45 = vadd.f32 %v1878_v41, %v3826_v39  ;;  %v2853_v41 = vld [vmem:[%s4233_s4 + $0x70] sm:$0xff] }
 0x9d1   : > { %v1869_v40 = vpop.f32.mrb[44].mxu1 }
 0x9d2   : > { %v1879_v42 = vmul.f32 0.35355338, %v1869_v40  ;;  %v3275_v44 = vpop.f32.mrb[45].mxu1  ;;  %v1884_v46 = vsel %vm740_vm5, %v1881_v45, -inf }
 0x9d3   : > { %1885 = vmax.xlane.f32.xlu0 %v1884_v46 }
 0x9d4   : > { %v1882_v47 = vadd.f32 %v1879_v42, %v3826_v39  ;;  %v3482_v42 = vpack.c.bf16 %v2854_v43, %v2853_v41 }
 0x9d5   : > { %v1874_v48 = vpop.f32.mrb[46].mxu1 }
 0x9d6   : > { %v1880_v49 = vmul.f32 0.35355338, %v1874_v48  ;;  %v3278_v50 = vpop.f32.mrb[47].mxu1  ;;  %v1887_v51 = vsel %vm740_vm5, %v1882_v47, -inf }
 0x9d7   : > { %1888 = vmax.xlane.f32.xlu1 %v1887_v51 }
 0x9d8   : > { %v1883_v52 = vadd.f32 %v1880_v49, %v3826_v39 }
 0x9da   : > { %v1890_v55 = vsel %vm740_vm5, %v1883_v52, -inf }
 0x9db   : > { %1891 = vmax.xlane.f32.xlu0 %v1890_v55 }
 0xa60   : > { %v1886_v56 = vpop.xlane.xlu0 %1885 }
 0xa61   : > { %v1893_v58 = vsub.f32 %v1881_v45, %v1886_v56 }
 0xa63   : > { %v1896_v54 = vmul.f32 1.442695, %v1893_v58 }
 0xa64   : > { %v1889_v60 = vpop.xlane.xlu1 %1888 }
 0xa65   : > { %3540 = vpow2.f32 %v1896_v54  ;;  %v1894_v62 = vsub.f32 %v1882_v47, %v1889_v60 }
 0xa67   : > { %v1898_v0 = vmul.f32 1.442695, %v1894_v62 }
 0xa68   : > { %v1892_v1 = vpop.xlane.xlu0 %1891 }
 0xa69   : > { %3542 = vpow2.f32 %v1898_v0  ;;  %v1895_v57 = vsub.f32 %v1883_v52, %v1892_v1 }
 0xa6b   : > { %v1900_v2 = vmul.f32 1.442695, %v1895_v57 }
 0xa6d   : > { %3544 = vpow2.f32 %v1900_v2 }
 0xa6f   : > { %v3541_v3 = vpop.eup %3540 }
 0xa70   : > { %v1902_v4 = vsel %vm740_vm5, %v3541_v3, 0.0 }
 0xa71   : > { %1903 = vadd.xlane.f32.xlu1 %v1902_v4 }
 0xa73   : > { %v3543_v59 = vpop.eup %3542 }
 0xa74   : > { %v1905_v5 = vsel %vm740_vm5, %v3543_v59, 0.0 }
 0xa75   : > { %1906 = vadd.xlane.f32.xlu0 %v1905_v5 }
 0xa77   : > { %v3545_v7 = vpop.eup %3544 }
 0xa78   : > { %v1908_v8 = vsel %vm740_vm5, %v3545_v7, 0.0 }
 0xa79   : > { %1909 = vadd.xlane.f32.xlu1 %v1908_v8 }
 0xafe   : > { %v1904_v10 = vpop.xlane.xlu1 %1903 }
 0xaff   : > { %3546 = vrcp.f32 %v1904_v10 }
 0xb02   : > { %v1907_v11 = vpop.xlane.xlu0 %1906 }
 0xb03   : > { %3548 = vrcp.f32 %v1907_v11 }
 0xb06   : > { %v1910_v12 = vpop.xlane.xlu1 %1909 }
 0xb07   : > { %3550 = vrcp.f32 %v1910_v12 }
 0xb09   : > { %v3547_v16 = vpop.eup %3546 }
 0xb0a   : > { %v1914_v19 = vmul.f32 %v3547_v16, %v3541_v3 }
 0xb0c   : > { %3286 = vmatmul.mubr.msk.f32.vlgmr.msra.gmra.mrb[48].mxu0 %vm740_vm5, %v1914_v19 }
 0xb0d   : > { %v3549_v23 = vpop.eup %3548  ;;  %3288 = vmatprep.mubr.msk.f32.mxu0 %vm3576_vm1, %v3577_v34  ;;  %3474 = vmatpush3.bf16.msra.mxu0 %v3473_v17 }
 0xb0e   : > { %v1915_v25 = vmul.f32 %v3549_v23, %v3543_v59  ;;  %3475 = vmatprep.subr.bf16.mxu0 %v3575_v26 }
 0xb10   : > { %3289 = vmatmul.mubr.msk.f32.gmra.mrb[50].mxu0 %vm740_vm5, %v1915_v25 }
 0xb11   : > { %v3551_v27 = vpop.eup %3550  ;;  %3291 = vmatprep.mubr.msk.f32.mxu0 %vm3576_vm1, %v3577_v34  ;;  %3477 = vmatpush3.bf16.msra.mxu0 %v3476_v24 }
 0xb12   : > { %v1916_v28 = vmul.f32 %v3551_v27, %v3545_v7  ;;  %3484 = vmatprep.subr.bf16.mxu0 %v3575_v26 }
 0xb14   : > { %3292 = vmatmul.mubr.msk.f32.gmra.mrb[52].mxu0 %vm740_vm5, %v1916_v28 }
 0xb15   : > { %3313 = vmatprep.mubr.msk.f32.mxu0 %vm3576_vm1, %v3577_v34 }
 0xb18   : > { %3314 = vmatmul.mubr.msk.f32.vlgmr.msra.gmra.mrb[54].mxu0 %vm311_vm0, %v3701_v53 }
 0xb19   : > { %3316 = vmatprep.mubr.msk.f32.mxu0 %vm3576_vm1, %v3577_v34  ;;  %3486 = vmatpush3.bf16.msra.mxu0 %v3485_v31 }
 0xb1a   : > { %3487 = vmatprep.subr.bf16.mxu0 %v3575_v26 }
 0xb1c   : > { %3317 = vmatmul.mubr.msk.f32.gmra.mrb[56].mxu0 %vm311_vm0, %v3718_v61 }
 0xb1d   : > { %3319 = vmatprep.mubr.msk.f32.mxu0 %vm3576_vm1, %v3577_v34  ;;  %3489 = vmatpush3.bf16.msra.mxu0 %v3488_v35 }
 0xb1e   : > { %3494 = vmatprep.subr.bf16.mxu0 %v3575_v26 }
 0xb20   : > { %3320 = vmatmul.mubr.msk.f32.gmra.mrb[58].mxu0 %vm311_vm0, %v3729_v63 }
 0xb21   : > { %3347 = vmatprep.mubr.msk.f32.mxu0 %vm3576_vm1, %v3577_v34 }
 0xb24   : > { %3348 = vmatmul.mubr.msk.f32.vlgmr.msra.gmra.mrb[60].mxu0 %vm311_vm0, %v3701_v53 }
 0xb25   : > { %3350 = vmatprep.mubr.msk.f32.mxu0 %vm3576_vm1, %v3577_v34 }
 0xb28   : > { %3351 = vmatmul.mubr.msk.f32.gmra.mrb[62].mxu0 %vm311_vm0, %v3718_v61 }
 0xb29   : > { %3353 = vmatprep.mubr.msk.f32.mxu0 %vm3576_vm1, %v3577_v34 }
 0xb2c   : > { %3354 = vmatmul.mubr.msk.f32.gmra.mrb[64].mxu0 %vm311_vm0, %v3729_v63 }
 0xb2d   : > { %3377 = vmatprep.mubr.msk.f32.mxu0 %vm3576_vm1, %v3577_v34 }
 0xbdf   : > { %v1992_v45 = vpop.f32.mrb[48].mxu0 }
 0xbe0   : > { %v3287_v40 = vpop.f32.mrb[49].mxu0  ;;  %3297 = vmatmul.mubr.msk.f32.vlgmr.msra.gmra.mrb[48].mxu1 %vm635_vm2, %v1992_v45 }
 0xbe1   : > { %3299 = vmatprep.mubr.msk.f32.mxu1 %vm3576_vm1, %v3577_v34  ;;  %3480 = vmatpush3.bf16.msra.mxu1 %v3479_v38 }
 0xbe2   : > { %3481 = vmatprep.subr.bf16.mxu1 %v3575_v26 }
 0xbe3   : > { %v1997_v44 = vpop.f32.mrb[50].mxu0 }
 0xbe4   : > { %v3290_v46 = vpop.f32.mrb[51].mxu0  ;;  %3300 = vmatmul.mubr.msk.f32.gmra.mrb[50].mxu1 %vm635_vm2, %v1997_v44  ;;  %v2874_v44 = vld [vmem:[%s4235_s6 + $0x18] sm:$0xff] }
 0xbe5   : > { %3302 = vmatprep.mubr.msk.f32.mxu1 %vm3576_vm1, %v3577_v34  ;;  %3483 = vmatpush3.bf16.msra.mxu1 %v3482_v42 }
 0xbe6   : > { %3490 = vmatprep.subr.bf16.mxu1 %v3575_v26 }
 0xbe7   : > { %v2002_v47 = vpop.f32.mrb[52].mxu0 }
 0xbe8   : > { %v3293_v48 = vpop.f32.mrb[53].mxu0  ;;  %3303 = vmatmul.mubr.msk.f32.gmra.mrb[52].mxu1 %vm635_vm2, %v2002_v47 }
 0xbe9   : > { %3330 = vmatprep.mubr.msk.f32.mxu1 %vm3576_vm1, %v3577_v34 }
 0xbeb   : > { %v2171_v49 = vpop.f32.mrb[54].mxu0 }
 0xbec   : > { %v3315_v50 = vpop.f32.mrb[55].mxu0  ;;  %3331 = vmatmul.mubr.msk.f32.vlgmr.msra.gmra.mrb[54].mxu1 %vm311_vm0, %v3701_v53 }
 0xbed   : > { %3333 = vmatprep.mubr.msk.f32.mxu1 %vm3576_vm1, %v3577_v34 }
 0xbef   : > { %v2176_v51 = vpop.f32.mrb[56].mxu0 }
 0xbf0   : > { %v3318_v52 = vpop.f32.mrb[57].mxu0  ;;  %3334 = vmatmul.mubr.msk.f32.gmra.mrb[56].mxu1 %vm311_vm0, %v3718_v61 }
 0xbf1   : > { %3336 = vmatprep.mubr.msk.f32.mxu1 %vm3576_vm1, %v3577_v34 }
 0xbf3   : > { %v2181_v26 = vpop.f32.mrb[58].mxu0 }
 0xbf4   : > { %v3321_v55 = vpop.f32.mrb[59].mxu0  ;;  %3337 = vmatmul.mubr.msk.f32.gmra.mrb[58].mxu1 %vm311_vm0, %v3729_v63 }
 0xbf5   : > { %3362 = vmatprep.mubr.msk.f32.mxu1 %vm3576_vm1, %v3577_v34 }
 0xbf7   : > { %v2341_v53 = vpop.f32.mrb[60].mxu0 }
 0xbf8   : > { %v3349_v56 = vpop.f32.mrb[61].mxu0 }
 0xbfb   : > { %v2346_v58 = vpop.f32.mrb[62].mxu0 }
 0xbfc   : > { %v3495_v54 = vpack.c.bf16 %v2346_v58, %v2341_v53  ;;  %v3352_v60 = vpop.f32.mrb[63].mxu0 }
 0xbfe   : > { %3496 = vmatpush3.bf16.msra.mxu0 %v3495_v54 }
 0xbff   : > { %v2351_v62 = vpop.f32.mrb[64].mxu0  ;;  %3375 = vmatprep.subr.mxu0 %v3577_v34 }
 0xc00   : > { %v3355_v61 = vpop.f32.mrb[65].mxu0 }
 0xc02   : > { %3376 = vmatpush3.msra.mxu0 %v2351_v62 }
 0xcb3   : > { %v2083_v0 = vpop.f32.mrb[48].mxu1 }
 0xcb4   : > { %v4161_v1 = vadd.f32 %v2083_v0, %v4033_v15  ;;  %v3298_v57 = vpop.f32.mrb[49].mxu1 }
 0xcb7   : > { %v2088_v63 = vpop.f32.mrb[50].mxu1 }
 0xcb8   : > { %v4164_v2 = vadd.f32 %v2088_v63, %v4035_v18  ;;  %v3301_v3 = vpop.f32.mrb[51].mxu1  ;;  %v2878_v63 = vld [vmem:[%s4236_s7] ss:$0 sm:$0xff] }
 0xcb9   : > { %v3564_v3 = vld [vmem:[%s3640_s10] sm:$0xff] }
 0xcbb   : > { %v2093_v4 = vpop.f32.mrb[52].mxu1 }
 0xcbc   : > { %v4167_v59 = vadd.f32 %v2093_v4, %v4037_v21  ;;  %v3304_v5 = vpop.f32.mrb[53].mxu1 }
 0xcbf   : > { %v2256_v7 = vpop.f32.mrb[54].mxu1 }
 0xcc0   : > { %v3332_v8 = vpop.f32.mrb[55].mxu1 }
 0xcc3   : > { %v2261_v9 = vpop.f32.mrb[56].mxu1 }
 0xcc4   : > { %v3491_v10 = vpack.c.bf16 %v2261_v9, %v2256_v7  ;;  %v3335_v11 = vpop.f32.mrb[57].mxu1 }
 0xcc6   : > { %3493 = vmatpush3.bf16.xpose.msk.msra.mxu1 %vm3754_vm3, %v3491_v10 }
 0xcc7   : > { %v2266_v15 = vpop.f32.mrb[58].mxu1  ;;  %3360 = vmatprep.subr.mxu1 %v3577_v34 }
 0xcc8   : > { %v3338_v12 = vpop.f32.mrb[59].mxu1 }
 0xcce   : > { %3361 = vmatpush3.xpose.msk.msra.mxu1 %vm635_vm2, %v2266_v15 }
 0xccf   : > { %3386 = vmatprep.subr.mxu1 %v3577_v34 }
 0xcd1   : > { %3363 = vmatmul.mubr.msk.f32.vlgmr.msra.gmra.mrb[60].mxu1 %vm635_vm2, %v2171_v49 }
 0xcd2   : > { %3365 = vmatprep.mubr.msk.f32.mxu1 %vm3576_vm1, %v3577_v34  ;;  %3387 = vmatpush3.msra.mxu1 %v2874_v44 }
 0xcd5   : > { %3366 = vmatmul.mubr.msk.f32.gmra.mrb[62].mxu1 %vm635_vm2, %v2176_v51 }
 0xcd6   : > { %3368 = vmatprep.mubr.msk.f32.mxu1 %vm3576_vm1, %v3577_v34 }
 0xcd9   : > { %3369 = vmatmul.mubr.msk.f32.gmra.mrb[64].mxu1 %vm635_vm2, %v2181_v26 }
 0xcda   : > { %3388 = vmatprep.mubr.msk.f32.mxu1 %vm3576_vm1, %v3577_v34 }
 0xda4   : > { %v2439_v6 = vpop.f32.mrb[60].mxu1 }
 0xda5   : > { %v2453_v18 = vmul.f32 0.35355338, %v2439_v6  ;;  %v3364_v21 = vpop.f32.mrb[61].mxu1  ;;  %v3566_v6 = vld [vmem:[%s3640_s10 + $0x10] sm:$0xff] }
 0xda7   : > { %v2456_v13 = vadd.f32 %v2453_v18, %v3826_v39 }
 0xda8   : > { %v2444_v14 = vpop.f32.mrb[62].mxu1 }
 0xda9   : > { %v2454_v16 = vmul.f32 0.35355338, %v2444_v14  ;;  %v3367_v17 = vpop.f32.mrb[63].mxu1  ;;  %v2459_v19 = vsel %vm740_vm5, %v2456_v13, -inf }
 0xdaa   : > { %2460 = vmax.xlane.f32.xlu0 %v2459_v19 }
 0xdab   : > { %v2457_v20 = vadd.f32 %v2454_v16, %v3826_v39 }
 0xdac   : > { %v2449_v22 = vpop.f32.mrb[64].mxu1 }
 0xdad   : > { %v2455_v23 = vmul.f32 0.35355338, %v2449_v22  ;;  %v3370_v24 = vpop.f32.mrb[65].mxu1  ;;  %v2462_v25 = vsel %vm740_vm5, %v2457_v20, -inf }
 0xdae   : > { %2463 = vmax.xlane.f32.xlu1 %v2462_v25 }
 0xdaf   : > { %v2458_v27 = vadd.f32 %v2455_v23, %v3826_v39 }
 0xdb1   : > { %v2465_v28 = vsel %vm740_vm5, %v2458_v27, -inf }
 0xdb2   : > { %2466 = vmax.xlane.f32.xlu0 %v2465_v28 }
 0xe37   : > { %v2461_v29 = vpop.xlane.xlu0 %2460 }
 0xe38   : > { %v2468_v30 = vsub.f32 %v2456_v13, %v2461_v29 }
 0xe3a   : > { %v2471_v31 = vmul.f32 1.442695, %v2468_v30 }
 0xe3b   : > { %v2464_v32 = vpop.xlane.xlu1 %2463 }
 0xe3c   : > { %3552 = vpow2.f32 %v2471_v31  ;;  %v2469_v33 = vsub.f32 %v2457_v20, %v2464_v32 }
 0xe3e   : > { %v2473_v35 = vmul.f32 1.442695, %v2469_v33 }
 0xe3f   : > { %v2467_v36 = vpop.xlane.xlu0 %2466 }
 0xe40   : > { %3554 = vpow2.f32 %v2473_v35  ;;  %v2470_v37 = vsub.f32 %v2458_v27, %v2467_v36 }
 0xe42   : > { %v2475_v38 = vmul.f32 1.442695, %v2470_v37 }
 0xe44   : > { %3556 = vpow2.f32 %v2475_v38 }
 0xe46   : > { %v3553_v41 = vpop.eup %3552 }
 0xe47   : > { %v2477_v43 = vsel %vm740_vm5, %v3553_v41, 0.0 }
 0xe48   : > { %2478 = vadd.xlane.f32.xlu1 %v2477_v43 }
 0xe4a   : > { %v3555_v39 = vpop.eup %3554 }
 0xe4b   : > { %v2480_v45 = vsel %vm740_vm5, %v3555_v39, 0.0 }
 0xe4c   : > { %2481 = vadd.xlane.f32.xlu0 %v2480_v45 }
 0xe4e   : > { %v3557_v40 = vpop.eup %3556 }
 0xe4f   : > { %v2483_v42 = vsel %vm740_vm5, %v3557_v40, 0.0 }
 0xe50   : > { %2484 = vadd.xlane.f32.xlu1 %v2483_v42 }
 0xed5   : > { %v2479_v46 = vpop.xlane.xlu1 %2478 }
 0xed6   : > { %3558 = vrcp.f32 %v2479_v46 }
 0xed9   : > { %v2482_v47 = vpop.xlane.xlu0 %2481 }
 0xeda   : > { %3560 = vrcp.f32 %v2482_v47 }
 0xedd   : > { %v2485_v48 = vpop.xlane.xlu1 %2484 }
 0xede   : > { %3562 = vrcp.f32 %v2485_v48 }
 0xee0   : > { %v3559_v49 = vpop.eup %3558 }
 0xee1   : > { %v2489_v50 = vmul.f32 %v3559_v49, %v3553_v41 }
 0xee3   : > { %3378 = vmatmul.mubr.msk.f32.vlgmr.msra.gmra.mrb[66].mxu0 %vm740_vm5, %v2489_v50 }
 0xee4   : > { %v3561_v51 = vpop.eup %3560  ;;  %3380 = vmatprep.mubr.msk.f32.mxu0 %vm3576_vm1, %v3577_v34 }
 0xee5   : > { %v2490_v52 = vmul.f32 %v3561_v51, %v3555_v39 }
 0xee7   : > { %3381 = vmatmul.mubr.msk.f32.gmra.mrb[68].mxu0 %vm740_vm5, %v2490_v52 }
 0xee8   : > { %v3563_v26 = vpop.eup %3562  ;;  %3383 = vmatprep.mubr.msk.f32.mxu0 %vm3576_vm1, %v3577_v34 }
 0xee9   : > { %v2491_v55 = vmul.f32 %v3563_v26, %v3557_v40 }
 0xeeb   : > { %3384 = vmatmul.mubr.msk.f32.gmra.mrb[70].mxu0 %vm740_vm5, %v2491_v55 }
 0xfb6   : > { %v2567_v53 = vpop.f32.mrb[66].mxu0 }
 0xfb7   : > { %v3379_v56 = vpop.f32.mrb[67].mxu0  ;;  %3389 = vmatmul.mubr.msk.f32.vlgmr.msra.gmra.mrb[66].mxu1 %vm635_vm2, %v2567_v53 }
 0xfb8   : > { %3391 = vmatprep.mubr.msk.f32.mxu1 %vm3576_vm1, %v3577_v34 }
 0xfba   : > { %v2572_v58 = vpop.f32.mrb[68].mxu0 }
 0xfbb   : > { %v3382_v54 = vpop.f32.mrb[69].mxu0  ;;  %3392 = vmatmul.mubr.msk.f32.gmra.mrb[68].mxu1 %vm635_vm2, %v2572_v58 }
 0xfbc   : > { %3394 = vmatprep.mubr.msk.f32.mxu1 %vm3576_vm1, %v3577_v34 }
 0xfbe   : > { %v2577_v60 = vpop.f32.mrb[70].mxu0 }
 0xfbf   : > { %v3385_v62 = vpop.f32.mrb[71].mxu0  ;;  %3395 = vmatmul.mubr.msk.f32.gmra.mrb[70].mxu1 %vm635_vm2, %v2577_v60 }
0x108a   : > { %v2658_v61 = vpop.f32.mrb[66].mxu1 }
0x108b   : > { %v2672_v0 = vadd.f32 %v2658_v61, %v4161_v1  ;;  %v3390_v57 = vpop.f32.mrb[67].mxu1  ;;  %v3565_v1 = vld [vmem:[%s3640_s10 + $0x8] sm:$0xff] }
0x108d   : > { %v2675_v4 = vadd.f32 %v3564_v3, %v2672_v0 }
0x108e   : > { %v2663_v34 = vpop.f32.mrb[68].mxu1 }
0x108f   : > { %v2685_v5 = vadd.f32 %v2878_v63, %v2675_v4  ;;  %v2673_v7 = vadd.f32 %v2663_v34, %v4164_v2  ;;  %v3393_v8 = vpop.f32.mrb[69].mxu1 }
0x1091   : > { %2688 = vst.msk [vmem:[%s305_s15] sm:$0xff] %vm311_vm0, %v2685_v5  ;;  %v2676_v9 = vadd.f32 %v3565_v1, %v2673_v7 }
0x1092   : > { %v2668_v10 = vpop.f32.mrb[70].mxu1 }
0x1093   : > { %v2686_v11 = vadd.f32 %v2878_v63, %v2676_v9  ;;  %v2674_v15 = vadd.f32 %v2668_v10, %v4167_v59  ;;  %v3396_v12 = vpop.f32.mrb[71].mxu1 }
0x1095   : > { %2689 = vst.msk [vmem:[%s305_s15 + $0x8] sm:$0xff] %vm311_vm0, %v2686_v11  ;;  %v2677_v18 = vadd.f32 %v3566_v6, %v2674_v15 }
0x1097   : > { %v2687_v21 = vadd.f32 %v2878_v63, %v2677_v18 }
0x1099   : > { %2690 = vst.msk [vmem:[%s305_s15 + $0x10] sm:$0xff] %vm311_vm0, %v2687_v21 }
0x109a PF: > { %s18_s27 = sadd.s32 1, %s3573_s27  }
0x109b   : > { %p15_p4 = scmp.ge.s32.totalorder %s18_s27, 4  }
0x109d   :  { %17 = sbr.rel (!%p15_p4) target bundleno = 1 (0x1), region = 94 }

</bundles_post_ra>
